<compile_context>
chip_gen: v6e
topology: v6e:2x2x1
jax: 0.10.0
libtpu: 0.0.40
codegen_flags: <defaults>
</compile_context>

<pallas_src>
import functools

import jax
import jax.numpy as jnp
from jax.experimental import pallas as pl
from jax.experimental.pallas import tpu as pltpu


_MATMUL_DTYPE = jnp.bfloat16   # MXU input dtype (f32 accumulation everywhere)

_PARAM_ORDER = (
    'w_sqkv', 'b_sqkv', 'w_so', 'b_so', 'g1', 'be1',               # self-attn
    'w_cq', 'b_cq', 'w_ckv', 'b_ckv', 'w_co', 'b_co', 'g2', 'be2',  # cross-attn
    'w_f1', 'b_f1', 'w_f2', 'b_f2', 'g3', 'be3',                    # feed-forward
)


# ---------------------------------------------------------------------------
# Fused decoder-stack kernel: one layer-grid step == one DecBlock
# ---------------------------------------------------------------------------
def _decoder_kernel(q_ref, k_ref, qm_ref, km_ref,
                    w_sqkv, b_sqkv, w_so, b_so, g1, be1,
                    w_cq, b_cq, w_ckv, b_ckv, w_co, b_co, g2, be2,
                    w_f1, b_f1, w_f2, b_f2, g3, be3,
                    out_ref, q_acc,
                    *, head_num, head_dims, Bb, Lq, Lk):
    layer = pl.program_id(1)
    H, Hd = head_num, head_dims
    Hid = H * Hd
    D = q_ref.shape[-1]

    # Initialize the resident activation from the input on the first layer of
    # each batch block (layers are the innermost / fastest grid axis).
    @pl.when(layer == 0)
    def _():
        q_acc[...] = q_ref[...].astype(jnp.float32).reshape(Bb * Lq, D)

    x = q_acc[...]                                        # (Bb*Lq, D)  f32
    qm = qm_ref[...].reshape(Bb * Lq, 1)                  # query-pad multiplier
    key2 = k_ref[...].reshape(Bb * Lk, -1)                # (Bb*Lk, Dk)  bf16

    # In-kernel attention masks (finite large negative; no HBM-resident bias).
    neg = jnp.float32(-1e30)
    causal = (jax.lax.broadcasted_iota(jnp.int32, (Lq, Lq), 1)
              > jax.lax.broadcasted_iota(jnp.int32, (Lq, Lq), 0))
    self_mask = ((qm_ref[...].reshape(Bb, 1, Lq) == 0)
                 | causal[None, :, :])                    # (Bb, Lq, Lq) bool
    cross_mask = (km_ref[...] == 0)                       # (Bb, 1,  Lk) bool

    def mm(a, w_ref, b_ref):
        # per-position linear: (N, in) @ (in, out) + (1, out); bf16 MXU, f32 acc
        return (jnp.dot(a.astype(_MATMUL_DTYPE), w_ref[0],
                        preferred_element_type=jnp.float32)
                + b_ref[0])

    def layer_norm(z, g_ref, b_ref):
        mean = jnp.mean(z, axis=-1, keepdims=True)
        var = jnp.mean(jnp.square(z - mean), axis=-1, keepdims=True)
        return (z - mean) * jax.lax.rsqrt(var + 1e-5) * g_ref[0] + b_ref[0]

    def attend(qp, kp, vp, mask, lk):
        # qp: (Bb*Lq, Hid), kp/vp: (Bb*lk, Hid); 1/sqrt(Hd) already folded into
        # the Q projection.  Per-head 3-D einsums (single batch dim) keep the
        # lowering on the well-trodden flash-attention path.
        q3 = qp.reshape(Bb, Lq, Hid)
        k3 = kp.reshape(Bb, lk, Hid)
        v3 = vp.reshape(Bb, lk, Hid)
        ctx_heads = []
        for h in range(H):                                # static unroll, H small
            sl = slice(h * Hd, (h + 1) * Hd)
            s = jnp.einsum('bqd,bkd->bqk',
                           q3[:, :, sl].astype(_MATMUL_DTYPE),
                           k3[:, :, sl].astype(_MATMUL_DTYPE),
                           preferred_element_type=jnp.float32)   # (Bb, Lq, lk)
            s = jnp.where(mask, neg, s)
            m = jnp.max(s, axis=-1, keepdims=True)
            e = jnp.exp(s - m)
            z = jnp.sum(e, axis=-1, keepdims=True)
            p = e * pl.reciprocal(z, approx=True)
            ctx_heads.append(
                jnp.einsum('bqk,bkd->bqd', p.astype(_MATMUL_DTYPE),
                           v3[:, :, sl].astype(_MATMUL_DTYPE),
                           preferred_element_type=jnp.float32))  # (Bb, Lq, Hd)
        ctx = jnp.concatenate(ctx_heads, axis=-1)                # (Bb, Lq, Hid)
        return ctx.reshape(Bb * Lq, Hid)

    # ---- masked causal self-attention + residual + LayerNorm --------------
    qkv = mm(x, w_sqkv, b_sqkv)                                  # (Bb*Lq, 3*Hid)
    ctx = attend(qkv[:, :Hid], qkv[:, Hid:2 * Hid], qkv[:, 2 * Hid:],
                 self_mask, Lq)
    att = mm(ctx, w_so, b_so) * qm
    x = layer_norm(x + att, g1, be1)

    # ---- cross-attention + residual + LayerNorm ----------------------------
    qp = mm(x, w_cq, b_cq)                                       # (Bb*Lq, Hid)
    kv = mm(key2, w_ckv, b_ckv)                                  # (Bb*Lk, 2*Hid)
    ctx = attend(qp, kv[:, :Hid], kv[:, Hid:], cross_mask, Lk)
    att = mm(ctx, w_co, b_co) * qm
    x = layer_norm(x + att, g2, be2)

    # ---- feed-forward (LeakyReLU 0.01) + residual + LayerNorm ---------------
    h = mm(x, w_f1, b_f1)
    h = jnp.where(h > 0, h, jnp.float32(0.01) * h)
    y = mm(h, w_f2, b_f2) * qm
    x = layer_norm(x + y, g3, be3)

    q_acc[...] = x

    @pl.when(layer == pl.num_programs(1) - 1)
    def _():
        out_ref[...] = x.astype(out_ref.dtype)                   # lane-dense slab


# ---------------------------------------------------------------------------
# pallas_call wrapper (whole decoder stack in one call)
# ---------------------------------------------------------------------------
def tran_dec_forward(params, query, key, query_mask=None, key_mask=None,
                     *, head_num, head_dims, batch_block=1):
    flag = query_mask is None
    if query_mask is None:
        # TODO(synk): PyTorch truncates to the data-dependent batch-max length;
        # keeping full length with the padding mask is mathematically equivalent.
        query_mask = jnp.sign(jnp.sum(jnp.abs(query), axis=-1))
    if key_mask is None:
        key_mask = jnp.sign(jnp.sum(jnp.abs(key), axis=-1))

    B, Lq, Dq = query.shape
    Lk = key.shape[1]
    layer_num = params['w_sqkv'].shape[0]
    ff_hid = params['w_f1'].shape[-1]

    batch_block = max(1, min(int(batch_block), B))
    while B % batch_block:
        batch_block -= 1
    nb = B // batch_block

    qm3 = query_mask.astype(jnp.float32)[:, :, None]       # (B, Lq, 1)
    km3 = key_mask.astype(jnp.float32)[:, None, :]         # (B, 1,  Lk)
    key_bf = key.astype(_MATMUL_DTYPE)                     # cast once, host-side

    inputs = (query, key_bf, qm3, km3) + tuple(params[k] for k in _PARAM_ORDER)

    def batch_spec(shape):
        nd = len(shape)
        return pl.BlockSpec((batch_block,) + tuple(shape[1:]),
                            lambda b, l, _nd=nd: (b,) + (0,) * (_nd - 1))

    def layer_spec(shape):
        nd = len(shape)
        return pl.BlockSpec((1,) + tuple(shape[1:]),
                            lambda b, l, _nd=nd: (l,) + (0,) * (_nd - 1))

    in_specs = ([batch_spec(query.shape), batch_spec(key_bf.shape),
                 batch_spec(qm3.shape), batch_spec(km3.shape)]
                + [layer_spec(params[k].shape) for k in _PARAM_ORDER])

    out_specs = pl.BlockSpec((batch_block * Lq, Dq), lambda b, l: (b, 0))

    # Explicit VMEM budget: 2x (double-buffered) per-layer weights + activation
    # blocks + resident activation scratch + softmax / FF temporaries, with
    # headroom; clamped to physical limits.
    def nbytes(a):
        return int(a.size) * a.dtype.itemsize
    per_layer_w = sum(nbytes(params[k]) for k in _PARAM_ORDER) // layer_num
    act = (nbytes(query) + nbytes(key_bf) + nbytes(qm3) + nbytes(km3)) // nb
    lmax = max(Lq, Lk)
    tmp = 4 * batch_block * head_num * Lq * lmax * 4
    tmp += 2 * batch_block * Lq * max(ff_hid, 3 * head_num * head_dims) * 4
    q_acc_bytes = batch_block * Lq * Dq * 4
    out_bytes = batch_block * Lq * Dq * query.dtype.itemsize
    vmem_limit = int(1.5 * (2 * per_layer_w + 2 * act + 2 * out_bytes
                            + q_acc_bytes + tmp)) + (8 << 20)
    vmem_limit = max(32 << 20, min(vmem_limit, 128 << 20))

    kernel = functools.partial(_decoder_kernel, head_num=head_num,
                               head_dims=head_dims, Bb=batch_block,
                               Lq=Lq, Lk=Lk)

    out = pl.pallas_call(
        kernel,
        out_shape=jax.ShapeDtypeStruct((B * Lq, Dq), query.dtype),
        grid=(nb, layer_num),
        in_specs=in_specs,
        out_specs=out_specs,
        scratch_shapes=[pltpu.VMEM((batch_block * Lq, Dq), jnp.float32)],
        compiler_params=pltpu.CompilerParams(
            dimension_semantics=("parallel", "arbitrary"),
            vmem_limit_bytes=vmem_limit),
    )(*inputs)

    out = out.reshape(B, Lq, Dq)
    if flag:
        out = out * query_mask[:, :, None]
    return out


# ---------------------------------------------------------------------------
# Parameter init (deterministic, synthetic): stacked along a layer axis,
# pre-transposed to (in, out), QKV / KV projections concatenated, matmul
# weights stored in bf16, attention scale folded into the Q projections.
# ---------------------------------------------------------------------------
def init_params(rng, query_dims, key_dims, head_num, head_dims, ff_hid, layer_num):
    hid = head_num * head_dims
    scale = float(head_dims) ** -0.5

    def dense(k, in_d, out_d):
        k1, k2 = jax.random.split(k)
        s = 1.0 / float(in_d) ** 0.5
        w = jax.random.uniform(k1, (in_d, out_d), jnp.float32, -s, s)
        b = jax.random.uniform(k2, (1, out_d), jnp.float32, -s, s)
        return w, b

    layers = []
    for _ in range(layer_num):
        rng, *ks = jax.random.split(rng, 11)
        wq, bq = dense(ks[0], query_dims, hid)
        wk, bk = dense(ks[1], query_dims, hid)
        wv, bv = dense(ks[2], query_dims, hid)
        wso, bso = dense(ks[3], hid, query_dims)
        wcq, bcq = dense(ks[4], query_dims, hid)
        wck, bck = dense(ks[5], key_dims, hid)
        wcv, bcv = dense(ks[6], key_dims, hid)
        wco, bco = dense(ks[7], hid, query_dims)
        wf1, bf1 = dense(ks[8], query_dims, ff_hid)
        wf2, bf2 = dense(ks[9], ff_hid, query_dims)
        ones = jnp.ones((1, query_dims), jnp.float32)
        zeros = jnp.zeros((1, query_dims), jnp.float32)
        # fold the 1/sqrt(head_dims) attention scale into the Q projections
        wq, bq = wq * scale, bq * scale
        wcq, bcq = wcq * scale, bcq * scale
        layers.append(dict(
            w_sqkv=jnp.concatenate([wq, wk, wv], axis=1).astype(_MATMUL_DTYPE),
            b_sqkv=jnp.concatenate([bq, bk, bv], axis=1),
            w_so=wso.astype(_MATMUL_DTYPE), b_so=bso, g1=ones, be1=zeros,
            w_cq=wcq.astype(_MATMUL_DTYPE), b_cq=bcq,
            w_ckv=jnp.concatenate([wck, wcv], axis=1).astype(_MATMUL_DTYPE),
            b_ckv=jnp.concatenate([bck, bcv], axis=1),
            w_co=wco.astype(_MATMUL_DTYPE), b_co=bco, g2=ones, be2=zeros,
            w_f1=wf1.astype(_MATMUL_DTYPE), b_f1=bf1,
            w_f2=wf2.astype(_MATMUL_DTYPE), b_f2=bf2, g3=ones, be3=zeros,
        ))
    return {k: jnp.stack([lp[k] for lp in layers], axis=0) for k in layers[0]}


if __name__ == "__main__":
    B, Lq, Lk = 2, 8, 8
    Dq = Dk = 32
    H, Hd = 4, 8          # head_num, head_dims (hid_dims = 32 = query_dims)
    FF_HID = 64
    LAYERS = 2

    root = jax.random.PRNGKey(0)
    k_q, k_k, k_p = jax.random.split(root, 3)
    query = jax.random.normal(k_q, (B, Lq, Dq), jnp.float32)
    key_seq = jax.random.normal(k_k, (B, Lk, Dk), jnp.float32)

    # padding masks (1 = valid token, 0 = pad); pad_idx = 0 as in the module
    query_mask = jnp.array([[1, 1, 1, 1, 1, 1, 1, 1],
                            [1, 1, 1, 1, 1, 1, 0, 0]], jnp.float32)
    key_mask = jnp.array([[1, 1, 1, 1, 1, 1, 1, 0],
                          [1, 1, 1, 1, 1, 0, 0, 0]], jnp.float32)

    params = init_params(k_p, Dq, Dk, H, Hd, FF_HID, LAYERS)

    fwd = jax.jit(functools.partial(tran_dec_forward, head_num=H, head_dims=Hd,
                                    batch_block=1))
    out = fwd(params, query, key_seq, query_mask, key_mask)
    out = jax.block_until_ready(out)

    assert out.shape == (B, Lq, Dq)
    assert bool(jnp.all(jnp.isfinite(out)))
    print("KERNEL_OK")
</pallas_src>

<mosaic_0001>
module attributes {stable_mosaic.version = 11 : i64} {
  func.func @_decoder_kernel(%arg0: i32, %arg1: i32, %arg2: memref<1x8x32xf32, #tpu.memory_space<vmem>>, %arg3: memref<1x8x32xbf16, #tpu.memory_space<vmem>>, %arg4: memref<1x8x1xf32, #tpu.memory_space<vmem>>, %arg5: memref<1x1x8xf32, #tpu.memory_space<vmem>>, %arg6: memref<1x32x96xbf16, #tpu.memory_space<vmem>>, %arg7: memref<1x1x96xf32, #tpu.memory_space<vmem>>, %arg8: memref<1x32x32xbf16, #tpu.memory_space<vmem>>, %arg9: memref<1x1x32xf32, #tpu.memory_space<vmem>>, %arg10: memref<1x1x32xf32, #tpu.memory_space<vmem>>, %arg11: memref<1x1x32xf32, #tpu.memory_space<vmem>>, %arg12: memref<1x32x32xbf16, #tpu.memory_space<vmem>>, %arg13: memref<1x1x32xf32, #tpu.memory_space<vmem>>, %arg14: memref<1x32x64xbf16, #tpu.memory_space<vmem>>, %arg15: memref<1x1x64xf32, #tpu.memory_space<vmem>>, %arg16: memref<1x32x32xbf16, #tpu.memory_space<vmem>>, %arg17: memref<1x1x32xf32, #tpu.memory_space<vmem>>, %arg18: memref<1x1x32xf32, #tpu.memory_space<vmem>>, %arg19: memref<1x1x32xf32, #tpu.memory_space<vmem>>, %arg20: memref<1x32x64xbf16, #tpu.memory_space<vmem>>, %arg21: memref<1x1x64xf32, #tpu.memory_space<vmem>>, %arg22: memref<1x64x32xbf16, #tpu.memory_space<vmem>>, %arg23: memref<1x1x32xf32, #tpu.memory_space<vmem>>, %arg24: memref<1x1x32xf32, #tpu.memory_space<vmem>>, %arg25: memref<1x1x32xf32, #tpu.memory_space<vmem>>, %arg26: memref<8x32xf32, #tpu.memory_space<vmem>>, %arg27: memref<8x32xf32, #tpu.memory_space<vmem>>) attributes {dimension_semantics = [#tpu.dimension_semantics<parallel>, #tpu.dimension_semantics<arbitrary>], iteration_bounds = array<i64: 2, 2>, scalar_prefetch = 0 : i64, scratch_operands = 1 : i64, tpu.core_type = #tpu.core_type<tc>, window_params = [{transform_indices = @transform_0, window_bounds = array<i64: 1, 8, 32>}, {transform_indices = @transform_1, window_bounds = array<i64: 1, 8, 32>}, {transform_indices = @transform_2, window_bounds = array<i64: 1, 8, 1>}, {transform_indices = @transform_3, window_bounds = array<i64: 1, 1, 8>}, {transform_indices = @transform_4, window_bounds = array<i64: 1, 32, 96>}, {transform_indices = @transform_5, window_bounds = array<i64: 1, 1, 96>}, {transform_indices = @transform_6, window_bounds = array<i64: 1, 32, 32>}, {transform_indices = @transform_7, window_bounds = array<i64: 1, 1, 32>}, {transform_indices = @transform_8, window_bounds = array<i64: 1, 1, 32>}, {transform_indices = @transform_9, window_bounds = array<i64: 1, 1, 32>}, {transform_indices = @transform_10, window_bounds = array<i64: 1, 32, 32>}, {transform_indices = @transform_11, window_bounds = array<i64: 1, 1, 32>}, {transform_indices = @transform_12, window_bounds = array<i64: 1, 32, 64>}, {transform_indices = @transform_13, window_bounds = array<i64: 1, 1, 64>}, {transform_indices = @transform_14, window_bounds = array<i64: 1, 32, 32>}, {transform_indices = @transform_15, window_bounds = array<i64: 1, 1, 32>}, {transform_indices = @transform_16, window_bounds = array<i64: 1, 1, 32>}, {transform_indices = @transform_17, window_bounds = array<i64: 1, 1, 32>}, {transform_indices = @transform_18, window_bounds = array<i64: 1, 32, 64>}, {transform_indices = @transform_19, window_bounds = array<i64: 1, 1, 64>}, {transform_indices = @transform_20, window_bounds = array<i64: 1, 64, 32>}, {transform_indices = @transform_21, window_bounds = array<i64: 1, 1, 32>}, {transform_indices = @transform_22, window_bounds = array<i64: 1, 1, 32>}, {transform_indices = @transform_23, window_bounds = array<i64: 1, 1, 32>}, {transform_indices = @transform_24, window_bounds = array<i64: 8, 32>}]} {
    %c0_i32 = arith.constant 0 : i32
    %0 = arith.cmpi eq, %arg1, %c0_i32 : i32
    %1 = arith.extui %0 : i1 to i32
    %c0_i32_0 = arith.constant 0 : i32
    %2 = arith.cmpi ne, %1, %c0_i32_0 : i32
    scf.if %2 {
      %c0_142 = arith.constant 0 : index
      %c0_143 = arith.constant 0 : index
      %c0_144 = arith.constant 0 : index
      %363 = vector.load %arg2[%c0_142, %c0_143, %c0_144] : memref<1x8x32xf32, #tpu.memory_space<vmem>>, vector<1x8x32xf32>
      %364 = vector.shape_cast %363 : vector<1x8x32xf32> to vector<8x32xf32>
      %c0_145 = arith.constant 0 : index
      %c0_146 = arith.constant 0 : index
      %365 = vector.load %arg27[%c0_145, %c0_146] : memref<8x32xf32, #tpu.memory_space<vmem>>, vector<8x32xf32>
      tpu.vector_store %arg27[%c0_145, %c0_146], %364 {strides = array<i32>} : memref<8x32xf32, #tpu.memory_space<vmem>>, vector<8x32xf32>,
    } else {
    }
    %c0 = arith.constant 0 : index
    %c0_1 = arith.constant 0 : index
    %3 = vector.load %arg27[%c0, %c0_1] : memref<8x32xf32, #tpu.memory_space<vmem>>, vector<8x32xf32>
    %c0_2 = arith.constant 0 : index
    %c0_3 = arith.constant 0 : index
    %c0_4 = arith.constant 0 : index
    %4 = vector.load %arg4[%c0_2, %c0_3, %c0_4] : memref<1x8x1xf32, #tpu.memory_space<vmem>>, vector<1x8x1xf32>
    %5 = vector.shape_cast %4 : vector<1x8x1xf32> to vector<8x1xf32>
    %c0_5 = arith.constant 0 : index
    %c0_6 = arith.constant 0 : index
    %c0_7 = arith.constant 0 : index
    %6 = vector.load %arg3[%c0_5, %c0_6, %c0_7] : memref<1x8x32xbf16, #tpu.memory_space<vmem>>, vector<1x8x32xbf16>
    %7 = vector.shape_cast %6 : vector<1x8x32xbf16> to vector<8x32xbf16>
    %8 = tpu.iota {dimensions = array<i32: 1>} : vector<8x8xi32>
    %9 = tpu.iota {dimensions = array<i32: 0>} : vector<8x8xi32>
    %10 = arith.cmpi sgt, %8, %9 : vector<8x8xi32>
    %c0_8 = arith.constant 0 : index
    %c0_9 = arith.constant 0 : index
    %c0_10 = arith.constant 0 : index
    %11 = vector.load %arg4[%c0_8, %c0_9, %c0_10] : memref<1x8x1xf32, #tpu.memory_space<vmem>>, vector<1x8x1xf32>
    %12 = vector.shape_cast %11 : vector<1x8x1xf32> to vector<1x1x8xf32>
    %cst = arith.constant 0.000000e+00 : f32
    %13 = vector.broadcast %cst : f32 to vector<1x1x8xf32>
    %14 = arith.cmpf oeq, %12, %13 : vector<1x1x8xf32>
    %15 = vector.shape_cast %10 : vector<8x8xi1> to vector<1x8x8xi1>
    %16 = vector.broadcast %14 : vector<1x1x8xi1> to vector<1x8x8xi1>
    %17 = arith.ori %16, %15 : vector<1x8x8xi1>
    %c0_11 = arith.constant 0 : index
    %c0_12 = arith.constant 0 : index
    %c0_13 = arith.constant 0 : index
    %18 = vector.load %arg5[%c0_11, %c0_12, %c0_13] : memref<1x1x8xf32, #tpu.memory_space<vmem>>, vector<1x1x8xf32>
    %cst_14 = arith.constant 0.000000e+00 : f32
    %19 = vector.broadcast %cst_14 : f32 to vector<1x1x8xf32>
    %20 = arith.cmpf oeq, %18, %19 : vector<1x1x8xf32>
    %21 = arith.truncf %3 : vector<8x32xf32> to vector<8x32xbf16>
    %c0_15 = arith.constant 0 : index
    %c0_16 = arith.constant 0 : index
    %c0_17 = arith.constant 0 : index
    %22 = vector.load %arg6[%c0_15, %c0_16, %c0_17] : memref<1x32x96xbf16, #tpu.memory_space<vmem>>, vector<1x32x96xbf16>
    %23 = vector.shape_cast %22 : vector<1x32x96xbf16> to vector<32x96xbf16>
    %cst_18 = arith.constant dense<0.000000e+00> : vector<8x96xf32>
    %24 = tpu.matmul %21, %23, %cst_18 {dimension_numbers = #tpu.dot_dimension_numbers<[1], [0], [0], [1], [0, 0, 1, 1], [], []>} : vector<8x32xbf16>, vector<32x96xbf16>, vector<8x96xf32> -> vector<8x96xf32>
    %c0_19 = arith.constant 0 : index
    %c0_20 = arith.constant 0 : index
    %c0_21 = arith.constant 0 : index
    %25 = vector.load %arg7[%c0_19, %c0_20, %c0_21] : memref<1x1x96xf32, #tpu.memory_space<vmem>>, vector<1x1x96xf32>
    %26 = vector.shape_cast %25 : vector<1x1x96xf32> to vector<1x96xf32>
    %27 = vector.broadcast %26 : vector<1x96xf32> to vector<8x96xf32>
    %28 = arith.addf %24, %27 : vector<8x96xf32>
    %29 = vector.extract_strided_slice %28 {offsets = [0, 0], sizes = [8, 32], strides = [1, 1]} : vector<8x96xf32> to vector<8x32xf32>
    %30 = vector.extract_strided_slice %28 {offsets = [0, 32], sizes = [8, 32], strides = [1, 1]} : vector<8x96xf32> to vector<8x32xf32>
    %31 = vector.extract_strided_slice %28 {offsets = [0, 64], sizes = [8, 32], strides = [1, 1]} : vector<8x96xf32> to vector<8x32xf32>
    %32 = vector.shape_cast %29 : vector<8x32xf32> to vector<1x8x32xf32>
    %33 = vector.shape_cast %30 : vector<8x32xf32> to vector<1x8x32xf32>
    %34 = vector.shape_cast %31 : vector<8x32xf32> to vector<1x8x32xf32>
    %35 = vector.extract_strided_slice %32 {offsets = [0, 0, 0], sizes = [1, 8, 8], strides = [1, 1, 1]} : vector<1x8x32xf32> to vector<1x8x8xf32>
    %36 = arith.truncf %35 : vector<1x8x8xf32> to vector<1x8x8xbf16>
    %37 = vector.extract_strided_slice %33 {offsets = [0, 0, 0], sizes = [1, 8, 8], strides = [1, 1, 1]} : vector<1x8x32xf32> to vector<1x8x8xf32>
    %38 = arith.truncf %37 : vector<1x8x8xf32> to vector<1x8x8xbf16>
    "tpu.trace_start"() <{level = 10 : i32, message = "bqd,bkd->bqk"}> : () -> ()
    %cst_22 = arith.constant dense<0.000000e+00> : vector<1x8x8xf32>
    %39 = tpu.matmul %36, %38, %cst_22 {dimension_numbers = #tpu.dot_dimension_numbers<[2], [2], [1], [1], [0, 0, 0, 1, 1, 1], [0], [0]>} : vector<1x8x8xbf16>, vector<1x8x8xbf16>, vector<1x8x8xf32> -> vector<1x8x8xf32>
    %cst_23 = arith.constant -1.000000e+30 : f32
    "tpu.trace_stop"() : () -> ()
    %40 = vector.broadcast %cst_23 : f32 to vector<1x8x8xf32>
    %41 = arith.select %17, %40, %39 : vector<1x8x8xi1>, vector<1x8x8xf32>
    %cst_24 = arith.constant dense<0xFF800000> : vector<1x8xf32>
    %42 = vector.multi_reduction <maximumf>, %41, %cst_24 [2] : vector<1x8x8xf32> to vector<1x8xf32>
    %43 = vector.shape_cast %42 : vector<1x8xf32> to vector<1x8x1xf32>
    %44 = vector.broadcast %43 : vector<1x8x1xf32> to vector<1x8x8xf32>
    %45 = arith.subf %41, %44 : vector<1x8x8xf32>
    %46 = math.exp %45 : vector<1x8x8xf32>
    %cst_25 = arith.constant dense<0.000000e+00> : vector<1x8xf32>
    %47 = vector.multi_reduction <add>, %46, %cst_25 [2] : vector<1x8x8xf32> to vector<1x8xf32>
    %48 = vector.shape_cast %47 : vector<1x8xf32> to vector<1x8x1xf32>
    %49 = tpu.reciprocal %48 {approx = true} : vector<1x8x1xf32> -> vector<1x8x1xf32>
    %50 = vector.broadcast %49 : vector<1x8x1xf32> to vector<1x8x8xf32>
    %51 = arith.mulf %46, %50 : vector<1x8x8xf32>
    %52 = arith.truncf %51 : vector<1x8x8xf32> to vector<1x8x8xbf16>
    %53 = vector.extract_strided_slice %34 {offsets = [0, 0, 0], sizes = [1, 8, 8], strides = [1, 1, 1]} : vector<1x8x32xf32> to vector<1x8x8xf32>
    %54 = arith.truncf %53 : vector<1x8x8xf32> to vector<1x8x8xbf16>
    "tpu.trace_start"() <{level = 10 : i32, message = "bqk,bkd->bqd"}> : () -> ()
    %cst_26 = arith.constant dense<0.000000e+00> : vector<1x8x8xf32>
    %55 = tpu.matmul %52, %54, %cst_26 {dimension_numbers = #tpu.dot_dimension_numbers<[2], [1], [1], [2], [0, 0, 0, 1, 1, 2], [0], [0]>} : vector<1x8x8xbf16>, vector<1x8x8xbf16>, vector<1x8x8xf32> -> vector<1x8x8xf32>
    "tpu.trace_stop"() : () -> ()
    %56 = vector.extract_strided_slice %32 {offsets = [0, 0, 8], sizes = [1, 8, 8], strides = [1, 1, 1]} : vector<1x8x32xf32> to vector<1x8x8xf32>
    %57 = arith.truncf %56 : vector<1x8x8xf32> to vector<1x8x8xbf16>
    %58 = vector.extract_strided_slice %33 {offsets = [0, 0, 8], sizes = [1, 8, 8], strides = [1, 1, 1]} : vector<1x8x32xf32> to vector<1x8x8xf32>
    %59 = arith.truncf %58 : vector<1x8x8xf32> to vector<1x8x8xbf16>
    "tpu.trace_start"() <{level = 10 : i32, message = "bqd,bkd->bqk"}> : () -> ()
    %cst_27 = arith.constant dense<0.000000e+00> : vector<1x8x8xf32>
    %60 = tpu.matmul %57, %59, %cst_27 {dimension_numbers = #tpu.dot_dimension_numbers<[2], [2], [1], [1], [0, 0, 0, 1, 1, 1], [0], [0]>} : vector<1x8x8xbf16>, vector<1x8x8xbf16>, vector<1x8x8xf32> -> vector<1x8x8xf32>
    %cst_28 = arith.constant -1.000000e+30 : f32
    "tpu.trace_stop"() : () -> ()
    %61 = vector.broadcast %cst_28 : f32 to vector<1x8x8xf32>
    %62 = arith.select %17, %61, %60 : vector<1x8x8xi1>, vector<1x8x8xf32>
    %cst_29 = arith.constant dense<0xFF800000> : vector<1x8xf32>
    %63 = vector.multi_reduction <maximumf>, %62, %cst_29 [2] : vector<1x8x8xf32> to vector<1x8xf32>
    %64 = vector.shape_cast %63 : vector<1x8xf32> to vector<1x8x1xf32>
    %65 = vector.broadcast %64 : vector<1x8x1xf32> to vector<1x8x8xf32>
    %66 = arith.subf %62, %65 : vector<1x8x8xf32>
    %67 = math.exp %66 : vector<1x8x8xf32>
    %cst_30 = arith.constant dense<0.000000e+00> : vector<1x8xf32>
    %68 = vector.multi_reduction <add>, %67, %cst_30 [2] : vector<1x8x8xf32> to vector<1x8xf32>
    %69 = vector.shape_cast %68 : vector<1x8xf32> to vector<1x8x1xf32>
    %70 = tpu.reciprocal %69 {approx = true} : vector<1x8x1xf32> -> vector<1x8x1xf32>
    %71 = vector.broadcast %70 : vector<1x8x1xf32> to vector<1x8x8xf32>
    %72 = arith.mulf %67, %71 : vector<1x8x8xf32>
    %73 = arith.truncf %72 : vector<1x8x8xf32> to vector<1x8x8xbf16>
    %74 = vector.extract_strided_slice %34 {offsets = [0, 0, 8], sizes = [1, 8, 8], strides = [1, 1, 1]} : vector<1x8x32xf32> to vector<1x8x8xf32>
    %75 = arith.truncf %74 : vector<1x8x8xf32> to vector<1x8x8xbf16>
    "tpu.trace_start"() <{level = 10 : i32, message = "bqk,bkd->bqd"}> : () -> ()
    %cst_31 = arith.constant dense<0.000000e+00> : vector<1x8x8xf32>
    %76 = tpu.matmul %73, %75, %cst_31 {dimension_numbers = #tpu.dot_dimension_numbers<[2], [1], [1], [2], [0, 0, 0, 1, 1, 2], [0], [0]>} : vector<1x8x8xbf16>, vector<1x8x8xbf16>, vector<1x8x8xf32> -> vector<1x8x8xf32>
    "tpu.trace_stop"() : () -> ()
    %77 = vector.extract_strided_slice %32 {offsets = [0, 0, 16], sizes = [1, 8, 8], strides = [1, 1, 1]} : vector<1x8x32xf32> to vector<1x8x8xf32>
    %78 = arith.truncf %77 : vector<1x8x8xf32> to vector<1x8x8xbf16>
    %79 = vector.extract_strided_slice %33 {offsets = [0, 0, 16], sizes = [1, 8, 8], strides = [1, 1, 1]} : vector<1x8x32xf32> to vector<1x8x8xf32>
    %80 = arith.truncf %79 : vector<1x8x8xf32> to vector<1x8x8xbf16>
    "tpu.trace_start"() <{level = 10 : i32, message = "bqd,bkd->bqk"}> : () -> ()
    %cst_32 = arith.constant dense<0.000000e+00> : vector<1x8x8xf32>
    %81 = tpu.matmul %78, %80, %cst_32 {dimension_numbers = #tpu.dot_dimension_numbers<[2], [2], [1], [1], [0, 0, 0, 1, 1, 1], [0], [0]>} : vector<1x8x8xbf16>, vector<1x8x8xbf16>, vector<1x8x8xf32> -> vector<1x8x8xf32>
    %cst_33 = arith.constant -1.000000e+30 : f32
    "tpu.trace_stop"() : () -> ()
    %82 = vector.broadcast %cst_33 : f32 to vector<1x8x8xf32>
    %83 = arith.select %17, %82, %81 : vector<1x8x8xi1>, vector<1x8x8xf32>
    %cst_34 = arith.constant dense<0xFF800000> : vector<1x8xf32>
    %84 = vector.multi_reduction <maximumf>, %83, %cst_34 [2] : vector<1x8x8xf32> to vector<1x8xf32>
    %85 = vector.shape_cast %84 : vector<1x8xf32> to vector<1x8x1xf32>
    %86 = vector.broadcast %85 : vector<1x8x1xf32> to vector<1x8x8xf32>
    %87 = arith.subf %83, %86 : vector<1x8x8xf32>
    %88 = math.exp %87 : vector<1x8x8xf32>
    %cst_35 = arith.constant dense<0.000000e+00> : vector<1x8xf32>
    %89 = vector.multi_reduction <add>, %88, %cst_35 [2] : vector<1x8x8xf32> to vector<1x8xf32>
    %90 = vector.shape_cast %89 : vector<1x8xf32> to vector<1x8x1xf32>
    %91 = tpu.reciprocal %90 {approx = true} : vector<1x8x1xf32> -> vector<1x8x1xf32>
    %92 = vector.broadcast %91 : vector<1x8x1xf32> to vector<1x8x8xf32>
    %93 = arith.mulf %88, %92 : vector<1x8x8xf32>
    %94 = arith.truncf %93 : vector<1x8x8xf32> to vector<1x8x8xbf16>
    %95 = vector.extract_strided_slice %34 {offsets = [0, 0, 16], sizes = [1, 8, 8], strides = [1, 1, 1]} : vector<1x8x32xf32> to vector<1x8x8xf32>
    %96 = arith.truncf %95 : vector<1x8x8xf32> to vector<1x8x8xbf16>
    "tpu.trace_start"() <{level = 10 : i32, message = "bqk,bkd->bqd"}> : () -> ()
    %cst_36 = arith.constant dense<0.000000e+00> : vector<1x8x8xf32>
    %97 = tpu.matmul %94, %96, %cst_36 {dimension_numbers = #tpu.dot_dimension_numbers<[2], [1], [1], [2], [0, 0, 0, 1, 1, 2], [0], [0]>} : vector<1x8x8xbf16>, vector<1x8x8xbf16>, vector<1x8x8xf32> -> vector<1x8x8xf32>
    "tpu.trace_stop"() : () -> ()
    %98 = vector.extract_strided_slice %32 {offsets = [0, 0, 24], sizes = [1, 8, 8], strides = [1, 1, 1]} : vector<1x8x32xf32> to vector<1x8x8xf32>
    %99 = arith.truncf %98 : vector<1x8x8xf32> to vector<1x8x8xbf16>
    %100 = vector.extract_strided_slice %33 {offsets = [0, 0, 24], sizes = [1, 8, 8], strides = [1, 1, 1]} : vector<1x8x32xf32> to vector<1x8x8xf32>
    %101 = arith.truncf %100 : vector<1x8x8xf32> to vector<1x8x8xbf16>
    "tpu.trace_start"() <{level = 10 : i32, message = "bqd,bkd->bqk"}> : () -> ()
    %cst_37 = arith.constant dense<0.000000e+00> : vector<1x8x8xf32>
    %102 = tpu.matmul %99, %101, %cst_37 {dimension_numbers = #tpu.dot_dimension_numbers<[2], [2], [1], [1], [0, 0, 0, 1, 1, 1], [0], [0]>} : vector<1x8x8xbf16>, vector<1x8x8xbf16>, vector<1x8x8xf32> -> vector<1x8x8xf32>
    %cst_38 = arith.constant -1.000000e+30 : f32
    "tpu.trace_stop"() : () -> ()
    %103 = vector.broadcast %cst_38 : f32 to vector<1x8x8xf32>
    %104 = arith.select %17, %103, %102 : vector<1x8x8xi1>, vector<1x8x8xf32>
    %cst_39 = arith.constant dense<0xFF800000> : vector<1x8xf32>
    %105 = vector.multi_reduction <maximumf>, %104, %cst_39 [2] : vector<1x8x8xf32> to vector<1x8xf32>
    %106 = vector.shape_cast %105 : vector<1x8xf32> to vector<1x8x1xf32>
    %107 = vector.broadcast %106 : vector<1x8x1xf32> to vector<1x8x8xf32>
    %108 = arith.subf %104, %107 : vector<1x8x8xf32>
    %109 = math.exp %108 : vector<1x8x8xf32>
    %cst_40 = arith.constant dense<0.000000e+00> : vector<1x8xf32>
    %110 = vector.multi_reduction <add>, %109, %cst_40 [2] : vector<1x8x8xf32> to vector<1x8xf32>
    %111 = vector.shape_cast %110 : vector<1x8xf32> to vector<1x8x1xf32>
    %112 = tpu.reciprocal %111 {approx = true} : vector<1x8x1xf32> -> vector<1x8x1xf32>
    %113 = vector.broadcast %112 : vector<1x8x1xf32> to vector<1x8x8xf32>
    %114 = arith.mulf %109, %113 : vector<1x8x8xf32>
    %115 = arith.truncf %114 : vector<1x8x8xf32> to vector<1x8x8xbf16>
    %116 = vector.extract_strided_slice %34 {offsets = [0, 0, 24], sizes = [1, 8, 8], strides = [1, 1, 1]} : vector<1x8x32xf32> to vector<1x8x8xf32>
    %117 = arith.truncf %116 : vector<1x8x8xf32> to vector<1x8x8xbf16>
    "tpu.trace_start"() <{level = 10 : i32, message = "bqk,bkd->bqd"}> : () -> ()
    %cst_41 = arith.constant dense<0.000000e+00> : vector<1x8x8xf32>
    %118 = tpu.matmul %115, %117, %cst_41 {dimension_numbers = #tpu.dot_dimension_numbers<[2], [1], [1], [2], [0, 0, 0, 1, 1, 2], [0], [0]>} : vector<1x8x8xbf16>, vector<1x8x8xbf16>, vector<1x8x8xf32> -> vector<1x8x8xf32>
    "tpu.trace_stop"() : () -> ()
    %119 = tpu.concatenate %55, %76, %97, %118 in 2 : vector<1x8x8xf32>, vector<1x8x8xf32>, vector<1x8x8xf32>, vector<1x8x8xf32> -> vector<1x8x32xf32>
    %120 = vector.shape_cast %119 : vector<1x8x32xf32> to vector<8x32xf32>
    %121 = arith.truncf %120 : vector<8x32xf32> to vector<8x32xbf16>
    %c0_42 = arith.constant 0 : index
    %c0_43 = arith.constant 0 : index
    %c0_44 = arith.constant 0 : index
    %122 = vector.load %arg8[%c0_42, %c0_43, %c0_44] : memref<1x32x32xbf16, #tpu.memory_space<vmem>>, vector<1x32x32xbf16>
    %123 = vector.shape_cast %122 : vector<1x32x32xbf16> to vector<32x32xbf16>
    %cst_45 = arith.constant dense<0.000000e+00> : vector<8x32xf32>
    %124 = tpu.matmul %121, %123, %cst_45 {dimension_numbers = #tpu.dot_dimension_numbers<[1], [0], [0], [1], [0, 0, 1, 1], [], []>} : vector<8x32xbf16>, vector<32x32xbf16>, vector<8x32xf32> -> vector<8x32xf32>
    %c0_46 = arith.constant 0 : index
    %c0_47 = arith.constant 0 : index
    %c0_48 = arith.constant 0 : index
    %125 = vector.load %arg9[%c0_46, %c0_47, %c0_48] : memref<1x1x32xf32, #tpu.memory_space<vmem>>, vector<1x1x32xf32>
    %126 = vector.shape_cast %125 : vector<1x1x32xf32> to vector<1x32xf32>
    %127 = vector.broadcast %126 : vector<1x32xf32> to vector<8x32xf32>
    %128 = arith.addf %124, %127 : vector<8x32xf32>
    %129 = vector.broadcast %5 : vector<8x1xf32> to vector<8x32xf32>
    %130 = arith.mulf %128, %129 : vector<8x32xf32>
    %131 = arith.addf %3, %130 : vector<8x32xf32>
    %cst_49 = arith.constant dense<0.000000e+00> : vector<8xf32>
    %132 = vector.multi_reduction <add>, %131, %cst_49 [1] : vector<8x32xf32> to vector<8xf32>
    %133 = vector.shape_cast %132 : vector<8xf32> to vector<8x1xf32>
    %cst_50 = arith.constant 3.200000e+01 : f32
    %134 = vector.broadcast %cst_50 : f32 to vector<8x1xf32>
    %135 = arith.divf %133, %134 : vector<8x1xf32>
    %136 = vector.broadcast %135 : vector<8x1xf32> to vector<8x32xf32>
    %137 = arith.subf %131, %136 : vector<8x32xf32>
    %138 = arith.mulf %137, %137 : vector<8x32xf32>
    %cst_51 = arith.constant dense<0.000000e+00> : vector<8xf32>
    %139 = vector.multi_reduction <add>, %138, %cst_51 [1] : vector<8x32xf32> to vector<8xf32>
    %140 = vector.shape_cast %139 : vector<8xf32> to vector<8x1xf32>
    %cst_52 = arith.constant 3.200000e+01 : f32
    %141 = vector.broadcast %cst_52 : f32 to vector<8x1xf32>
    %142 = arith.divf %140, %141 : vector<8x1xf32>
    %143 = vector.broadcast %135 : vector<8x1xf32> to vector<8x32xf32>
    %144 = arith.subf %131, %143 : vector<8x32xf32>
    %cst_53 = arith.constant 9.99999974E-6 : f32
    %145 = vector.broadcast %cst_53 : f32 to vector<8x1xf32>
    %146 = arith.addf %142, %145 : vector<8x1xf32>
    %147 = math.rsqrt %146 : vector<8x1xf32>
    %148 = vector.broadcast %147 : vector<8x1xf32> to vector<8x32xf32>
    %149 = arith.mulf %144, %148 : vector<8x32xf32>
    %c0_54 = arith.constant 0 : index
    %c0_55 = arith.constant 0 : index
    %c0_56 = arith.constant 0 : index
    %150 = vector.load %arg10[%c0_54, %c0_55, %c0_56] : memref<1x1x32xf32, #tpu.memory_space<vmem>>, vector<1x1x32xf32>
    %151 = vector.shape_cast %150 : vector<1x1x32xf32> to vector<1x32xf32>
    %152 = vector.broadcast %151 : vector<1x32xf32> to vector<8x32xf32>
    %153 = arith.mulf %149, %152 : vector<8x32xf32>
    %c0_57 = arith.constant 0 : index
    %c0_58 = arith.constant 0 : index
    %c0_59 = arith.constant 0 : index
    %154 = vector.load %arg11[%c0_57, %c0_58, %c0_59] : memref<1x1x32xf32, #tpu.memory_space<vmem>>, vector<1x1x32xf32>
    %155 = vector.shape_cast %154 : vector<1x1x32xf32> to vector<1x32xf32>
    %156 = vector.broadcast %155 : vector<1x32xf32> to vector<8x32xf32>
    %157 = arith.addf %153, %156 : vector<8x32xf32>
    %158 = arith.truncf %157 : vector<8x32xf32> to vector<8x32xbf16>
    %c0_60 = arith.constant 0 : index
    %c0_61 = arith.constant 0 : index
    %c0_62 = arith.constant 0 : index
    %159 = vector.load %arg12[%c0_60, %c0_61, %c0_62] : memref<1x32x32xbf16, #tpu.memory_space<vmem>>, vector<1x32x32xbf16>
    %160 = vector.shape_cast %159 : vector<1x32x32xbf16> to vector<32x32xbf16>
    %cst_63 = arith.constant dense<0.000000e+00> : vector<8x32xf32>
    %161 = tpu.matmul %158, %160, %cst_63 {dimension_numbers = #tpu.dot_dimension_numbers<[1], [0], [0], [1], [0, 0, 1, 1], [], []>} : vector<8x32xbf16>, vector<32x32xbf16>, vector<8x32xf32> -> vector<8x32xf32>
    %c0_64 = arith.constant 0 : index
    %c0_65 = arith.constant 0 : index
    %c0_66 = arith.constant 0 : index
    %162 = vector.load %arg13[%c0_64, %c0_65, %c0_66] : memref<1x1x32xf32, #tpu.memory_space<vmem>>, vector<1x1x32xf32>
    %163 = vector.shape_cast %162 : vector<1x1x32xf32> to vector<1x32xf32>
    %164 = vector.broadcast %163 : vector<1x32xf32> to vector<8x32xf32>
    %165 = arith.addf %161, %164 : vector<8x32xf32>
    %c0_67 = arith.constant 0 : index
    %c0_68 = arith.constant 0 : index
    %c0_69 = arith.constant 0 : index
    %166 = vector.load %arg14[%c0_67, %c0_68, %c0_69] : memref<1x32x64xbf16, #tpu.memory_space<vmem>>, vector<1x32x64xbf16>
    %167 = vector.shape_cast %166 : vector<1x32x64xbf16> to vector<32x64xbf16>
    %cst_70 = arith.constant dense<0.000000e+00> : vector<8x64xf32>
    %168 = tpu.matmul %7, %167, %cst_70 {dimension_numbers = #tpu.dot_dimension_numbers<[1], [0], [0], [1], [0, 0, 1, 1], [], []>} : vector<8x32xbf16>, vector<32x64xbf16>, vector<8x64xf32> -> vector<8x64xf32>
    %c0_71 = arith.constant 0 : index
    %c0_72 = arith.constant 0 : index
    %c0_73 = arith.constant 0 : index
    %169 = vector.load %arg15[%c0_71, %c0_72, %c0_73] : memref<1x1x64xf32, #tpu.memory_space<vmem>>, vector<1x1x64xf32>
    %170 = vector.shape_cast %169 : vector<1x1x64xf32> to vector<1x64xf32>
    %171 = vector.broadcast %170 : vector<1x64xf32> to vector<8x64xf32>
    %172 = arith.addf %168, %171 : vector<8x64xf32>
    %173 = vector.extract_strided_slice %172 {offsets = [0, 0], sizes = [8, 32], strides = [1, 1]} : vector<8x64xf32> to vector<8x32xf32>
    %174 = vector.extract_strided_slice %172 {offsets = [0, 32], sizes = [8, 32], strides = [1, 1]} : vector<8x64xf32> to vector<8x32xf32>
    %175 = vector.shape_cast %165 : vector<8x32xf32> to vector<1x8x32xf32>
    %176 = vector.shape_cast %173 : vector<8x32xf32> to vector<1x8x32xf32>
    %177 = vector.shape_cast %174 : vector<8x32xf32> to vector<1x8x32xf32>
    %178 = vector.extract_strided_slice %175 {offsets = [0, 0, 0], sizes = [1, 8, 8], strides = [1, 1, 1]} : vector<1x8x32xf32> to vector<1x8x8xf32>
    %179 = arith.truncf %178 : vector<1x8x8xf32> to vector<1x8x8xbf16>
    %180 = vector.extract_strided_slice %176 {offsets = [0, 0, 0], sizes = [1, 8, 8], strides = [1, 1, 1]} : vector<1x8x32xf32> to vector<1x8x8xf32>
    %181 = arith.truncf %180 : vector<1x8x8xf32> to vector<1x8x8xbf16>
    "tpu.trace_start"() <{level = 10 : i32, message = "bqd,bkd->bqk"}> : () -> ()
    %cst_74 = arith.constant dense<0.000000e+00> : vector<1x8x8xf32>
    %182 = tpu.matmul %179, %181, %cst_74 {dimension_numbers = #tpu.dot_dimension_numbers<[2], [2], [1], [1], [0, 0, 0, 1, 1, 1], [0], [0]>} : vector<1x8x8xbf16>, vector<1x8x8xbf16>, vector<1x8x8xf32> -> vector<1x8x8xf32>
    %cst_75 = arith.constant -1.000000e+30 : f32
    "tpu.trace_stop"() : () -> ()
    %183 = vector.shape_cast %20 : vector<1x1x8xi1> to vector<1x1x8xi1>
    %184 = vector.broadcast %183 : vector<1x1x8xi1> to vector<1x8x8xi1>
    %185 = vector.broadcast %cst_75 : f32 to vector<1x8x8xf32>
    %186 = arith.select %184, %185, %182 : vector<1x8x8xi1>, vector<1x8x8xf32>
    %cst_76 = arith.constant dense<0xFF800000> : vector<1x8xf32>
    %187 = vector.multi_reduction <maximumf>, %186, %cst_76 [2] : vector<1x8x8xf32> to vector<1x8xf32>
    %188 = vector.shape_cast %187 : vector<1x8xf32> to vector<1x8x1xf32>
    %189 = vector.broadcast %188 : vector<1x8x1xf32> to vector<1x8x8xf32>
    %190 = arith.subf %186, %189 : vector<1x8x8xf32>
    %191 = math.exp %190 : vector<1x8x8xf32>
    %cst_77 = arith.constant dense<0.000000e+00> : vector<1x8xf32>
    %192 = vector.multi_reduction <add>, %191, %cst_77 [2] : vector<1x8x8xf32> to vector<1x8xf32>
    %193 = vector.shape_cast %192 : vector<1x8xf32> to vector<1x8x1xf32>
    %194 = tpu.reciprocal %193 {approx = true} : vector<1x8x1xf32> -> vector<1x8x1xf32>
    %195 = vector.broadcast %194 : vector<1x8x1xf32> to vector<1x8x8xf32>
    %196 = arith.mulf %191, %195 : vector<1x8x8xf32>
    %197 = arith.truncf %196 : vector<1x8x8xf32> to vector<1x8x8xbf16>
    %198 = vector.extract_strided_slice %177 {offsets = [0, 0, 0], sizes = [1, 8, 8], strides = [1, 1, 1]} : vector<1x8x32xf32> to vector<1x8x8xf32>
    %199 = arith.truncf %198 : vector<1x8x8xf32> to vector<1x8x8xbf16>
    "tpu.trace_start"() <{level = 10 : i32, message = "bqk,bkd->bqd"}> : () -> ()
    %cst_78 = arith.constant dense<0.000000e+00> : vector<1x8x8xf32>
    %200 = tpu.matmul %197, %199, %cst_78 {dimension_numbers = #tpu.dot_dimension_numbers<[2], [1], [1], [2], [0, 0, 0, 1, 1, 2], [0], [0]>} : vector<1x8x8xbf16>, vector<1x8x8xbf16>, vector<1x8x8xf32> -> vector<1x8x8xf32>
    "tpu.trace_stop"() : () -> ()
    %201 = vector.extract_strided_slice %175 {offsets = [0, 0, 8], sizes = [1, 8, 8], strides = [1, 1, 1]} : vector<1x8x32xf32> to vector<1x8x8xf32>
    %202 = arith.truncf %201 : vector<1x8x8xf32> to vector<1x8x8xbf16>
    %203 = vector.extract_strided_slice %176 {offsets = [0, 0, 8], sizes = [1, 8, 8], strides = [1, 1, 1]} : vector<1x8x32xf32> to vector<1x8x8xf32>
    %204 = arith.truncf %203 : vector<1x8x8xf32> to vector<1x8x8xbf16>
    "tpu.trace_start"() <{level = 10 : i32, message = "bqd,bkd->bqk"}> : () -> ()
    %cst_79 = arith.constant dense<0.000000e+00> : vector<1x8x8xf32>
    %205 = tpu.matmul %202, %204, %cst_79 {dimension_numbers = #tpu.dot_dimension_numbers<[2], [2], [1], [1], [0, 0, 0, 1, 1, 1], [0], [0]>} : vector<1x8x8xbf16>, vector<1x8x8xbf16>, vector<1x8x8xf32> -> vector<1x8x8xf32>
    %cst_80 = arith.constant -1.000000e+30 : f32
    "tpu.trace_stop"() : () -> ()
    %206 = vector.shape_cast %20 : vector<1x1x8xi1> to vector<1x1x8xi1>
    %207 = vector.broadcast %206 : vector<1x1x8xi1> to vector<1x8x8xi1>
    %208 = vector.broadcast %cst_80 : f32 to vector<1x8x8xf32>
    %209 = arith.select %207, %208, %205 : vector<1x8x8xi1>, vector<1x8x8xf32>
    %cst_81 = arith.constant dense<0xFF800000> : vector<1x8xf32>
    %210 = vector.multi_reduction <maximumf>, %209, %cst_81 [2] : vector<1x8x8xf32> to vector<1x8xf32>
    %211 = vector.shape_cast %210 : vector<1x8xf32> to vector<1x8x1xf32>
    %212 = vector.broadcast %211 : vector<1x8x1xf32> to vector<1x8x8xf32>
    %213 = arith.subf %209, %212 : vector<1x8x8xf32>
    %214 = math.exp %213 : vector<1x8x8xf32>
    %cst_82 = arith.constant dense<0.000000e+00> : vector<1x8xf32>
    %215 = vector.multi_reduction <add>, %214, %cst_82 [2] : vector<1x8x8xf32> to vector<1x8xf32>
    %216 = vector.shape_cast %215 : vector<1x8xf32> to vector<1x8x1xf32>
    %217 = tpu.reciprocal %216 {approx = true} : vector<1x8x1xf32> -> vector<1x8x1xf32>
    %218 = vector.broadcast %217 : vector<1x8x1xf32> to vector<1x8x8xf32>
    %219 = arith.mulf %214, %218 : vector<1x8x8xf32>
    %220 = arith.truncf %219 : vector<1x8x8xf32> to vector<1x8x8xbf16>
    %221 = vector.extract_strided_slice %177 {offsets = [0, 0, 8], sizes = [1, 8, 8], strides = [1, 1, 1]} : vector<1x8x32xf32> to vector<1x8x8xf32>
    %222 = arith.truncf %221 : vector<1x8x8xf32> to vector<1x8x8xbf16>
    "tpu.trace_start"() <{level = 10 : i32, message = "bqk,bkd->bqd"}> : () -> ()
    %cst_83 = arith.constant dense<0.000000e+00> : vector<1x8x8xf32>
    %223 = tpu.matmul %220, %222, %cst_83 {dimension_numbers = #tpu.dot_dimension_numbers<[2], [1], [1], [2], [0, 0, 0, 1, 1, 2], [0], [0]>} : vector<1x8x8xbf16>, vector<1x8x8xbf16>, vector<1x8x8xf32> -> vector<1x8x8xf32>
    "tpu.trace_stop"() : () -> ()
    %224 = vector.extract_strided_slice %175 {offsets = [0, 0, 16], sizes = [1, 8, 8], strides = [1, 1, 1]} : vector<1x8x32xf32> to vector<1x8x8xf32>
    %225 = arith.truncf %224 : vector<1x8x8xf32> to vector<1x8x8xbf16>
    %226 = vector.extract_strided_slice %176 {offsets = [0, 0, 16], sizes = [1, 8, 8], strides = [1, 1, 1]} : vector<1x8x32xf32> to vector<1x8x8xf32>
    %227 = arith.truncf %226 : vector<1x8x8xf32> to vector<1x8x8xbf16>
    "tpu.trace_start"() <{level = 10 : i32, message = "bqd,bkd->bqk"}> : () -> ()
    %cst_84 = arith.constant dense<0.000000e+00> : vector<1x8x8xf32>
    %228 = tpu.matmul %225, %227, %cst_84 {dimension_numbers = #tpu.dot_dimension_numbers<[2], [2], [1], [1], [0, 0, 0, 1, 1, 1], [0], [0]>} : vector<1x8x8xbf16>, vector<1x8x8xbf16>, vector<1x8x8xf32> -> vector<1x8x8xf32>
    %cst_85 = arith.constant -1.000000e+30 : f32
    "tpu.trace_stop"() : () -> ()
    %229 = vector.shape_cast %20 : vector<1x1x8xi1> to vector<1x1x8xi1>
    %230 = vector.broadcast %229 : vector<1x1x8xi1> to vector<1x8x8xi1>
    %231 = vector.broadcast %cst_85 : f32 to vector<1x8x8xf32>
    %232 = arith.select %230, %231, %228 : vector<1x8x8xi1>, vector<1x8x8xf32>
    %cst_86 = arith.constant dense<0xFF800000> : vector<1x8xf32>
    %233 = vector.multi_reduction <maximumf>, %232, %cst_86 [2] : vector<1x8x8xf32> to vector<1x8xf32>
    %234 = vector.shape_cast %233 : vector<1x8xf32> to vector<1x8x1xf32>
    %235 = vector.broadcast %234 : vector<1x8x1xf32> to vector<1x8x8xf32>
    %236 = arith.subf %232, %235 : vector<1x8x8xf32>
    %237 = math.exp %236 : vector<1x8x8xf32>
    %cst_87 = arith.constant dense<0.000000e+00> : vector<1x8xf32>
    %238 = vector.multi_reduction <add>, %237, %cst_87 [2] : vector<1x8x8xf32> to vector<1x8xf32>
    %239 = vector.shape_cast %238 : vector<1x8xf32> to vector<1x8x1xf32>
    %240 = tpu.reciprocal %239 {approx = true} : vector<1x8x1xf32> -> vector<1x8x1xf32>
    %241 = vector.broadcast %240 : vector<1x8x1xf32> to vector<1x8x8xf32>
    %242 = arith.mulf %237, %241 : vector<1x8x8xf32>
    %243 = arith.truncf %242 : vector<1x8x8xf32> to vector<1x8x8xbf16>
    %244 = vector.extract_strided_slice %177 {offsets = [0, 0, 16], sizes = [1, 8, 8], strides = [1, 1, 1]} : vector<1x8x32xf32> to vector<1x8x8xf32>
    %245 = arith.truncf %244 : vector<1x8x8xf32> to vector<1x8x8xbf16>
    "tpu.trace_start"() <{level = 10 : i32, message = "bqk,bkd->bqd"}> : () -> ()
    %cst_88 = arith.constant dense<0.000000e+00> : vector<1x8x8xf32>
    %246 = tpu.matmul %243, %245, %cst_88 {dimension_numbers = #tpu.dot_dimension_numbers<[2], [1], [1], [2], [0, 0, 0, 1, 1, 2], [0], [0]>} : vector<1x8x8xbf16>, vector<1x8x8xbf16>, vector<1x8x8xf32> -> vector<1x8x8xf32>
    "tpu.trace_stop"() : () -> ()
    %247 = vector.extract_strided_slice %175 {offsets = [0, 0, 24], sizes = [1, 8, 8], strides = [1, 1, 1]} : vector<1x8x32xf32> to vector<1x8x8xf32>
    %248 = arith.truncf %247 : vector<1x8x8xf32> to vector<1x8x8xbf16>
    %249 = vector.extract_strided_slice %176 {offsets = [0, 0, 24], sizes = [1, 8, 8], strides = [1, 1, 1]} : vector<1x8x32xf32> to vector<1x8x8xf32>
    %250 = arith.truncf %249 : vector<1x8x8xf32> to vector<1x8x8xbf16>
    "tpu.trace_start"() <{level = 10 : i32, message = "bqd,bkd->bqk"}> : () -> ()
    %cst_89 = arith.constant dense<0.000000e+00> : vector<1x8x8xf32>
    %251 = tpu.matmul %248, %250, %cst_89 {dimension_numbers = #tpu.dot_dimension_numbers<[2], [2], [1], [1], [0, 0, 0, 1, 1, 1], [0], [0]>} : vector<1x8x8xbf16>, vector<1x8x8xbf16>, vector<1x8x8xf32> -> vector<1x8x8xf32>
    %cst_90 = arith.constant -1.000000e+30 : f32
    "tpu.trace_stop"() : () -> ()
    %252 = vector.shape_cast %20 : vector<1x1x8xi1> to vector<1x1x8xi1>
    %253 = vector.broadcast %252 : vector<1x1x8xi1> to vector<1x8x8xi1>
    %254 = vector.broadcast %cst_90 : f32 to vector<1x8x8xf32>
    %255 = arith.select %253, %254, %251 : vector<1x8x8xi1>, vector<1x8x8xf32>
    %cst_91 = arith.constant dense<0xFF800000> : vector<1x8xf32>
    %256 = vector.multi_reduction <maximumf>, %255, %cst_91 [2] : vector<1x8x8xf32> to vector<1x8xf32>
    %257 = vector.shape_cast %256 : vector<1x8xf32> to vector<1x8x1xf32>
    %258 = vector.broadcast %257 : vector<1x8x1xf32> to vector<1x8x8xf32>
    %259 = arith.subf %255, %258 : vector<1x8x8xf32>
    %260 = math.exp %259 : vector<1x8x8xf32>
    %cst_92 = arith.constant dense<0.000000e+00> : vector<1x8xf32>
    %261 = vector.multi_reduction <add>, %260, %cst_92 [2] : vector<1x8x8xf32> to vector<1x8xf32>
    %262 = vector.shape_cast %261 : vector<1x8xf32> to vector<1x8x1xf32>
    %263 = tpu.reciprocal %262 {approx = true} : vector<1x8x1xf32> -> vector<1x8x1xf32>
    %264 = vector.broadcast %263 : vector<1x8x1xf32> to vector<1x8x8xf32>
    %265 = arith.mulf %260, %264 : vector<1x8x8xf32>
    %266 = arith.truncf %265 : vector<1x8x8xf32> to vector<1x8x8xbf16>
    %267 = vector.extract_strided_slice %177 {offsets = [0, 0, 24], sizes = [1, 8, 8], strides = [1, 1, 1]} : vector<1x8x32xf32> to vector<1x8x8xf32>
    %268 = arith.truncf %267 : vector<1x8x8xf32> to vector<1x8x8xbf16>
    "tpu.trace_start"() <{level = 10 : i32, message = "bqk,bkd->bqd"}> : () -> ()
    %cst_93 = arith.constant dense<0.000000e+00> : vector<1x8x8xf32>
    %269 = tpu.matmul %266, %268, %cst_93 {dimension_numbers = #tpu.dot_dimension_numbers<[2], [1], [1], [2], [0, 0, 0, 1, 1, 2], [0], [0]>} : vector<1x8x8xbf16>, vector<1x8x8xbf16>, vector<1x8x8xf32> -> vector<1x8x8xf32>
    "tpu.trace_stop"() : () -> ()
    %270 = tpu.concatenate %200, %223, %246, %269 in 2 : vector<1x8x8xf32>, vector<1x8x8xf32>, vector<1x8x8xf32>, vector<1x8x8xf32> -> vector<1x8x32xf32>
    %271 = vector.shape_cast %270 : vector<1x8x32xf32> to vector<8x32xf32>
    %272 = arith.truncf %271 : vector<8x32xf32> to vector<8x32xbf16>
    %c0_94 = arith.constant 0 : index
    %c0_95 = arith.constant 0 : index
    %c0_96 = arith.constant 0 : index
    %273 = vector.load %arg16[%c0_94, %c0_95, %c0_96] : memref<1x32x32xbf16, #tpu.memory_space<vmem>>, vector<1x32x32xbf16>
    %274 = vector.shape_cast %273 : vector<1x32x32xbf16> to vector<32x32xbf16>
    %cst_97 = arith.constant dense<0.000000e+00> : vector<8x32xf32>
    %275 = tpu.matmul %272, %274, %cst_97 {dimension_numbers = #tpu.dot_dimension_numbers<[1], [0], [0], [1], [0, 0, 1, 1], [], []>} : vector<8x32xbf16>, vector<32x32xbf16>, vector<8x32xf32> -> vector<8x32xf32>
    %c0_98 = arith.constant 0 : index
    %c0_99 = arith.constant 0 : index
    %c0_100 = arith.constant 0 : index
    %276 = vector.load %arg17[%c0_98, %c0_99, %c0_100] : memref<1x1x32xf32, #tpu.memory_space<vmem>>, vector<1x1x32xf32>
    %277 = vector.shape_cast %276 : vector<1x1x32xf32> to vector<1x32xf32>
    %278 = vector.broadcast %277 : vector<1x32xf32> to vector<8x32xf32>
    %279 = arith.addf %275, %278 : vector<8x32xf32>
    %280 = vector.broadcast %5 : vector<8x1xf32> to vector<8x32xf32>
    %281 = arith.mulf %279, %280 : vector<8x32xf32>
    %282 = arith.addf %157, %281 : vector<8x32xf32>
    %cst_101 = arith.constant dense<0.000000e+00> : vector<8xf32>
    %283 = vector.multi_reduction <add>, %282, %cst_101 [1] : vector<8x32xf32> to vector<8xf32>
    %284 = vector.shape_cast %283 : vector<8xf32> to vector<8x1xf32>
    %cst_102 = arith.constant 3.200000e+01 : f32
    %285 = vector.broadcast %cst_102 : f32 to vector<8x1xf32>
    %286 = arith.divf %284, %285 : vector<8x1xf32>
    %287 = vector.broadcast %286 : vector<8x1xf32> to vector<8x32xf32>
    %288 = arith.subf %282, %287 : vector<8x32xf32>
    %289 = arith.mulf %288, %288 : vector<8x32xf32>
    %cst_103 = arith.constant dense<0.000000e+00> : vector<8xf32>
    %290 = vector.multi_reduction <add>, %289, %cst_103 [1] : vector<8x32xf32> to vector<8xf32>
    %291 = vector.shape_cast %290 : vector<8xf32> to vector<8x1xf32>
    %cst_104 = arith.constant 3.200000e+01 : f32
    %292 = vector.broadcast %cst_104 : f32 to vector<8x1xf32>
    %293 = arith.divf %291, %292 : vector<8x1xf32>
    %294 = vector.broadcast %286 : vector<8x1xf32> to vector<8x32xf32>
    %295 = arith.subf %282, %294 : vector<8x32xf32>
    %cst_105 = arith.constant 9.99999974E-6 : f32
    %296 = vector.broadcast %cst_105 : f32 to vector<8x1xf32>
    %297 = arith.addf %293, %296 : vector<8x1xf32>
    %298 = math.rsqrt %297 : vector<8x1xf32>
    %299 = vector.broadcast %298 : vector<8x1xf32> to vector<8x32xf32>
    %300 = arith.mulf %295, %299 : vector<8x32xf32>
    %c0_106 = arith.constant 0 : index
    %c0_107 = arith.constant 0 : index
    %c0_108 = arith.constant 0 : index
    %301 = vector.load %arg18[%c0_106, %c0_107, %c0_108] : memref<1x1x32xf32, #tpu.memory_space<vmem>>, vector<1x1x32xf32>
    %302 = vector.shape_cast %301 : vector<1x1x32xf32> to vector<1x32xf32>
    %303 = vector.broadcast %302 : vector<1x32xf32> to vector<8x32xf32>
    %304 = arith.mulf %300, %303 : vector<8x32xf32>
    %c0_109 = arith.constant 0 : index
    %c0_110 = arith.constant 0 : index
    %c0_111 = arith.constant 0 : index
    %305 = vector.load %arg19[%c0_109, %c0_110, %c0_111] : memref<1x1x32xf32, #tpu.memory_space<vmem>>, vector<1x1x32xf32>
    %306 = vector.shape_cast %305 : vector<1x1x32xf32> to vector<1x32xf32>
    %307 = vector.broadcast %306 : vector<1x32xf32> to vector<8x32xf32>
    %308 = arith.addf %304, %307 : vector<8x32xf32>
    %309 = arith.truncf %308 : vector<8x32xf32> to vector<8x32xbf16>
    %c0_112 = arith.constant 0 : index
    %c0_113 = arith.constant 0 : index
    %c0_114 = arith.constant 0 : index
    %310 = vector.load %arg20[%c0_112, %c0_113, %c0_114] : memref<1x32x64xbf16, #tpu.memory_space<vmem>>, vector<1x32x64xbf16>
    %311 = vector.shape_cast %310 : vector<1x32x64xbf16> to vector<32x64xbf16>
    %cst_115 = arith.constant dense<0.000000e+00> : vector<8x64xf32>
    %312 = tpu.matmul %309, %311, %cst_115 {dimension_numbers = #tpu.dot_dimension_numbers<[1], [0], [0], [1], [0, 0, 1, 1], [], []>} : vector<8x32xbf16>, vector<32x64xbf16>, vector<8x64xf32> -> vector<8x64xf32>
    %c0_116 = arith.constant 0 : index
    %c0_117 = arith.constant 0 : index
    %c0_118 = arith.constant 0 : index
    %313 = vector.load %arg21[%c0_116, %c0_117, %c0_118] : memref<1x1x64xf32, #tpu.memory_space<vmem>>, vector<1x1x64xf32>
    %314 = vector.shape_cast %313 : vector<1x1x64xf32> to vector<1x64xf32>
    %315 = vector.broadcast %314 : vector<1x64xf32> to vector<8x64xf32>
    %316 = arith.addf %312, %315 : vector<8x64xf32>
    %cst_119 = arith.constant 0.000000e+00 : f32
    %317 = vector.broadcast %cst_119 : f32 to vector<8x64xf32>
    %318 = arith.cmpf ogt, %316, %317 : vector<8x64xf32>
    %cst_120 = arith.constant 0.00999999977 : f32
    %319 = vector.broadcast %cst_120 : f32 to vector<8x64xf32>
    %320 = arith.mulf %319, %316 : vector<8x64xf32>
    %321 = arith.select %318, %316, %320 : vector<8x64xi1>, vector<8x64xf32>
    %322 = arith.truncf %321 : vector<8x64xf32> to vector<8x64xbf16>
    %c0_121 = arith.constant 0 : index
    %c0_122 = arith.constant 0 : index
    %c0_123 = arith.constant 0 : index
    %323 = vector.load %arg22[%c0_121, %c0_122, %c0_123] : memref<1x64x32xbf16, #tpu.memory_space<vmem>>, vector<1x64x32xbf16>
    %324 = vector.shape_cast %323 : vector<1x64x32xbf16> to vector<64x32xbf16>
    %cst_124 = arith.constant dense<0.000000e+00> : vector<8x32xf32>
    %325 = tpu.matmul %322, %324, %cst_124 {dimension_numbers = #tpu.dot_dimension_numbers<[1], [0], [0], [1], [0, 0, 1, 1], [], []>} : vector<8x64xbf16>, vector<64x32xbf16>, vector<8x32xf32> -> vector<8x32xf32>
    %c0_125 = arith.constant 0 : index
    %c0_126 = arith.constant 0 : index
    %c0_127 = arith.constant 0 : index
    %326 = vector.load %arg23[%c0_125, %c0_126, %c0_127] : memref<1x1x32xf32, #tpu.memory_space<vmem>>, vector<1x1x32xf32>
    %327 = vector.shape_cast %326 : vector<1x1x32xf32> to vector<1x32xf32>
    %328 = vector.broadcast %327 : vector<1x32xf32> to vector<8x32xf32>
    %329 = arith.addf %325, %328 : vector<8x32xf32>
    %330 = vector.broadcast %5 : vector<8x1xf32> to vector<8x32xf32>
    %331 = arith.mulf %329, %330 : vector<8x32xf32>
    %332 = arith.addf %308, %331 : vector<8x32xf32>
    %cst_128 = arith.constant dense<0.000000e+00> : vector<8xf32>
    %333 = vector.multi_reduction <add>, %332, %cst_128 [1] : vector<8x32xf32> to vector<8xf32>
    %334 = vector.shape_cast %333 : vector<8xf32> to vector<8x1xf32>
    %cst_129 = arith.constant 3.200000e+01 : f32
    %335 = vector.broadcast %cst_129 : f32 to vector<8x1xf32>
    %336 = arith.divf %334, %335 : vector<8x1xf32>
    %337 = vector.broadcast %336 : vector<8x1xf32> to vector<8x32xf32>
    %338 = arith.subf %332, %337 : vector<8x32xf32>
    %339 = arith.mulf %338, %338 : vector<8x32xf32>
    %cst_130 = arith.constant dense<0.000000e+00> : vector<8xf32>
    %340 = vector.multi_reduction <add>, %339, %cst_130 [1] : vector<8x32xf32> to vector<8xf32>
    %341 = vector.shape_cast %340 : vector<8xf32> to vector<8x1xf32>
    %cst_131 = arith.constant 3.200000e+01 : f32
    %342 = vector.broadcast %cst_131 : f32 to vector<8x1xf32>
    %343 = arith.divf %341, %342 : vector<8x1xf32>
    %344 = vector.broadcast %336 : vector<8x1xf32> to vector<8x32xf32>
    %345 = arith.subf %332, %344 : vector<8x32xf32>
    %cst_132 = arith.constant 9.99999974E-6 : f32
    %346 = vector.broadcast %cst_132 : f32 to vector<8x1xf32>
    %347 = arith.addf %343, %346 : vector<8x1xf32>
    %348 = math.rsqrt %347 : vector<8x1xf32>
    %349 = vector.broadcast %348 : vector<8x1xf32> to vector<8x32xf32>
    %350 = arith.mulf %345, %349 : vector<8x32xf32>
    %c0_133 = arith.constant 0 : index
    %c0_134 = arith.constant 0 : index
    %c0_135 = arith.constant 0 : index
    %351 = vector.load %arg24[%c0_133, %c0_134, %c0_135] : memref<1x1x32xf32, #tpu.memory_space<vmem>>, vector<1x1x32xf32>
    %352 = vector.shape_cast %351 : vector<1x1x32xf32> to vector<1x32xf32>
    %353 = vector.broadcast %352 : vector<1x32xf32> to vector<8x32xf32>
    %354 = arith.mulf %350, %353 : vector<8x32xf32>
    %c0_136 = arith.constant 0 : index
    %c0_137 = arith.constant 0 : index
    %c0_138 = arith.constant 0 : index
    %355 = vector.load %arg25[%c0_136, %c0_137, %c0_138] : memref<1x1x32xf32, #tpu.memory_space<vmem>>, vector<1x1x32xf32>
    %356 = vector.shape_cast %355 : vector<1x1x32xf32> to vector<1x32xf32>
    %357 = vector.broadcast %356 : vector<1x32xf32> to vector<8x32xf32>
    %358 = arith.addf %354, %357 : vector<8x32xf32>
    %c0_139 = arith.constant 0 : index
    %c0_140 = arith.constant 0 : index
    %359 = vector.load %arg27[%c0_139, %c0_140] : memref<8x32xf32, #tpu.memory_space<vmem>>, vector<8x32xf32>
    tpu.vector_store %arg27[%c0_139, %c0_140], %358 {strides = array<i32>} : memref<8x32xf32, #tpu.memory_space<vmem>>, vector<8x32xf32>,
    %c1_i32 = arith.constant 1 : i32
    %360 = arith.cmpi eq, %arg1, %c1_i32 : i32
    %361 = arith.extui %360 : i1 to i32
    %c0_i32_141 = arith.constant 0 : i32
    %362 = arith.cmpi ne, %361, %c0_i32_141 : i32
    scf.if %362 {
      %c0_142 = arith.constant 0 : index
      %c0_143 = arith.constant 0 : index
      %363 = vector.load %arg26[%c0_142, %c0_143] : memref<8x32xf32, #tpu.memory_space<vmem>>, vector<8x32xf32>
      tpu.vector_store %arg26[%c0_142, %c0_143], %358 {strides = array<i32>} : memref<8x32xf32, #tpu.memory_space<vmem>>, vector<8x32xf32>,
    } else {
    }
    return
  }
  func.func @transform_0(%arg0: i32, %arg1: i32) -> (i32, i32, i32) {
    %c0_i32 = arith.constant 0 : i32
    %c0_i32_0 = arith.constant 0 : i32
    %c0_i32_1 = arith.constant 0 : i32
    return %arg0, %c0_i32, %c0_i32_0 : i32, i32, i32
  }
  func.func @transform_1(%arg0: i32, %arg1: i32) -> (i32, i32, i32) {
    %c0_i32 = arith.constant 0 : i32
    %c0_i32_0 = arith.constant 0 : i32
    %c0_i32_1 = arith.constant 0 : i32
    return %arg0, %c0_i32, %c0_i32_0 : i32, i32, i32
  }
  func.func @transform_2(%arg0: i32, %arg1: i32) -> (i32, i32, i32) {
    %c0_i32 = arith.constant 0 : i32
    %c0_i32_0 = arith.constant 0 : i32
    %c0_i32_1 = arith.constant 0 : i32
    return %arg0, %c0_i32, %c0_i32_0 : i32, i32, i32
  }
  func.func @transform_3(%arg0: i32, %arg1: i32) -> (i32, i32, i32) {
    %c0_i32 = arith.constant 0 : i32
    %c0_i32_0 = arith.constant 0 : i32
    %c0_i32_1 = arith.constant 0 : i32
    return %arg0, %c0_i32, %c0_i32_0 : i32, i32, i32
  }
  func.func @transform_4(%arg0: i32, %arg1: i32) -> (i32, i32, i32) {
    %c0_i32 = arith.constant 0 : i32
    %c0_i32_0 = arith.constant 0 : i32
    %c0_i32_1 = arith.constant 0 : i32
    return %arg1, %c0_i32, %c0_i32_0 : i32, i32, i32
  }
  func.func @transform_5(%arg0: i32, %arg1: i32) -> (i32, i32, i32) {
    %c0_i32 = arith.constant 0 : i32
    %c0_i32_0 = arith.constant 0 : i32
    %c0_i32_1 = arith.constant 0 : i32
    return %arg1, %c0_i32, %c0_i32_0 : i32, i32, i32
  }
  func.func @transform_6(%arg0: i32, %arg1: i32) -> (i32, i32, i32) {
    %c0_i32 = arith.constant 0 : i32
    %c0_i32_0 = arith.constant 0 : i32
    %c0_i32_1 = arith.constant 0 : i32
    return %arg1, %c0_i32, %c0_i32_0 : i32, i32, i32
  }
  func.func @transform_7(%arg0: i32, %arg1: i32) -> (i32, i32, i32) {
    %c0_i32 = arith.constant 0 : i32
    %c0_i32_0 = arith.constant 0 : i32
    %c0_i32_1 = arith.constant 0 : i32
    return %arg1, %c0_i32, %c0_i32_0 : i32, i32, i32
  }
  func.func @transform_8(%arg0: i32, %arg1: i32) -> (i32, i32, i32) {
    %c0_i32 = arith.constant 0 : i32
    %c0_i32_0 = arith.constant 0 : i32
    %c0_i32_1 = arith.constant 0 : i32
    return %arg1, %c0_i32, %c0_i32_0 : i32, i32, i32
  }
  func.func @transform_9(%arg0: i32, %arg1: i32) -> (i32, i32, i32) {
    %c0_i32 = arith.constant 0 : i32
    %c0_i32_0 = arith.constant 0 : i32
    %c0_i32_1 = arith.constant 0 : i32
    return %arg1, %c0_i32, %c0_i32_0 : i32, i32, i32
  }
  func.func @transform_10(%arg0: i32, %arg1: i32) -> (i32, i32, i32) {
    %c0_i32 = arith.constant 0 : i32
    %c0_i32_0 = arith.constant 0 : i32
    %c0_i32_1 = arith.constant 0 : i32
    return %arg1, %c0_i32, %c0_i32_0 : i32, i32, i32
  }
  func.func @transform_11(%arg0: i32, %arg1: i32) -> (i32, i32, i32) {
    %c0_i32 = arith.constant 0 : i32
    %c0_i32_0 = arith.constant 0 : i32
    %c0_i32_1 = arith.constant 0 : i32
    return %arg1, %c0_i32, %c0_i32_0 : i32, i32, i32
  }
  func.func @transform_12(%arg0: i32, %arg1: i32) -> (i32, i32, i32) {
    %c0_i32 = arith.constant 0 : i32
    %c0_i32_0 = arith.constant 0 : i32
    %c0_i32_1 = arith.constant 0 : i32
    return %arg1, %c0_i32, %c0_i32_0 : i32, i32, i32
  }
  func.func @transform_13(%arg0: i32, %arg1: i32) -> (i32, i32, i32) {
    %c0_i32 = arith.constant 0 : i32
    %c0_i32_0 = arith.constant 0 : i32
    %c0_i32_1 = arith.constant 0 : i32
    return %arg1, %c0_i32, %c0_i32_0 : i32, i32, i32
  }
  func.func @transform_14(%arg0: i32, %arg1: i32) -> (i32, i32, i32) {
    %c0_i32 = arith.constant 0 : i32
    %c0_i32_0 = arith.constant 0 : i32
    %c0_i32_1 = arith.constant 0 : i32
    return %arg1, %c0_i32, %c0_i32_0 : i32, i32, i32
  }
  func.func @transform_15(%arg0: i32, %arg1: i32) -> (i32, i32, i32) {
    %c0_i32 = arith.constant 0 : i32
    %c0_i32_0 = arith.constant 0 : i32
    %c0_i32_1 = arith.constant 0 : i32
    return %arg1, %c0_i32, %c0_i32_0 : i32, i32, i32
  }
  func.func @transform_16(%arg0: i32, %arg1: i32) -> (i32, i32, i32) {
    %c0_i32 = arith.constant 0 : i32
    %c0_i32_0 = arith.constant 0 : i32
    %c0_i32_1 = arith.constant 0 : i32
    return %arg1, %c0_i32, %c0_i32_0 : i32, i32, i32
  }
  func.func @transform_17(%arg0: i32, %arg1: i32) -> (i32, i32, i32) {
    %c0_i32 = arith.constant 0 : i32
    %c0_i32_0 = arith.constant 0 : i32
    %c0_i32_1 = arith.constant 0 : i32
    return %arg1, %c0_i32, %c0_i32_0 : i32, i32, i32
  }
  func.func @transform_18(%arg0: i32, %arg1: i32) -> (i32, i32, i32) {
    %c0_i32 = arith.constant 0 : i32
    %c0_i32_0 = arith.constant 0 : i32
    %c0_i32_1 = arith.constant 0 : i32
    return %arg1, %c0_i32, %c0_i32_0 : i32, i32, i32
  }
  func.func @transform_19(%arg0: i32, %arg1: i32) -> (i32, i32, i32) {
    %c0_i32 = arith.constant 0 : i32
    %c0_i32_0 = arith.constant 0 : i32
    %c0_i32_1 = arith.constant 0 : i32
    return %arg1, %c0_i32, %c0_i32_0 : i32, i32, i32
  }
  func.func @transform_20(%arg0: i32, %arg1: i32) -> (i32, i32, i32) {
    %c0_i32 = arith.constant 0 : i32
    %c0_i32_0 = arith.constant 0 : i32
    %c0_i32_1 = arith.constant 0 : i32
    return %arg1, %c0_i32, %c0_i32_0 : i32, i32, i32
  }
  func.func @transform_21(%arg0: i32, %arg1: i32) -> (i32, i32, i32) {
    %c0_i32 = arith.constant 0 : i32
    %c0_i32_0 = arith.constant 0 : i32
    %c0_i32_1 = arith.constant 0 : i32
    return %arg1, %c0_i32, %c0_i32_0 : i32, i32, i32
  }
  func.func @transform_22(%arg0: i32, %arg1: i32) -> (i32, i32, i32) {
    %c0_i32 = arith.constant 0 : i32
    %c0_i32_0 = arith.constant 0 : i32
    %c0_i32_1 = arith.constant 0 : i32
    return %arg1, %c0_i32, %c0_i32_0 : i32, i32, i32
  }
  func.func @transform_23(%arg0: i32, %arg1: i32) -> (i32, i32, i32) {
    %c0_i32 = arith.constant 0 : i32
    %c0_i32_0 = arith.constant 0 : i32
    %c0_i32_1 = arith.constant 0 : i32
    return %arg1, %c0_i32, %c0_i32_0 : i32, i32, i32
  }
  func.func @transform_24(%arg0: i32, %arg1: i32) -> (i32, i32) {
    %c0_i32 = arith.constant 0 : i32
    %c0_i32_0 = arith.constant 0 : i32
    return %arg0, %c0_i32 : i32, i32
  }
}

</mosaic_0001>

<bundles_post_ra>
// kernel: tran_dec_forward.1
= control target key start
LH: loop header
LB: loop body
LE: loop exit
PB: predicated region body
PF: predicated region fallthrough
CT: control target
= control target key end

     0   :  { %s7827_s0 = inlined_call_operand.vmem [shape: f32[2,8,32], index: 0, kind: input, shape index: {}]   ;;  %s7828_s1 = inlined_call_operand.vmem [shape: bf16[2,8,32], index: 1, kind: input, shape index: {}]   ;;  %s7829_s2 = inlined_call_operand.vmem [shape: f32[2,8,1], index: 2, kind: input, shape index: {}]   ;;  %s7830_s3 = inlined_call_operand.vmem [shape: f32[2,1,8], index: 3, kind: input, shape index: {}]   ;;  %s7831_s4 = inlined_call_operand.vmem [shape: bf16[2,32,96], index: 4, kind: input, shape index: {}]   ;;  %s7832_s5 = inlined_call_operand.hbm [shape: f32[2,1,96], index: 5, kind: input, shape index: {}]   ;;  %s7833_s6 = inlined_call_operand.vmem [shape: bf16[2,32,32], index: 6, kind: input, shape index: {}]   ;;  %s7834_s7 = inlined_call_operand.hbm [shape: f32[2,1,32], index: 7, kind: input, shape index: {}]   ;;  %s7835_s8 = inlined_call_operand.hbm [shape: f32[2,1,32], index: 8, kind: input, shape index: {}]   ;;  %s7836_s9 = inlined_call_operand.hbm [shape: f32[2,1,32], index: 9, kind: input, shape index: {}]   ;;  %s7837_s10 = inlined_call_operand.vmem [shape: bf16[2,32,32], index: 10, kind: input, shape index: {}]   ;;  %s7838_s11 = inlined_call_operand.hbm [shape: f32[2,1,32], index: 11, kind: input, shape index: {}]   ;;  %s7839_s12 = inlined_call_operand.vmem [shape: bf16[2,32,64], index: 12, kind: input, shape index: {}]   ;;  %s7840_s13 = inlined_call_operand.hbm [shape: f32[2,1,64], index: 13, kind: input, shape index: {}]   ;;  %s7841_s14 = inlined_call_operand.vmem [shape: bf16[2,32,32], index: 14, kind: input, shape index: {}]   ;;  %s7842_s15 = inlined_call_operand.hbm [shape: f32[2,1,32], index: 15, kind: input, shape index: {}]   ;;  %s7843_s16 = inlined_call_operand.hbm [shape: f32[2,1,32], index: 16, kind: input, shape index: {}]   ;;  %s7844_s17 = inlined_call_operand.hbm [shape: f32[2,1,32], index: 17, kind: input, shape index: {}]   ;;  %s7845_s18 = inlined_call_operand.hbm [shape: bf16[2,32,64], index: 18, kind: input, shape index: {}]   ;;  %s7846_s19 = inlined_call_operand.hbm [shape: f32[2,1,64], index: 19, kind: input, shape index: {}]   ;;  %s7847_s20 = inlined_call_operand.vmem [shape: bf16[2,64,32], index: 20, kind: input, shape index: {}]   ;;  %s7848_s21 = inlined_call_operand.hbm [shape: f32[2,1,32], index: 21, kind: input, shape index: {}]   ;;  %s7849_s22 = inlined_call_operand.hbm [shape: f32[2,1,32], index: 22, kind: input, shape index: {}]   ;;  %s7850_s23 = inlined_call_operand.hbm [shape: f32[2,1,32], index: 23, kind: input, shape index: {}]   ;;  %s7851_s24 = inlined_call_operand.hbm [shape: f32[16,32], index: 24, kind: output, shape index: {}]  }
   0x1   :  { %7876 = sst [smem:[#allocation52_spill]] %s7827_s0 }
   0x2   :  { %7877 = sst [smem:[#allocation53_spill]] %s7828_s1 }
   0x3   :  { %7878 = sst [smem:[#allocation54_spill]] %s7829_s2 }
   0x4   :  { %7879 = sst [smem:[#allocation55_spill]] %s7830_s3 }
   0x5   :  { %7880 = sst [smem:[#allocation56_spill]] %s7831_s4 }
   0x6   :  { %7881 = sst [smem:[#allocation57_spill]] %s7832_s5 }
   0x7   :  { %7882 = sst [smem:[#allocation58_spill]] %s7833_s6 }
   0x8   :  { %7883 = sst [smem:[#allocation59_spill]] %s7834_s7 }
   0x9   :  { %7884 = sst [smem:[#allocation60_spill]] %s7835_s8 }
   0xa   :  { %7885 = sst [smem:[#allocation61_spill]] %s7836_s9 }
   0xb   :  { %7886 = sst [smem:[#allocation62_spill]] %s7837_s10 }
   0xc   :  { %7887 = sst [smem:[#allocation63_spill]] %s7838_s11 }
   0xd   :  { %7888 = sst [smem:[#allocation64_spill]] %s7839_s12 }
   0xe   :  { %7889 = sst [smem:[#allocation65_spill]] %s7840_s13 }
   0xf   :  { %7890 = sst [smem:[#allocation66_spill]] %s7841_s14 }
  0x10   :  { %7891 = sst [smem:[#allocation67_spill]] %s7842_s15 }
  0x11   :  { %7892 = sst [smem:[#allocation68_spill]] %s7843_s16 }
  0x12   :  { %7893 = sst [smem:[#allocation69_spill]] %s7844_s17 }
  0x13   :  { %7894 = sst [smem:[#allocation70_spill]] %s7845_s18 }
  0x14   :  { %7895 = sst [smem:[#allocation71_spill]] %s7846_s19 }
  0x15   :  { %7896 = sst [smem:[#allocation72_spill]] %s7847_s20 }
  0x16   :  { %7897 = sst [smem:[#allocation73_spill]] %s7848_s21 }
  0x17   :  { %7898 = sst [smem:[#allocation74_spill]] %s7849_s22 }
  0x18   :  { %7899 = sst [smem:[#allocation75_spill]] %s7850_s23 }
  0x19   :  { %7900 = sst [smem:[#allocation76_spill]] %s7851_s24 }
  0x1a   :  { %29 = vsyncpa [#allocation4], 0 }
  0x1b   :  { %31 = vsyncpa [#allocation4 + $0x1], 0 }
  0x1c   :  { %32 = vsyncpa [#allocation7], 0 }
  0x1d   :  { %34 = vsyncpa [#allocation7 + $0x1], 0 }
  0x1e   :  { %35 = vsyncpa [#allocation10], 0 }
  0x1f   :  { %37 = vsyncpa [#allocation10 + $0x1], 0 }
  0x20   :  { %38 = vsyncpa [#allocation13], 0 }
  0x21   :  { %40 = vsyncpa [#allocation13 + $0x1], 0 }
  0x22   :  { %41 = vsyncpa [#allocation16], 0 }
  0x23   :  { %43 = vsyncpa [#allocation16 + $0x1], 0 }
  0x24   :  { %44 = vsyncpa [#allocation19], 0 }
  0x25   :  { %46 = vsyncpa [#allocation19 + $0x1], 0 }
  0x26   :  { %47 = vsyncpa [#allocation22], 0 }
  0x27   :  { %49 = vsyncpa [#allocation22 + $0x1], 0 }
  0x28   :  { %50 = vsyncpa [#allocation25], 0 }
  0x29   :  { %52 = vsyncpa [#allocation25 + $0x1], 0 }
  0x2a   :  { %53 = vsyncpa [#allocation5], 0 }
  0x2b   :  { %55 = vsyncpa [#allocation5 + $0x1], 0  ;;  %s6421_s5 = smov 0   ;;  %s6423_s26 = smov 0  }
  0x2c   :  { %s6425_s27 = smov 0   ;;  %s6427_s28 = smov 0  }
  0x2d   :  { %s6429_s6 = smov 0   ;;  %s6431_s2 = smov 0  }
  0x2e   :  { %s6433_s29 = smov 0   ;;  %s6435_s0 = smov 0  }
  0x2f   :  { %s6437_s7 = smov 0   ;;  %s6439_s30 = smov 0  }
  0x30   :  { %s6441_s3 = smov 0  }
  0x31 LB: > { %7901 = sst [smem:[#allocation36_spill]] %s6220_s5  ;;  %s6475_s25 = sadd.s32 4294967295, %s6260_s3   ;;  %s6260_s3 = sphi %s6441_s3, %s61_s3   ;;  %s6256_s30 = sphi %s6439_s30, %s8011_s30   ;;  %s6252_s7 = sphi %s6437_s7, %s8010_s7   ;;  %s6248_s0 = sphi %s6435_s0, %s8004_s0   ;;  %s6244_s29 = sphi %s6433_s29, %s8009_s29   ;;  %s6240_s2 = sphi %s6431_s2, %s8003_s2   ;;  %s6236_s6 = sphi %s6429_s6, %s8008_s6   ;;  %s6232_s28 = sphi %s6427_s28, %s8007_s28   ;;  %s6228_s27 = sphi %s6425_s27, %s8001_s27   ;;  %s6224_s26 = sphi %s6423_s26, %s8000_s26   ;;  %s6220_s5 = sphi %s6421_s5, %s7999_s5  }
  0x32   : > { %7902 = sst [smem:[#allocation37_spill]] %s6224_s26  ;;  %s5107_s8 = sadd.s32 4294967294, %s6260_s3  }
  0x33   : > { %7903 = sst [smem:[#allocation38_spill]] %s6228_s27  ;;  %s70_s4 = sadd.s32 1, %s6252_s7 }
  0x34   : > { %7904 = sst [smem:[#allocation39_spill]] %s6240_s2  ;;  %s73_s1 = sadd.s32 1, %s6256_s30 }
  0x35   : > { %7905 = sst [smem:[#allocation40_spill]] %s6244_s29  ;;  %p71_p0 = scmp.ge.s32.totalorder %s70_s4, 2 }
  0x36   : > { %7906 = sst [smem:[#allocation41_spill]] %s6248_s0  ;;  %s210_s24 = sadd.s32 1, %s6240_s2 }
  0x37   : > { %7907 = sst [smem:[#allocation42_spill]] %s6256_s30  ;;  %p217_p1 = scmp.ne.s32.totalorder %s6240_s2, %s6236_s6 }
  0x38   : > { %7908 = sst [smem:[#allocation43_spill]] %s6260_s3  ;;  %p218_p2 = scmp.eq.s32.totalorder %s6260_s3, 0 }
  0x39   : > { %7909 = sst [smem:[#allocation44_spill]] %s6475_s25  ;;  %s8013_s4 = smov (%p71_p0, %s70_s4), 0 }
  0x3a   : > { %7910 = sst [smem:[#allocation45_spill]] %s8013_s4  ;;  %s8015_s1 = smov (!%p71_p0, %s73_s1), %s6256_s30 }
  0x3b   : > { %s207_s20 = ssub.s32 %s6252_s7, %s8013_s4  ;;  %p6489_p3 = por %p218_p2, %p217_p1 }
  0x3c   : > { %p75_p4 = scmp.ge.s32.totalorder %s8015_s1, 2  ;;  %p208_p5 = scmp.eq.s32.totalorder %s207_s20, 0 }
  0x3d   : > { %p223_p6 = scmp.ne.s32.totalorder %s6236_s6, %s6232_s28  ;;  %p224_p7 = scmp.eq.s32.totalorder %s6475_s25, 0 }
  0x3e   : > { %s8017_s1 = smov (%p75_p4, %s8015_s1), 0  ;;  %s704_s29 = sadd.s32 1, %s6228_s27 }
  0x3f   : > { %7912 = sst [smem:[#allocation46_spill]] %s8017_s1  ;;  %p6500_p8 = por %p224_p7, %p223_p6 }
  0x40   : > { %s6498_s12 = scalar_select %p208_p5, %s6240_s2, %s210_s24  }
  0x41   : > { %s7914_s4 = scalar_select %p6500_p8, 1, 0 }
  0x42   : > { %7913 = sst [smem:[#allocation47_spill]] %s6498_s12  ;;  %s701_s10 = ssub.s32 %s6256_s30, %s8017_s1 }
  0x43   : > { %7915 = sst [smem:[#allocation48_spill]] %s7914_s4  ;;  %p702_p9 = scmp.eq.s32.totalorder %s701_s10, 0 }
  0x44   : > { %p714_p10 = scmp.ne.s32.totalorder %s6228_s27, %s6224_s26  ;;  %p715_p11 = scmp.eq.s32.totalorder %s6475_s25, 3 }
  0x45   : > { %s6511_s20 = scalar_select %p702_p9, %s6228_s27, %s704_s29  }
  0x46   : > { %p6513_p12 = por %p715_p11, %p714_p10  ;;  %p720_p13 = scmp.ne.s32.totalorder %s6224_s26, %s6220_s5 }
  0x47   : > { %7916 = sst [smem:[#allocation49_spill]] %s6511_s20  ;;  %p721_p0 = scmp.eq.s32.totalorder %s5107_s8, 3 }
  0x48   : > { %s7917_s28 = scalar_select %p6513_p12, 1, 0 }
  0x49   : > { %p5497_p1 = scmp.lt.s32.totalorder %s6260_s3, 4  ;;  %s6521_s24 = sand.u32 1, %s6240_s2  }
  0x4a   : > { %7918 = sst [smem:[#allocation50_spill]] %s7917_s28  ;;  %p6523_p2 = por %p721_p0, %p720_p13 }
  0x4b   : > { %s6528_s10 = sshll.u32 %s6252_s7, 4  ;;  %p6532_p4 = pnand %p5497_p1, %p6489_p3 }
  0x4c   : > { %s7919_s1 = scalar_select %p6523_p2, 1, 0 }
  0x4d   : > { %s6537_s30 = sand.u32 1, %s6260_s3   ;;  %s7922_s2 = sld [smem:[#allocation59_spill]] }
  0x4e   : > { %7920 = sst [smem:[#allocation51_spill]] %s7919_s1  ;;  %s804_s27 = scalar_lea.vmem [#allocation6], %s6521_s24 }
  0x4f   : > { %s811_s5 = sshll.u32 %s804_s27, 4  ;;  %p5126_p5 = scmp.ge.s32.totalorder %s6260_s3, 1  ;;  %s812_s5 = int_to_ptr.vmem [resolvable:$true] %s811_s5 }
  0x50   : > { %p1056_p6 = scmp.lt.s32.totalorder %s6260_s3, 5  ;;  %s7867_s1 = scalar_lea.sflag [#allocation7], %s6537_s30 }
  0x51   : > { %p6549_p7 = pneg %p6532_p4  ;;  %s5733_s28 = scalar_lea.vmem %s812_s5, 16 }
  0x52   : > { %p5734_p3 = scmp.ne.s32.totalorder %s812_s5, %s5733_s28  ;;  %s6262_s12 = smov [#allocation6]  }
  0x53   : > { %s809_s20 = scalar_lea.hbm %s7922_s2, %s6528_s10  ;;  %s5738_s8 = sshll.u32 %s6262_s12, 4  ;;  %s5739_s8 = int_to_ptr.vmem [resolvable:$false] %s5738_s8 }
  0x54   : > { %p5736_p9 = pnand %p5734_p3, %p6549_p7  ;;  %s5740_s2 = scalar_lea.vmem %s5739_s8, 32 }
  0x55   : > { %p5741_p11 = scmp.lt.s32.totalorder %s812_s5, %s5739_s8  ;;  %p5742_p13 = scmp.lt.s32.totalorder %s5740_s2, %s5733_s28 }
  0x56   : > { %p5737_p10 = pneg %p5736_p9 }
  0x57   : > { %p5743_p0 = por %p5742_p13, %p5741_p11 }
  0x59   : > { %p5744_p1 = pnand %p5743_p0, %p5737_p10 }
  0x5b   : > { %5747 = shalt.err (!%p5744_p1)
}
  0x5c   : > { %5456 = dma.hbm_to_vmem [thread:$0]  (!%p6532_p4), %s809_s20, 16, %s812_s5, %s7867_s1  }
  0x5d   : > { %p6563_p3 = pnand %p5126_p5, %p1056_p6  ;;  %s7925_s9 = sld [smem:[#allocation61_spill]] }
  0x5e   : > { %s838_s2 = scalar_lea.vmem [#allocation9], %s6521_s24  ;;  %s7872_s26 = scalar_lea.sflag [#allocation10], %s6537_s30 }
  0x5f   : > { %s845_s0 = sshll.u32 %s838_s2, 4  ;;  %s6263_s5 = smov [#allocation9]   ;;  %s846_s0 = int_to_ptr.vmem [resolvable:$true] %s845_s0 }
  0x60   : > { %s5761_s25 = scalar_lea.vmem %s846_s0, 16  ;;  %s5766_s20 = sshll.u32 %s6263_s5, 4  ;;  %s5767_s20 = int_to_ptr.vmem [resolvable:$false] %s5766_s20 }
  0x61   : > { %p5762_p9 = scmp.ne.s32.totalorder %s846_s0, %s5761_s25  ;;  %s5768_s1 = scalar_lea.vmem %s5767_s20, 32 }
  0x62   : > { %p5769_p5 = scmp.lt.s32.totalorder %s846_s0, %s5767_s20  ;;  %p5770_p6 = scmp.lt.s32.totalorder %s5768_s1, %s5761_s25 }
  0x63   : > { %s843_s8 = scalar_lea.hbm %s7925_s9, %s6528_s10  ;;  %p5764_p10 = pnand %p5762_p9, %p6549_p7 }
  0x64   : > { %p5771_p13 = por %p5770_p6, %p5769_p5 }
  0x65   : > { %p5765_p11 = pneg %p5764_p10 }
  0x67   : > { %p5772_p0 = pnand %p5771_p13, %p5765_p11 }
  0x69   : > { %5775 = shalt.err (!%p5772_p0)
}
  0x6a   : > { %5462 = dma.hbm_to_vmem [thread:$0]  (!%p6532_p4), %s843_s8, 16, %s846_s0, %s7872_s26  }
  0x6b   : > { %s7926_s13 = sld [smem:[#allocation65_spill]]  ;;  %s888_s5 = scalar_lea.vmem [#allocation12], %s6521_s24 }
  0x6c   : > { %s895_s9 = sshll.u32 %s888_s5, 4  ;;  %s7873_s25 = scalar_lea.sflag [#allocation13], %s6537_s30  ;;  %s896_s9 = int_to_ptr.vmem [resolvable:$true] %s895_s9 }
  0x6d   : > { %s5789_s1 = scalar_lea.vmem %s896_s9, 16  ;;  %s6264_s20 = smov [#allocation12]  }
  0x6e   : > { %p5790_p1 = scmp.ne.s32.totalorder %s896_s9, %s5789_s1  ;;  %s5794_s3 = sshll.u32 %s6264_s20, 4  ;;  %s5795_s3 = int_to_ptr.vmem [resolvable:$false] %s5794_s3 }
  0x6f   : > { %s5796_s4 = scalar_lea.vmem %s5795_s3, 32  ;;  %p5797_p11 = scmp.lt.s32.totalorder %s896_s9, %s5795_s3 }
  0x70   : > { %p5792_p9 = pnand %p5790_p1, %p6549_p7  ;;  %p5798_p5 = scmp.lt.s32.totalorder %s5796_s4, %s5789_s1 }
  0x71   : > { %s893_s2 = scalar_lea.hbm %s7926_s13, %s6528_s10 }
  0x72   : > { %p5793_p10 = pneg %p5792_p9  ;;  %p5799_p6 = por %p5798_p5, %p5797_p11 }
  0x74   : > { %p5800_p13 = pnand %p5799_p6, %p5793_p10 }
  0x76   : > { %5803 = shalt.err (!%p5800_p13)
}
  0x77   : > { %5468 = dma.hbm_to_vmem [thread:$0]  (!%p6532_p4), %s893_s2, 16, %s896_s9, %s7873_s25  }
  0x78   : > { %s7927_s16 = sld [smem:[#allocation68_spill]]  ;;  %s930_s12 = scalar_lea.vmem [#allocation15], %s6521_s24 }
  0x79   : > { %s937_s3 = sshll.u32 %s930_s12, 4  ;;  %s5119_s4 = sshll.u32 %s6521_s24, 4  ;;  %s938_s3 = int_to_ptr.vmem [resolvable:$true] %s937_s3 }
  0x7a   : > { %s7874_s5 = scalar_lea.sflag [#allocation16], %s6537_s30  ;;  %s5817_s1 = scalar_lea.vmem %s938_s3, 16 }
  0x7b   : > { %p5818_p0 = scmp.ne.s32.totalorder %s938_s3, %s5817_s1  ;;  %s6265_s20 = smov [#allocation15]  }
  0x7c   : > { %s5822_s26 = sshll.u32 %s6265_s20, 4  ;;  %s5823_s26 = int_to_ptr.vmem [resolvable:$false] %s5822_s26 }
  0x7d   : > { %p5820_p1 = pnand %p5818_p0, %p6549_p7  ;;  %s5824_s13 = scalar_lea.vmem %s5823_s26, 32 }
  0x7e   : > { %s935_s28 = scalar_lea.hbm %s7927_s16, %s6528_s10  ;;  %p5825_p10 = scmp.lt.s32.totalorder %s938_s3, %s5823_s26 }
  0x7f   : > { %p5821_p9 = pneg %p5820_p1  ;;  %p5826_p11 = scmp.lt.s32.totalorder %s5824_s13, %s5817_s1 }
  0x81   : > { %p5827_p5 = por %p5826_p11, %p5825_p10 }
  0x83   : > { %p5828_p6 = pnand %p5827_p5, %p5821_p9 }
  0x85   : > { %5831 = shalt.err (!%p5828_p6)
}
  0x86   : > { %5474 = dma.hbm_to_vmem [thread:$0]  (!%p6532_p4), %s935_s28, 16, %s938_s3, %s7874_s5  }
  0x87   : > { %s5202_s9 = sshll.u32 %s6252_s7, 8  ;;  %s7928_s18 = sld [smem:[#allocation70_spill]] }
  0x88   : > { %s965_s12 = scalar_lea.vmem [#allocation18], %s5119_s4  ;;  %s962_s13 = scalar_lea.sflag [#allocation19], %s6537_s30 }
  0x89   : > { %s972_s20 = sshll.u32 %s965_s12, 4  ;;  %s6266_s1 = smov [#allocation18]   ;;  %s973_s20 = int_to_ptr.vmem [resolvable:$true] %s972_s20 }
  0x8a   : > { %s5845_s26 = scalar_lea.vmem %s973_s20, 256  ;;  %s5850_s25 = sshll.u32 %s6266_s1, 4  ;;  %s5851_s25 = int_to_ptr.vmem [resolvable:$false] %s5850_s25 }
  0x8b   : > { %p5846_p13 = scmp.ne.s32.totalorder %s973_s20, %s5845_s26  ;;  %s5852_s16 = scalar_lea.vmem %s5851_s25, 512 }
  0x8c   : > { %p5853_p9 = scmp.lt.s32.totalorder %s973_s20, %s5851_s25  ;;  %p5854_p10 = scmp.lt.s32.totalorder %s5852_s16, %s5845_s26 }
  0x8d   : > { %s971_s8 = scalar_lea.hbm %s7928_s18, %s5202_s9  ;;  %p5848_p0 = pnand %p5846_p13, %p6549_p7 }
  0x8e   : > { %p5855_p11 = por %p5854_p10, %p5853_p9 }
  0x8f   : > { %p5849_p1 = pneg %p5848_p0 }
  0x91   : > { %p5856_p5 = pnand %p5855_p11, %p5849_p1 }
  0x93   : > { %5859 = shalt.err (!%p5856_p5)
}
  0x94   : > { %s6267_s28 = smov 64   ;;  %s6268_s3 = smov 4  }
  0x95   : > { %5480 = dma.hbm_to_vmem [thread:$0]  (!%p6532_p4), %s971_s8, 256, %s973_s20, %s962_s13, %s6267_s28, %s6267_s28, %s6268_s3  }
  0x96   : > { %s7929_s21 = sld [smem:[#allocation73_spill]]  ;;  %s1010_s25 = scalar_lea.vmem [#allocation21], %s6521_s24 }
  0x97   : > { %s1017_s16 = sshll.u32 %s1010_s25, 4  ;;  %s1008_s0 = scalar_lea.sflag [#allocation22], %s6537_s30  ;;  %s1018_s16 = int_to_ptr.vmem [resolvable:$true] %s1017_s16 }
  0x98   : > { %s5873_s12 = scalar_lea.vmem %s1018_s16, 16  ;;  %s6269_s26 = smov [#allocation21]  }
  0x99   : > { %p5874_p6 = scmp.ne.s32.totalorder %s1018_s16, %s5873_s12  ;;  %s5878_s1 = sshll.u32 %s6269_s26, 4  ;;  %s5879_s1 = int_to_ptr.vmem [resolvable:$false] %s5878_s1 }
  0x9a   : > { %s5880_s5 = scalar_lea.vmem %s5879_s1, 32  ;;  %p5881_p1 = scmp.lt.s32.totalorder %s1018_s16, %s5879_s1 }
  0x9b   : > { %p5876_p13 = pnand %p5874_p6, %p6549_p7  ;;  %p5882_p9 = scmp.lt.s32.totalorder %s5880_s5, %s5873_s12 }
  0x9c   : > { %s1015_s2 = scalar_lea.hbm %s7929_s21, %s6528_s10 }
  0x9d   : > { %p5877_p0 = pneg %p5876_p13  ;;  %p5883_p10 = por %p5882_p9, %p5881_p1 }
  0x9f   : > { %p5884_p11 = pnand %p5883_p10, %p5877_p0 }
  0xa1   : > { %5887 = shalt.err (!%p5884_p11)
}
  0xa2   : > { %5486 = dma.hbm_to_vmem [thread:$0]  (!%p6532_p4), %s1015_s2, 16, %s1018_s16, %s1008_s0  }
  0xa3   : > { %s7930_s28 = sld [smem:[#allocation57_spill]]  ;;  %s779_s4 = scalar_lea.vmem [#allocation3], %s6521_s24 }
  0xa4   : > { %s786_s9 = sshll.u32 %s779_s4, 4  ;;  %s777_s5 = scalar_lea.sflag [#allocation4], %s6521_s24  ;;  %s787_s9 = int_to_ptr.vmem [resolvable:$true] %s786_s9 }
  0xa5   : > { %s5901_s25 = scalar_lea.vmem %s787_s9, 16  ;;  %s6270_s12 = smov [#allocation3]  }
  0xa6   : > { %p5902_p5 = scmp.ne.s32.totalorder %s787_s9, %s5901_s25  ;;  %s5906_s26 = sshll.u32 %s6270_s12, 4  ;;  %s5907_s26 = int_to_ptr.vmem [resolvable:$false] %s5906_s26 }
  0xa7   : > { %s5908_s1 = scalar_lea.vmem %s5907_s26, 32  ;;  %p5909_p0 = scmp.lt.s32.totalorder %s787_s9, %s5907_s26 }
  0xa8   : > { %p5904_p6 = pnand %p5902_p5, %p6549_p7  ;;  %p5910_p1 = scmp.lt.s32.totalorder %s5908_s1, %s5901_s25 }
  0xa9   : > { %s784_s3 = scalar_lea.hbm %s7930_s28, %s6528_s10 }
  0xaa   : > { %p5905_p13 = pneg %p5904_p6  ;;  %p5911_p9 = por %p5910_p1, %p5909_p0 }
  0xac   : > { %p5912_p10 = pnand %p5911_p9, %p5905_p13 }
  0xae   : > { %5915 = shalt.err (!%p5912_p10)
}
  0xaf   : > { %5453 = dma.hbm_to_vmem [thread:$0]  (!%p6532_p4), %s784_s3, 16, %s787_s9, %s777_s5  }
  0xb0   : > { %s7931_s8 = sld [smem:[#allocation60_spill]]  ;;  %s821_s28 = scalar_lea.vmem [#allocation8], %s6521_s24 }
  0xb1   : > { %s828_s4 = sshll.u32 %s821_s28, 4  ;;  %s6271_s25 = smov [#allocation8]   ;;  %s829_s4 = int_to_ptr.vmem [resolvable:$true] %s828_s4 }
  0xb2   : > { %s5929_s12 = scalar_lea.vmem %s829_s4, 16  ;;  %s5934_s26 = sshll.u32 %s6271_s25, 4  ;;  %s5935_s26 = int_to_ptr.vmem [resolvable:$false] %s5934_s26 }
  0xb3   : > { %p5930_p11 = scmp.ne.s32.totalorder %s829_s4, %s5929_s12  ;;  %s5936_s1 = scalar_lea.vmem %s5935_s26, 32 }
  0xb4   : > { %p5937_p13 = scmp.lt.s32.totalorder %s829_s4, %s5935_s26  ;;  %p5938_p0 = scmp.lt.s32.totalorder %s5936_s1, %s5929_s12 }
  0xb5   : > { %p5932_p5 = pnand %p5930_p11, %p6549_p7 }
  0xb6   : > { %s826_s20 = scalar_lea.hbm %s7931_s8, %s6528_s10  ;;  %p5939_p1 = por %p5938_p0, %p5937_p13 }
  0xb7   : > { %p5933_p6 = pneg %p5932_p5 }
  0xb9   : > { %p5940_p9 = pnand %p5939_p1, %p5933_p6 }
  0xbb   : > { %5943 = shalt.err (!%p5940_p9)
}
  0xbc   : > { %s7932_s3 = scalar_lea.sflag [#allocation7], %s6537_s30  ;;  %s7933_s11 = sld [smem:[#allocation63_spill]] }
  0xbd   : > { %5459 = dma.hbm_to_vmem [thread:$0]  (!%p6532_p4), %s826_s20, 16, %s829_s4, %s7932_s3  }
  0xbe   : > { %s863_s16 = scalar_lea.vmem [#allocation11], %s6521_s24  ;;  %s6272_s12 = smov [#allocation11]  }
  0xbf   : > { %s870_s8 = sshll.u32 %s863_s16, 4  ;;  %s5962_s25 = sshll.u32 %s6272_s12, 4  ;;  %s871_s8 = int_to_ptr.vmem [resolvable:$true] %s870_s8  ;;  %s5963_s25 = int_to_ptr.vmem [resolvable:$false] %s5962_s25 }
  0xc0   : > { %s5957_s28 = scalar_lea.vmem %s871_s8, 16  ;;  %s5964_s26 = scalar_lea.vmem %s5963_s25, 32 }
  0xc1   : > { %p5958_p10 = scmp.ne.s32.totalorder %s871_s8, %s5957_s28  ;;  %p5965_p6 = scmp.lt.s32.totalorder %s871_s8, %s5963_s25 }
  0xc2   : > { %s868_s2 = scalar_lea.hbm %s7933_s11, %s6528_s10  ;;  %p5966_p13 = scmp.lt.s32.totalorder %s5964_s26, %s5957_s28 }
  0xc3   : > { %p5960_p11 = pnand %p5958_p10, %p6549_p7 }
  0xc4   : > { %p5967_p0 = por %p5966_p13, %p5965_p6 }
  0xc5   : > { %p5961_p5 = pneg %p5960_p11 }
  0xc7   : > { %p5968_p1 = pnand %p5967_p0, %p5961_p5 }
  0xc9   : > { %5971 = shalt.err (!%p5968_p1)
}
  0xca   : > { %s7934_s20 = scalar_lea.sflag [#allocation10], %s6537_s30  ;;  %s7935_s15 = sld [smem:[#allocation67_spill]] }
  0xcb   : > { %5465 = dma.hbm_to_vmem [thread:$0]  (!%p6532_p4), %s868_s2, 16, %s871_s8, %s7934_s20  }
  0xcc   : > { %s913_s9 = scalar_lea.vmem [#allocation14], %s6521_s24  ;;  %s6273_s28 = smov [#allocation14]  }
  0xcd   : > { %s920_s5 = sshll.u32 %s913_s9, 4  ;;  %s5990_s12 = sshll.u32 %s6273_s28, 4  ;;  %s921_s5 = int_to_ptr.vmem [resolvable:$true] %s920_s5  ;;  %s5991_s12 = int_to_ptr.vmem [resolvable:$false] %s5990_s12 }
  0xce   : > { %s5985_s16 = scalar_lea.vmem %s921_s5, 16  ;;  %s5992_s25 = scalar_lea.vmem %s5991_s12, 32 }
  0xcf   : > { %p5986_p9 = scmp.ne.s32.totalorder %s921_s5, %s5985_s16  ;;  %p5993_p5 = scmp.lt.s32.totalorder %s921_s5, %s5991_s12 }
  0xd0   : > { %s918_s3 = scalar_lea.hbm %s7935_s15, %s6528_s10  ;;  %p5994_p6 = scmp.lt.s32.totalorder %s5992_s25, %s5985_s16 }
  0xd1   : > { %p5988_p10 = pnand %p5986_p9, %p6549_p7 }
  0xd2   : > { %p5995_p13 = por %p5994_p6, %p5993_p5 }
  0xd3   : > { %p5989_p11 = pneg %p5988_p10 }
  0xd5   : > { %p5996_p0 = pnand %p5995_p13, %p5989_p11 }
  0xd7   : > { %5999 = shalt.err (!%p5996_p0)
}
  0xd8   : > { %s7936_s2 = scalar_lea.sflag [#allocation13], %s6537_s30  ;;  %s7937_s17 = sld [smem:[#allocation69_spill]] }
  0xd9   : > { %5471 = dma.hbm_to_vmem [thread:$0]  (!%p6532_p4), %s918_s3, 16, %s921_s5, %s7936_s2  }
  0xda   : > { %s947_s4 = scalar_lea.vmem [#allocation17], %s6521_s24  ;;  %s6274_s16 = smov [#allocation17]  }
  0xdb   : > { %s954_s1 = sshll.u32 %s947_s4, 4  ;;  %s6018_s28 = sshll.u32 %s6274_s16, 4  ;;  %s955_s1 = int_to_ptr.vmem [resolvable:$true] %s954_s1  ;;  %s6019_s28 = int_to_ptr.vmem [resolvable:$false] %s6018_s28 }
  0xdc   : > { %s6013_s9 = scalar_lea.vmem %s955_s1, 16  ;;  %s6020_s12 = scalar_lea.vmem %s6019_s28, 32 }
  0xdd   : > { %p6014_p1 = scmp.ne.s32.totalorder %s955_s1, %s6013_s9  ;;  %p6021_p11 = scmp.lt.s32.totalorder %s955_s1, %s6019_s28 }
  0xde   : > { %s952_s20 = scalar_lea.hbm %s7937_s17, %s6528_s10  ;;  %p6022_p5 = scmp.lt.s32.totalorder %s6020_s12, %s6013_s9 }
  0xdf   : > { %p6016_p9 = pnand %p6014_p1, %p6549_p7 }
  0xe0   : > { %p6023_p6 = por %p6022_p5, %p6021_p11 }
  0xe1   : > { %p6017_p10 = pneg %p6016_p9 }
  0xe3   : > { %p6024_p13 = pnand %p6023_p6, %p6017_p10 }
  0xe5   : > { %6027 = shalt.err (!%p6024_p13)
}
  0xe6   : > { %s7938_s3 = scalar_lea.sflag [#allocation16], %s6537_s30  ;;  %s7939_s19 = sld [smem:[#allocation71_spill]] }
  0xe7   : > { %5477 = dma.hbm_to_vmem [thread:$0]  (!%p6532_p4), %s952_s20, 16, %s955_s1, %s7938_s3  }
  0xe8   : > { %s985_s8 = scalar_lea.vmem [#allocation20], %s6521_s24  ;;  %s6275_s9 = smov [#allocation20]  }
  0xe9   : > { %s992_s26 = sshll.u32 %s985_s8, 4  ;;  %s6046_s16 = sshll.u32 %s6275_s9, 4  ;;  %s993_s26 = int_to_ptr.vmem [resolvable:$true] %s992_s26  ;;  %s6047_s16 = int_to_ptr.vmem [resolvable:$false] %s6046_s16 }
  0xea   : > { %s6041_s4 = scalar_lea.vmem %s993_s26, 16  ;;  %s6048_s28 = scalar_lea.vmem %s6047_s16, 32 }
  0xeb   : > { %p6042_p0 = scmp.ne.s32.totalorder %s993_s26, %s6041_s4  ;;  %p6049_p10 = scmp.lt.s32.totalorder %s993_s26, %s6047_s16 }
  0xec   : > { %s990_s2 = scalar_lea.hbm %s7939_s19, %s6528_s10  ;;  %p6050_p11 = scmp.lt.s32.totalorder %s6048_s28, %s6041_s4 }
  0xed   : > { %p6044_p1 = pnand %p6042_p0, %p6549_p7 }
  0xee   : > { %p6051_p5 = por %p6050_p11, %p6049_p10 }
  0xef   : > { %p6045_p9 = pneg %p6044_p1 }
  0xf1   : > { %p6052_p6 = pnand %p6051_p5, %p6045_p9 }
  0xf3   : > { %6055 = shalt.err (!%p6052_p6)
}
  0xf4   : > { %5483 = dma.hbm_to_vmem [thread:$0]  (!%p6532_p4), %s990_s2, 16, %s993_s26, %s962_s13  }
  0xf5   : > { %s7940_s22 = sld [smem:[#allocation74_spill]]  ;;  %s1027_s3 = scalar_lea.vmem [#allocation23], %s6521_s24 }
  0xf6   : > { %s1034_s5 = sshll.u32 %s1027_s3, 4  ;;  %s6276_s8 = smov [#allocation23]   ;;  %s1035_s5 = int_to_ptr.vmem [resolvable:$true] %s1034_s5 }
  0xf7   : > { %s6069_s25 = scalar_lea.vmem %s1035_s5, 16  ;;  %s6074_s4 = sshll.u32 %s6276_s8, 4  ;;  %s6075_s4 = int_to_ptr.vmem [resolvable:$false] %s6074_s4 }
  0xf8   : > { %p6070_p13 = scmp.ne.s32.totalorder %s1035_s5, %s6069_s25  ;;  %s6076_s9 = scalar_lea.vmem %s6075_s4, 32 }
  0xf9   : > { %p6077_p9 = scmp.lt.s32.totalorder %s1035_s5, %s6075_s4  ;;  %p6078_p10 = scmp.lt.s32.totalorder %s6076_s9, %s6069_s25 }
  0xfa   : > { %p6072_p0 = pnand %p6070_p13, %p6549_p7 }
  0xfb   : > { %s1032_s12 = scalar_lea.hbm %s7940_s22, %s6528_s10  ;;  %p6079_p11 = por %p6078_p10, %p6077_p9 }
  0xfc   : > { %p6073_p1 = pneg %p6072_p0 }
  0xfe   : > { %p6080_p5 = pnand %p6079_p11, %p6073_p1 }
 0x100   : > { %6083 = shalt.err (!%p6080_p5)
}
 0x101   : > { %5489 = dma.hbm_to_vmem [thread:$0]  (!%p6532_p4), %s1032_s12, 16, %s1035_s5, %s1008_s0  }
 0x102   : > { %s7941_s23 = sld [smem:[#allocation75_spill]]  ;;  %s1044_s16 = scalar_lea.vmem [#allocation24], %s6521_s24 }
 0x103   : > { %s1051_s28 = sshll.u32 %s1044_s16, 4  ;;  %s1042_s20 = scalar_lea.sflag [#allocation25], %s6521_s24  ;;  %s1052_s28 = int_to_ptr.vmem [resolvable:$true] %s1051_s28 }
 0x104   : > { %s6097_s1 = scalar_lea.vmem %s1052_s28, 16  ;;  %s6277_s3 = smov [#allocation24]  }
 0x105   : > { %p6098_p6 = scmp.ne.s32.totalorder %s1052_s28, %s6097_s1  ;;  %s6102_s30 = sshll.u32 %s6277_s3, 4  ;;  %s6103_s30 = int_to_ptr.vmem [resolvable:$false] %s6102_s30 }
 0x106   : > { %s6104_s25 = scalar_lea.vmem %s6103_s30, 32  ;;  %p6105_p1 = scmp.lt.s32.totalorder %s1052_s28, %s6103_s30 }
 0x107   : > { %p6100_p13 = pnand %p6098_p6, %p6549_p7  ;;  %p6106_p9 = scmp.lt.s32.totalorder %s6104_s25, %s6097_s1 }
 0x108   : > { %s1049_s26 = scalar_lea.hbm %s7941_s23, %s6528_s10 }
 0x109   : > { %p6101_p0 = pneg %p6100_p13  ;;  %p6107_p10 = por %p6106_p9, %p6105_p1 }
 0x10b   : > { %p6108_p11 = pnand %p6107_p10, %p6101_p0 }
 0x10d   : > { %6111 = shalt.err (!%p6108_p11)
}
 0x10e   : > { %5492 = dma.hbm_to_vmem [thread:$0]  (!%p6532_p4), %s1049_s26, 16, %s1052_s28, %s1042_s20  }
 0x10f   : > { %1060 = sbr.rel (%p6563_p3) target bundleno = 4985 (0x1379), region = 116  ;;  %s6716_s10 = sand.u32 (!%p6563_p3), 1, %s6236_s6  }
 0x110   : > { %s1063_s14 = scalar_lea.sflag (!%p6563_p3), [#allocation4], %s6716_s10 }
 0x114   : > { %6183 = dma.done.wait (%p6500_p8), %s1063_s14, 16  }
 0x115   : > { %6185 = vsyncadd (%p6500_p8), %s1063_s14, 4294967280  ;;  %s7943_s12 = sld [smem:[#allocation44_spill]] }
 0x11b   : > { %s6725_s29 = sand.u32 1, %s7943_s12  }
 0x11c   : > { %s1071_s27 = scalar_lea.sflag [#allocation7], %s6725_s29 }
 0x11d   : > { %6187 = dma.done.wait (%p6500_p8), %s1071_s27, 32  }
 0x11e   : > { %6189 = vsyncadd (%p6500_p8), %s1071_s27, 4294967264  ;;  %s1087_s4 = scalar_lea.sflag [#allocation10], %s6725_s29 }
 0x11f   : > { %6191 = dma.done.wait (%p6500_p8), %s1087_s4, 32  }
 0x120   : > { %6193 = vsyncadd (%p6500_p8), %s1087_s4, 4294967264  ;;  %s1103_s2 = scalar_lea.sflag [#allocation13], %s6725_s29 }
 0x121   : > { %6195 = dma.done.wait (%p6500_p8), %s1103_s2, 32  }
 0x122   : > { %6197 = vsyncadd (%p6500_p8), %s1103_s2, 4294967264  ;;  %s1119_s28 = scalar_lea.sflag [#allocation16], %s6725_s29 }
 0x123   : > { %6199 = dma.done.wait (%p6500_p8), %s1119_s28, 32  }
 0x124   : > { %6201 = vsyncadd (%p6500_p8), %s1119_s28, 4294967264  ;;  %s5127_s1 = sshll.u32 %s6716_s10, 4  ;;  %s1135_s30 = scalar_lea.sflag [#allocation19], %s6725_s29 }
 0x125   : > { %s6757_s25 = scalar_lea.vmem [#allocation18], %s5127_s1 }
 0x126   : > { %6203 = dma.done.wait (%p6500_p8), %s1135_s30, 272  }
 0x127   : > { %6205 = vsyncadd (%p6500_p8), %s1135_s30, 4294967024  ;;  %s1152_s12 = scalar_lea.sflag [#allocation22], %s6725_s29 }
 0x128   : > { %6207 = dma.done.wait (%p6500_p8), %s1152_s12, 32  }
 0x129   : > { %6209 = vsyncadd (%p6500_p8), %s1152_s12, 4294967264  ;;  %s1168_s2 = scalar_lea.sflag [#allocation25], %s6716_s10 }
 0x12a   : > { %6211 = dma.done.wait (%p6500_p8), %s1168_s2, 16  }
 0x12b   : > { %6213 = vsyncadd (%p6500_p8), %s1168_s2, 4294967280  ;;  %s7944_s1 = sld [smem:[#allocation37_spill]] }
 0x12c   : > { %s7945_s29 = sld [smem:[#allocation41_spill]] }
 0x12d   : > { %s7946_s30 = sld [smem:[#allocation40_spill]] }
 0x12e   : > { %s7947_s3 = sld [smem:[#allocation52_spill]] }
 0x12f   : > { %s7948_s26 = sld [smem:[#allocation53_spill]] }
 0x130   : > { %s7949_s8 = sld [smem:[#allocation54_spill]] }
 0x131   : > { %s7875_s27 = sand.u32 1, %s7944_s1   ;;  %s7951_s14 = sld [smem:[#allocation56_spill]] }
 0x132   : > { %p1332_p4 = scmp.lt.s32.totalorder %s7945_s29, 1  ;;  %s6781_s12 = sshll.u32 %s7875_s27, 3 }
 0x133   : > { %p1347_p7 = scmp.lt.s32.totalorder %s7946_s30, 1  ;;  %s7952_s13 = sld [smem:[#allocation58_spill]] }
 0x134   : > { %s8019_s29 = smov (!%p1332_p4, %s7945_s29), 1  ;;  %s7953_s9 = sld [smem:[#allocation62_spill]] }
 0x135   : > { %s1348_s24 = scalar_select %p1347_p7, %s7946_s30, 1 }
 0x136   : > { %s5129_s2 = sshll.u32 %s8019_s29, 3  ;;  %s5130_s28 = sshll.u32 %s8019_s29, 2 }
 0x137   : > { %s1335_s20 = scalar_lea.vmem %s7947_s3, %s5129_s2  ;;  %s6796_s1 = scalar_lea.vmem %s7948_s26, %s5130_s28 }
 0x138   : > { %s6801_s5 = scalar_lea.vmem %s7949_s8, %s5129_s2  ;;  %s5203_s18 = sshll.u32 %s1348_s24, 4 }
 0x139   : > { %s5208_s19 = sshll.u32 %s1348_s24, 5  ;;  %s1351_s3 = scalar_lea.vmem %s7951_s14, %s5203_s18 }
 0x13a   : > { %s6813_s26 = scalar_lea.vmem %s7952_s13, %s5203_s18  ;;  %s6818_s8 = scalar_lea.vmem %s7953_s9, %s5203_s18 }
 0x13b   : > { %s7954_s11 = sld [smem:[#allocation64_spill]]  ;;  %s1331_s13 = scalar_lea.vmem [#allocation26], %s6781_s12 }
 0x13c   : > { %s7955_s17 = sld [smem:[#allocation66_spill]]  ;;  %p5144_p8 = scmp.ne.s32.totalorder %s7946_s30, 0 }
 0x13d   : > { %s7956_s23 = sld [smem:[#allocation72_spill]] }
 0x13f   : > { %1381 = sbr.rel (%p5144_p8) target bundleno = 326 (0x146), region = 176 }
 0x141   : > { %s6823_s15 = scalar_lea.vmem %s7954_s11, %s5203_s18 }
 0x142   : > { %s6828_s21 = scalar_lea.vmem %s7955_s17, %s5203_s18 }
 0x143   : > { %s6833_s4 = scalar_lea.vmem %s7956_s23, %s5208_s19 }
 0x144   : > { %v1382_v0 = vld [vmem:[%s1335_s20] sm:$0xff]  ;;  %vm1383_vm0 = vcmask 261120  }
 0x145   : > { %1384 = vst.msk [vmem:[#allocation2] sm:$0xff] %vm1383_vm0, %v1382_v0 }
 0x146 PF: > { %v5608_v1 = vld [vmem:[%s1351_s3 + $0x8] sm:$0xff]   ;;  %v6278_v2 = vmov 0.0   ;;  %v5609_v3 = vld [vmem:[%s1351_s3] sm:$0xff]   ;;  %vm6279_vm1 = vmmov 0   ;;  %vm1495_vm2 = vcmask 261120   ;;  %s7957_s17 = scalar_lea.vmem [#allocation3], %s6716_s10  ;;  %v1388_v13 = vlaneseq }
 0x147   : > { %5264 = vmatprep.subr.bf16.mxu1 %v6278_v2  ;;  %5278 = vmatprep.subr.bf16.mxu0 %v6278_v2  ;;  %v5145_v6 = vld [vmem:[%s7957_s17] ss:$0 sm:$0xff]  ;;  %s6280_s18 = smov 120   ;;  %s6281_s19 = smov 96   ;;  %v6287_v14 = vmov 0   ;;  %vm1543_vm4 = vcmask 64512  }
 0x148   : > { %5265 = vmatpush3.bf16.msra.mxu1 %v5608_v1  ;;  %5268 = vmatprep.mubr.msk.bf16.mxu1 %vm6279_vm1, %v6278_v2  ;;  %s6282_s20 = smov 80   ;;  %s6283_s30 = smov 88   ;;  %v1389_v15 = vand.u32 127, %v1388_v13  ;;  %v1391_v16 = vshrl.u32 %v1388_v13, 7 }
 0x149   : > { %5266 = vmatprep.subr.bf16.mxu1 %v6278_v2  ;;  %5280 = vmatprep.mubr.msk.bf16.mxu0 %vm6279_vm1, %v6278_v2  ;;  %s6284_s3 = smov 72   ;;  %s6285_s16 = smov 112  }
 0x14a   : > { %s6286_s28 = smov 104   ;;  %5607 = vset.pattern.permute.xlu0 %v6287_v14  ;;  %5606 = vset.pattern.permute.xlu1 %v6287_v14  ;;  %vm1392_vm3 = vcmp.gt.s32.totalorder %v1389_v15, %v1391_v16  ;;  %v6868_v17 = vsub.s32 0, %v1391_v16  ;;  %v6870_v18 = vsub.s32 1, %v1391_v16  ;;  %v6872_v19 = vsub.s32 2, %v1391_v16  ;;  %s6288_s9 = smov 64  }
 0x14b   : > { %v1396_v20 = vsel %vm1392_vm3, 1, %v6287_v14  ;;  %v6875_v21 = vsub.s32 3, %v1391_v16  ;;  %v6878_v23 = vsub.s32 %v1389_v15, %v1391_v16  ;;  %v6881_v25 = vsub.s32 4, %v1391_v16  ;;  %s6289_s27 = smov 48   ;;  %s6290_s2 = smov 56  }
 0x14c   : > { %v1385_v4 = vld [vmem:[#allocation2] sm:$0xff]  ;;  %5267 = vmatpush3.bf16.msra.mxu1 %v5609_v3  ;;  %v1400_v22 = vrot.slane %v1396_v20, %v6868_v17  ;;  %v1407_v24 = vrot.slane %v1396_v20, %v6870_v18  ;;  %v1414_v26 = vrot.slane %v1396_v20, %v6872_v19  ;;  %v6885_v28 = vsub.s32 5, %v1391_v16  ;;  %s6291_s11 = smov 40   ;;  %s6292_s0 = smov 8  }
 0x14d   : > { %v1471_v5 = vpack.c.bf16 %v1385_v4, %v1385_v4  ;;  %5272 = vmatprep.subr.bf16.mxu1 %v6278_v2  ;;  %v1421_v27 = vrot.slane %v1396_v20, %v6875_v21  ;;  %v1428_v29 = vrot.slane %v1396_v20, %v6881_v25  ;;  %v6888_v30 = vsub.s32 6, %v1391_v16  ;;  %s6293_s24 = smov 16   ;;  %s6294_s22 = smov 24  }
 0x14e   : > { %v1435_v31 = vrot.slane %v1396_v20, %v6885_v28  ;;  %v6891_v32 = vsub.s32 7, %v1391_v16  ;;  %s7979_s17 = sld [smem:[#allocation55_spill]] }
 0x14f   : > { %5269 = vmatmul.mubr.msk.bf16.vlgmr.msra.gmra.mxu1 %vm1495_vm2, %v1471_v5  ;;  %v1442_v33 = vrot.slane %v1396_v20, %v6888_v30 }
 0x150   : > { %5274 = vmatprep.mubr.msk.bf16.mxu1 %vm6279_vm1, %v6278_v2  ;;  %v1449_v34 = vrot.slane %v1396_v20, %v6891_v32 }
 0x20f   : > { %v1533_v7 = vpop.f32.mrf.mxu1 }
 0x210   : > { %v1534_v8 = vadd.f32 %v5145_v6, %v1533_v7 }
 0x211   : > { %v5270_v9 = vpop.f32.mrf.mxu1 }
 0x212   : > { %v6850_v10 = vpack.c.bf16 %v1534_v8, %v1534_v8 }
 0x213   : > { %v1536_v11 = vpop.f32.mrf.mxu1 }
 0x214   : > { %2072 = vrot.lane.b32.xlu1 %v6850_v10, %s6280_s18  ;;  %1541 = vrot.lane.b32.xlu0 %v6850_v10, %s6281_s19 }
 0x215   : > { %v5271_v12 = vpop.f32.mrf.mxu1 }
 0x218   : > { %2598 = vrot.lane.b32.xlu1 %v6850_v10, %s6282_s20  ;;  %2074 = vrot.lane.b32.xlu0 %v6850_v10, %s6283_s30 }
 0x21c   : > { %3122 = vrot.lane.b32.xlu1 %v6850_v10, %s6284_s3  ;;  %2596 = vrot.lane.b32.xlu0 %v6850_v10, %s6285_s16 }
 0x220   : > { %3120 = vrot.lane.b32.xlu0 %v6850_v10, %s6286_s28  ;;  %1402 = vbcast.lane.b32.xlu1 %v1400_v22, 256 }
 0x224   : > { %1409 = vbcast.lane.b32.xlu0 %v1407_v24, 256  ;;  %1416 = vbcast.lane.b32.xlu1 %v1414_v26, 256 }
 0x228   : > { %1423 = vbcast.lane.b32.xlu0 %v1421_v27, 256  ;;  %1430 = vbcast.lane.b32.xlu1 %v1428_v29, 256 }
 0x22c   : > { %1437 = vbcast.lane.b32.xlu1 %v1435_v31, 256 }
 0x230   : > { %1444 = vbcast.lane.b32.xlu1 %v1442_v33, 256 }
 0x234   : > { %1451 = vbcast.lane.b32.xlu1 %v1449_v34, 256 }
 0x286   : > { %v1542_v35 = vpop.permute.xlu0 %1541  ;;  %v2073_v38 = vpop.permute.xlu1 %2072 }
 0x287   : > { %v1548_v36 = vsel %vm1543_vm4, %v1542_v35, 0 }
 0x288   : > { %5273 = vmatpush3.bf16.xpose.msra.mxu1 %v1548_v36 }
 0x289   : > { %5284 = vmatprep.subr.bf16.mxu1 %v6278_v2 }
 0x28a   : > { %v2075_v37 = vpop.permute.xlu0 %2074  ;;  %v2599_v40 = vpop.permute.xlu1 %2598 }
 0x28b   : > { %v2080_v39 = vsel %vm1543_vm4, %v2075_v37, 0  ;;  %v2604_v41 = vsel %vm1543_vm4, %v2599_v40, 0 }
 0x28e   : > { %v3123_v42 = vpop.permute.xlu1 %3122  ;;  %v2597_v43 = vpop.permute.xlu0 %2596 }
 0x28f   : > { %5275 = vmatmul.mubr.msk.bf16.vlgmr.msra.gmra.mxu1 %vm1543_vm4, %v6850_v10  ;;  %v3128_v44 = vsel %vm1543_vm4, %v3123_v42, 0 }
 0x290   : > { %5285 = vmatpush3.bf16.xpose.msra.mxu1 %v2080_v39  ;;  %5286 = vmatprep.mubr.msk.bf16.mxu1 %vm6279_vm1, %v6278_v2 }
 0x291   : > { %5296 = vmatprep.subr.bf16.mxu1 %v6278_v2 }
 0x292   : > { %v3121_v45 = vpop.permute.xlu0 %3120  ;;  %v1403_v42 = vpop.permute.xlu1 %1402 }
 0x293   : > { %vm1453_vm6 = vcmp.ne.s32.totalorder %v1403_v42, 0 }
 0x297   : > { %5287 = vmatmul.mubr.msk.bf16.vlgmr.msra.gmra.mxu1 %vm1543_vm4, %v2073_v38 }
 0x298   : > { %5297 = vmatpush3.bf16.xpose.msra.mxu1 %v2604_v41  ;;  %5298 = vmatprep.mubr.msk.bf16.mxu1 %vm6279_vm1, %v6278_v2 }
 0x299   : > { %5308 = vmatprep.subr.bf16.mxu1 %v6278_v2 }
 0x29f   : > { %5299 = vmatmul.mubr.msk.bf16.vlgmr.msra.gmra.mxu1 %vm1543_vm4, %v2597_v43  ;;  %v1417_v43 = vpop.permute.xlu1 %1416 }
 0x2a0   : > { %5309 = vmatpush3.bf16.xpose.msra.mxu1 %v3128_v44  ;;  %5310 = vmatprep.mubr.msk.bf16.mxu1 %vm6279_vm1, %v6278_v2  ;;  %vm1455_vm10 = vcmp.ne.s32.totalorder %v1417_v43, 0 }
 0x2a1   : > { %5320 = vmatprep.subr.bf16.mxu1 %v6278_v2 }
 0x2a3   : > { %v1431_v44 = vpop.permute.xlu1 %1430 }
 0x2a4   : > { %vm1457_vm14 = vcmp.ne.s32.totalorder %v1431_v44, 0 }
 0x2a7   : > { %5311 = vmatmul.mubr.msk.bf16.vlgmr.msra.gmra.mxu1 %vm1543_vm4, %v3121_v45  ;;  %v1438_v45 = vpop.permute.xlu1 %1437 }
 0x2a8   : > { %5324 = vmatprep.mubr.msk.bf16.mxu1 %vm6279_vm1, %v6278_v2  ;;  %vm1458_vm0 = vcmp.ne.s32.totalorder %v1438_v45, 0 }
 0x34f   : > { %v1584_v46 = vpop.f32.mrf.mxu1 }
 0x350   : > { %v1601_v47 = vrot.slane %v1584_v46, %v6870_v18  ;;  %v1594_v48 = vrot.slane %v1584_v46, %v6868_v17  ;;  %v1608_v51 = vrot.slane %v1584_v46, %v6872_v19  ;;  %v1636_v52 = vrot.slane %v1584_v46, %v6888_v30 }
 0x351   : > { %v5276_v49 = vpop.f32.mrf.mxu1  ;;  %v1615_v55 = vrot.slane %v1584_v46, %v6875_v21  ;;  %v1622_v59 = vrot.slane %v1584_v46, %v6881_v25  ;;  %v1629_v63 = vrot.slane %v1584_v46, %v6885_v28  ;;  %v1643_v4 = vrot.slane %v1584_v46, %v6891_v32  ;;  %v1445_v46 = vpop.permute.xlu1 %1444 }
 0x352   : > { %1603 = vbcast.lane.b32.xlu0 %v1601_v47, 256  ;;  %1596 = vbcast.lane.b32.xlu1 %v1594_v48, 256  ;;  %v1410_v47 = vpop.permute.xlu0 %1409  ;;  %v1386_v48 = vld [vmem:[%s6801_s5] sm:$0xff]  ;;  %vm1459_vm3 = vcmp.ne.s32.totalorder %v1445_v46, 0 }
 0x353   : > { %v1587_v50 = vpop.f32.mrf.mxu1  ;;  %vm1393_vm5 = vcmp.eq.f32.partialorder %v1386_v48, 0.0  ;;  %vm1454_vm7 = vcmp.ne.s32.totalorder %v1410_v47, 0 }
 0x354   : > { %vm6950_vm8 = vmor %vm1393_vm5, %vm1453_vm6 }
 0x355   : > { %v5277_v53 = vpop.f32.mrf.mxu1  ;;  %v1452_v49 = vpop.permute.xlu1 %1451  ;;  %vm6955_vm9 = vmor %vm1393_vm5, %vm1454_vm7 }
 0x356   : > { %1610 = vbcast.lane.b32.xlu0 %v1608_v51, 256  ;;  %1638 = vbcast.lane.b32.xlu1 %v1636_v52, 256  ;;  %v1424_v50 = vpop.permute.xlu0 %1423  ;;  %vm6970_vm11 = vmor %vm1393_vm5, %vm1455_vm10  ;;  %vm1460_vm10 = vcmp.ne.s32.totalorder %v1452_v49, 0 }
 0x357   : > { %v2116_v54 = vpop.f32.mrf.mxu1  ;;  %vm1456_vm12 = vcmp.ne.s32.totalorder %v1424_v50, 0  ;;  %vm6990_vm15 = vmor %vm1393_vm5, %vm1457_vm14  ;;  %vm1737_vm14 = vcmask 1046534  }
 0x358   : > { %v2126_v56 = vrot.slane %v2116_v54, %v6868_v17  ;;  %v2140_v60 = vrot.slane %v2116_v54, %v6872_v19  ;;  %v2154_v0 = vrot.slane %v2116_v54, %v6881_v25  ;;  %v2168_v5 = vrot.slane %v2116_v54, %v6888_v30  ;;  %vm6980_vm13 = vmor %vm1393_vm5, %vm1456_vm12 }
 0x359   : > { %v5288_v57 = vpop.f32.mrf.mxu1  ;;  %v2133_v8 = vrot.slane %v2116_v54, %v6870_v18  ;;  %v2147_v13 = vrot.slane %v2116_v54, %v6875_v21  ;;  %v2161_v20 = vrot.slane %v2116_v54, %v6885_v28  ;;  %v2175_v24 = vrot.slane %v2116_v54, %v6891_v32  ;;  %vm7000_vm6 = vmor %vm1393_vm5, %vm1458_vm0 }
 0x35a   : > { %1617 = vbcast.lane.b32.xlu0 %v1615_v55, 256  ;;  %2128 = vbcast.lane.b32.xlu1 %v2126_v56, 256  ;;  %vm7005_vm7 = vmor %vm1393_vm5, %vm1459_vm3  ;;  %vm2028_vm0 = vcmask 1043456   ;;  %vm3657_vm3 = vcmask 130048  }
 0x35b   : > { %v2119_v58 = vpop.f32.mrf.mxu1  ;;  %vm7020_vm12 = vmor %vm1393_vm5, %vm1460_vm10  ;;  %vm1727_vm5 = vcmask 1041409  }
 0x35d   : > { %v5289_v61 = vpop.f32.mrf.mxu1 }
 0x35e   : > { %1624 = vbcast.lane.b32.xlu0 %v1622_v59, 256  ;;  %2142 = vbcast.lane.b32.xlu1 %v2140_v60, 256 }
 0x35f   : > { %v2640_v62 = vpop.f32.mrf.mxu1 }
 0x360   : > { %v2650_v9 = vrot.slane %v2640_v62, %v6868_v17  ;;  %v2664_v15 = vrot.slane %v2640_v62, %v6872_v19  ;;  %v2678_v22 = vrot.slane %v2640_v62, %v6881_v25  ;;  %v2692_v26 = vrot.slane %v2640_v62, %v6888_v30 }
 0x361   : > { %v5300_v1 = vpop.f32.mrf.mxu1  ;;  %v2657_v27 = vrot.slane %v2640_v62, %v6870_v18  ;;  %v2671_v31 = vrot.slane %v2640_v62, %v6875_v21  ;;  %v2685_v34 = vrot.slane %v2640_v62, %v6885_v28  ;;  %v2699_v36 = vrot.slane %v2640_v62, %v6891_v32 }
 0x362   : > { %1631 = vbcast.lane.b32.xlu0 %v1629_v63, 256  ;;  %2156 = vbcast.lane.b32.xlu1 %v2154_v0, 256 }
 0x363   : > { %v2643_v3 = vpop.f32.mrf.mxu1 }
 0x365   : > { %v5301_v6 = vpop.f32.mrf.mxu1 }
 0x366   : > { %1645 = vbcast.lane.b32.xlu0 %v1643_v4, 256  ;;  %2170 = vbcast.lane.b32.xlu1 %v2168_v5, 256 }
 0x367   : > { %v3164_v7 = vpop.f32.mrf.mxu1 }
 0x368   : > { %v3174_v29 = vrot.slane %v3164_v7, %v6868_v17  ;;  %v3188_v33 = vrot.slane %v3164_v7, %v6872_v19  ;;  %v3202_v35 = vrot.slane %v3164_v7, %v6881_v25  ;;  %v3216_v37 = vrot.slane %v3164_v7, %v6888_v30 }
 0x369   : > { %v5312_v11 = vpop.f32.mrf.mxu1  ;;  %v3181_v38 = vrot.slane %v3164_v7, %v6870_v18  ;;  %v3195_v39 = vrot.slane %v3164_v7, %v6875_v21  ;;  %v3209_v40 = vrot.slane %v3164_v7, %v6885_v28  ;;  %v3223_v41 = vrot.slane %v3164_v7, %v6891_v32 }
 0x36a   : > { %2135 = vbcast.lane.b32.xlu0 %v2133_v8, 256  ;;  %2652 = vbcast.lane.b32.xlu1 %v2650_v9, 256 }
 0x36b   : > { %v3167_v12 = vpop.f32.mrf.mxu1 }
 0x36d   : > { %v5313_v16 = vpop.f32.mrf.mxu1 }
 0x36e   : > { %2149 = vbcast.lane.b32.xlu0 %v2147_v13, 256  ;;  %2666 = vbcast.lane.b32.xlu1 %v2664_v15, 256 }
 0x372   : > { %2163 = vbcast.lane.b32.xlu0 %v2161_v20, 256  ;;  %2680 = vbcast.lane.b32.xlu1 %v2678_v22, 256 }
 0x376   : > { %2177 = vbcast.lane.b32.xlu0 %v2175_v24, 256  ;;  %2694 = vbcast.lane.b32.xlu1 %v2692_v26, 256 }
 0x37a   : > { %2659 = vbcast.lane.b32.xlu0 %v2657_v27, 256  ;;  %3176 = vbcast.lane.b32.xlu1 %v3174_v29, 256 }
 0x37e   : > { %2673 = vbcast.lane.b32.xlu0 %v2671_v31, 256  ;;  %3190 = vbcast.lane.b32.xlu1 %v3188_v33, 256 }
 0x382   : > { %2687 = vbcast.lane.b32.xlu0 %v2685_v34, 256  ;;  %3204 = vbcast.lane.b32.xlu1 %v3202_v35, 256 }
 0x386   : > { %2701 = vbcast.lane.b32.xlu0 %v2699_v36, 256  ;;  %3218 = vbcast.lane.b32.xlu1 %v3216_v37, 256 }
 0x38a   : > { %3183 = vbcast.lane.b32.xlu0 %v3181_v38, 256 }
 0x38e   : > { %3197 = vbcast.lane.b32.xlu0 %v3195_v39, 256 }
 0x392   : > { %3211 = vbcast.lane.b32.xlu0 %v3209_v40, 256 }
 0x396   : > { %3225 = vbcast.lane.b32.xlu0 %v3223_v41, 256 }
 0x3c4   : > { %v1604_v53 = vpop.permute.xlu0 %1603  ;;  %v1597_v54 = vpop.permute.xlu1 %1596 }
 0x3c5   : > { %v6961_v55 = vsel %vm6955_vm9, -1e+30, %v1604_v53  ;;  %v6965_v56 = vsel %vm6950_vm8, -1e+30, %v1597_v54 }
 0x3c6   : > { %1675 = vperm.xlu0 %5607, %v6961_v55   ;;  %1672 = vperm.xlu1 %5606, %v6965_v56  }
 0x3c8   : > { %v1611_v58 = vpop.permute.xlu0 %1610  ;;  %v1639_v59 = vpop.permute.xlu1 %1638 }
 0x3c9   : > { %v6976_v60 = vsel %vm6970_vm11, -1e+30, %v1611_v58  ;;  %v7011_v11 = vsel %vm7005_vm7, -1e+30, %v1639_v59 }
 0x3ca   : > { %1678 = vperm.xlu1 %5606, %v6976_v60  }
 0x3cc   : > { %v1618_v62 = vpop.permute.xlu0 %1617  ;;  %v2129_v63 = vpop.permute.xlu1 %2128 }
 0x3cd   : > { %v6986_v0 = vsel %vm6980_vm13, -1e+30, %v1618_v62  ;;  %v7026_v20 = vsel %vm6950_vm8, -1e+30, %v2129_v63 }
 0x3ce   : > { %1681 = vperm.xlu1 %5606, %v6986_v0  }
 0x3d0   : > { %v1625_v3 = vpop.permute.xlu0 %1624  ;;  %v2143_v4 = vpop.permute.xlu1 %2142 }
 0x3d1   : > { %v6996_v5 = vsel %vm6990_vm15, -1e+30, %v1625_v3  ;;  %v7036_v27 = vsel %vm6970_vm11, -1e+30, %v2143_v4 }
 0x3d2   : > { %1684 = vperm.xlu0 %5607, %v6996_v5  }
 0x3d4   : > { %v1632_v8 = vpop.permute.xlu0 %1631  ;;  %v2157_v9 = vpop.permute.xlu1 %2156 }
 0x3d5   : > { %v7015_v12 = vsel %vm7000_vm6, -1e+30, %v1632_v8  ;;  %v7046_v34 = vsel %vm6990_vm15, -1e+30, %v2157_v9 }
 0x3d6   : > { %1690 = vperm.xlu0 %5607, %v7011_v11   ;;  %1687 = vperm.xlu1 %5606, %v7015_v12  }
 0x3d8   : > { %v1646_v15 = vpop.permute.xlu0 %1645  ;;  %v2171_v16 = vpop.permute.xlu1 %2170 }
 0x3d9   : > { %v7030_v22 = vsel %vm7020_vm12, -1e+30, %v1646_v15  ;;  %v7056_v38 = vsel %vm7005_vm7, -1e+30, %v2171_v16 }
 0x3da   : > { %2204 = vperm.xlu0 %5607, %v7026_v20   ;;  %1693 = vperm.xlu1 %5606, %v7030_v22  }
 0x3dc   : > { %v2136_v24 = vpop.permute.xlu0 %2135  ;;  %v2653_v26 = vpop.permute.xlu1 %2652 }
 0x3dd   : > { %v7040_v29 = vsel %vm6955_vm9, -1e+30, %v2136_v24  ;;  %v7066_v41 = vsel %vm6950_vm8, -1e+30, %v2653_v26 }
 0x3de   : > { %2210 = vperm.xlu0 %5607, %v7036_v27   ;;  %2207 = vperm.xlu1 %5606, %v7040_v29  }
 0x3e0   : > { %v2150_v31 = vpop.permute.xlu0 %2149  ;;  %v2667_v33 = vpop.permute.xlu1 %2666 }
 0x3e1   : > { %v7050_v35 = vsel %vm6980_vm13, -1e+30, %v2150_v31  ;;  %v7076_v45 = vsel %vm6970_vm11, -1e+30, %v2667_v33 }
 0x3e2   : > { %2216 = vperm.xlu0 %5607, %v7046_v34   ;;  %2213 = vperm.xlu1 %5606, %v7050_v35  }
 0x3e4   : > { %v2164_v36 = vpop.permute.xlu0 %2163  ;;  %v2681_v37 = vpop.permute.xlu1 %2680 }
 0x3e5   : > { %v7060_v39 = vsel %vm7000_vm6, -1e+30, %v2164_v36  ;;  %v7086_v49 = vsel %vm6990_vm15, -1e+30, %v2681_v37 }
 0x3e6   : > { %2222 = vperm.xlu0 %5607, %v7056_v38   ;;  %2219 = vperm.xlu1 %5606, %v7060_v39  }
 0x3e8   : > { %v2178_v40 = vpop.permute.xlu0 %2177  ;;  %v2695_v43 = vpop.permute.xlu1 %2694 }
 0x3e9   : > { %v7070_v42 = vsel %vm7020_vm12, -1e+30, %v2178_v40  ;;  %v7096_v54 = vsel %vm7005_vm7, -1e+30, %v2695_v43 }
 0x3ea   : > { %2728 = vperm.xlu0 %5607, %v7066_v41   ;;  %2225 = vperm.xlu1 %5606, %v7070_v42  }
 0x3ec   : > { %v2660_v44 = vpop.permute.xlu0 %2659  ;;  %v3177_v47 = vpop.permute.xlu1 %3176 }
 0x3ed   : > { %v7080_v46 = vsel %vm6955_vm9, -1e+30, %v2660_v44  ;;  %v7110_v3 = vsel %vm6950_vm8, -1e+30, %v3177_v47  ;;  %vm1729_vm8 = vcmask 1042434  }
 0x3ee   : > { %2734 = vperm.xlu0 %5607, %v7076_v45   ;;  %2731 = vperm.xlu1 %5606, %v7080_v46  }
 0x3f0   : > { %v2674_v48 = vpop.permute.xlu0 %2673  ;;  %v3191_v59 = vpop.permute.xlu1 %3190 }
 0x3f1   : > { %v7090_v50 = vsel %vm6980_vm13, -1e+30, %v2674_v48  ;;  %v7120_v15 = vsel %vm6970_vm11, -1e+30, %v3191_v59  ;;  %vm1733_vm11 = vcmask 1044484  }
 0x3f2   : > { %2740 = vperm.xlu0 %5607, %v7086_v49   ;;  %2737 = vperm.xlu1 %5606, %v7090_v50  }
 0x3f4   : > { %v2688_v53 = vpop.permute.xlu0 %2687  ;;  %v3205_v4 = vpop.permute.xlu1 %3204 }
 0x3f5   : > { %v7100_v58 = vsel %vm7000_vm6, -1e+30, %v2688_v53  ;;  %v7130_v24 = vsel %vm6990_vm15, -1e+30, %v3205_v4  ;;  %vm1739_vm15 = vcmask 1047559  }
 0x3f6   : > { %2746 = vperm.xlu0 %5607, %v7096_v54   ;;  %2743 = vperm.xlu1 %5606, %v7100_v58  }
 0x3f8   : > { %v2702_v62 = vpop.permute.xlu0 %2701  ;;  %v3219_v52 = vpop.permute.xlu1 %3218 }
 0x3f9   : > { %v7106_v63 = vsel %vm7020_vm12, -1e+30, %v2702_v62  ;;  %v7140_v31 = vsel %vm7005_vm7, -1e+30, %v3219_v52 }
 0x3fa   : > { %2749 = vperm.xlu1 %5606, %v7106_v63   ;;  %3252 = vperm.xlu0 %5607, %v7110_v3  }
 0x3fc   : > { %v3184_v8 = vpop.permute.xlu0 %3183 }
 0x3fd   : > { %v7116_v9 = vsel %vm6955_vm9, -1e+30, %v3184_v8  ;;  %vm1731_vm9 = vcmask 1043459  }
 0x3fe   : > { %3255 = vperm.xlu1 %5606, %v7116_v9   ;;  %3258 = vperm.xlu0 %5607, %v7120_v15  }
 0x400   : > { %v3198_v51 = vpop.permute.xlu0 %3197 }
 0x401   : > { %v7126_v16 = vsel %vm6980_vm13, -1e+30, %v3198_v51  ;;  %vm1735_vm13 = vcmask 1045509  }
 0x402   : > { %3261 = vperm.xlu1 %5606, %v7126_v16   ;;  %3264 = vperm.xlu0 %5607, %v7130_v24  }
 0x404   : > { %v3212_v57 = vpop.permute.xlu0 %3211 }
 0x405   : > { %v7136_v26 = vsel %vm7000_vm6, -1e+30, %v3212_v57  ;;  %vm3659_vm6 = vcmask 195584  }
 0x406   : > { %3267 = vperm.xlu1 %5606, %v7136_v26   ;;  %3270 = vperm.xlu0 %5607, %v7140_v31  }
 0x408   : > { %v3226_v61 = vpop.permute.xlu0 %3225 }
 0x409   : > { %v7146_v1 = vsel %vm7020_vm12, -1e+30, %v3226_v61 }
 0x40a   : > { %3273 = vperm.xlu1 %5606, %v7146_v1  }
 0x441   : > { %v1673_v33 = vpop.permute.xlu1 %1672  ;;  %v1676_v6 = vpop.permute.xlu0 %1675 }
 0x442   : > { %v1702_v40 = vrot.slane %v1676_v6, %v6878_v23  ;;  %v1698_v7 = vrot.slane %v1673_v33, %v6878_v23 }
 0x444   : > { %v1728_v48 = vsel %vm1727_vm5, %v1702_v40, %v1698_v7 }
 0x445   : > { %v1679_v36 = vpop.permute.xlu1 %1678 }
 0x446   : > { %v1706_v43 = vrot.slane %v1679_v36, %v6878_v23 }
 0x448   : > { %v1730_v53 = vsel %vm1729_vm8, %v1706_v43, %v1728_v48 }
 0x449   : > { %v1682_v37 = vpop.permute.xlu1 %1681 }
 0x44a   : > { %v1710_v47 = vrot.slane %v1682_v37, %v6878_v23 }
 0x44c   : > { %v1732_v4 = vsel %vm1731_vm9, %v1710_v47, %v1730_v53 }
 0x44d   : > { %v1685_v44 = vpop.permute.xlu0 %1684 }
 0x44e   : > { %v1714_v13 = vrot.slane %v1685_v44, %v6878_v23 }
 0x450   : > { %v1734_v51 = vsel %vm1733_vm11, %v1714_v13, %v1732_v4 }
 0x451   : > { %v1691_v59 = vpop.permute.xlu0 %1690  ;;  %v1688_v62 = vpop.permute.xlu1 %1687 }
 0x452   : > { %v1718_v8 = vrot.slane %v1688_v62, %v6878_v23  ;;  %v1722_v52 = vrot.slane %v1691_v59, %v6878_v23 }
 0x454   : > { %v1736_v57 = vsel %vm1735_vm13, %v1718_v8, %v1734_v51 }
 0x455   : > { %v2205_v61 = vpop.permute.xlu0 %2204  ;;  %v1694_v33 = vpop.permute.xlu1 %1693  ;;  %v1738_v6 = vsel %vm1737_vm14, %v1722_v52, %v1736_v57 }
 0x456   : > { %v1726_v36 = vrot.slane %v1694_v33, %v6878_v23  ;;  %v2230_v44 = vrot.slane %v2205_v61, %v6878_v23 }
 0x458   : > { %v1740_v37 = vsel %vm1739_vm15, %v1726_v36, %v1738_v6 }
 0x459   : > { %v2211_v40 = vpop.permute.xlu0 %2210  ;;  %v2208_v7 = vpop.permute.xlu1 %2207  ;;  %v1742_v43 = vsel %vm1543_vm4, %v1740_v37, -inf }
 0x45a   : > { %v2234_v47 = vrot.slane %v2208_v7, %v6878_v23  ;;  %1743 = vmax.xlane.f32.xlu0 %v1742_v43  ;;  %v2238_v13 = vrot.slane %v2211_v40, %v6878_v23 }
 0x45c   : > { %v2259_v48 = vsel %vm1727_vm5, %v2234_v47, %v2230_v44 }
 0x45d   : > { %v2217_v53 = vpop.permute.xlu0 %2216  ;;  %v2214_v59 = vpop.permute.xlu1 %2213  ;;  %v2260_v8 = vsel %vm1729_vm8, %v2238_v13, %v2259_v48 }
 0x45e   : > { %v2242_v62 = vrot.slane %v2214_v59, %v6878_v23  ;;  %v2246_v4 = vrot.slane %v2217_v53, %v6878_v23 }
 0x460   : > { %v2261_v51 = vsel %vm1731_vm9, %v2242_v62, %v2260_v8 }
 0x461   : > { %v2223_v52 = vpop.permute.xlu0 %2222  ;;  %v2220_v57 = vpop.permute.xlu1 %2219  ;;  %v2262_v36 = vsel %vm1733_vm11, %v2246_v4, %v2261_v51 }
 0x462   : > { %v2250_v61 = vrot.slane %v2220_v57, %v6878_v23  ;;  %v2254_v33 = vrot.slane %v2223_v52, %v6878_v23 }
 0x464   : > { %v2263_v6 = vsel %vm1735_vm13, %v2250_v61, %v2262_v36 }
 0x465   : > { %v2729_v37 = vpop.permute.xlu0 %2728  ;;  %v2226_v40 = vpop.permute.xlu1 %2225  ;;  %v2264_v43 = vsel %vm1737_vm14, %v2254_v33, %v2263_v6 }
 0x466   : > { %v2258_v7 = vrot.slane %v2226_v40, %v6878_v23  ;;  %v2754_v53 = vrot.slane %v2729_v37, %v6878_v23 }
 0x468   : > { %v2265_v44 = vsel %vm1739_vm15, %v2258_v7, %v2264_v43 }
 0x469   : > { %v2735_v47 = vpop.permute.xlu0 %2734  ;;  %v2732_v13 = vpop.permute.xlu1 %2731  ;;  %v2267_v48 = vsel %vm1543_vm4, %v2265_v44, -inf }
 0x46a   : > { %v2758_v59 = vrot.slane %v2732_v13, %v6878_v23  ;;  %2268 = vmax.xlane.f32.xlu1 %v2267_v48  ;;  %v2762_v62 = vrot.slane %v2735_v47, %v6878_v23 }
 0x46c   : > { %v2783_v4 = vsel %vm1727_vm5, %v2758_v59, %v2754_v53 }
 0x46d   : > { %v2741_v8 = vpop.permute.xlu0 %2740  ;;  %v2738_v51 = vpop.permute.xlu1 %2737  ;;  %v2784_v61 = vsel %vm1729_vm8, %v2762_v62, %v2783_v4 }
 0x46e   : > { %v2766_v52 = vrot.slane %v2738_v51, %v6878_v23  ;;  %v2770_v57 = vrot.slane %v2741_v8, %v6878_v23 }
 0x470   : > { %v2785_v33 = vsel %vm1731_vm9, %v2766_v52, %v2784_v61 }
 0x471   : > { %v2747_v36 = vpop.permute.xlu0 %2746  ;;  %v2744_v6 = vpop.permute.xlu1 %2743  ;;  %v2786_v7 = vsel %vm1733_vm11, %v2770_v57, %v2785_v33 }
 0x472   : > { %v2774_v37 = vrot.slane %v2744_v6, %v6878_v23  ;;  %v2778_v40 = vrot.slane %v2747_v36, %v6878_v23 }
 0x474   : > { %v2787_v43 = vsel %vm1735_vm13, %v2774_v37, %v2786_v7 }
 0x475   : > { %v3253_v44 = vpop.permute.xlu0 %3252  ;;  %v2750_v47 = vpop.permute.xlu1 %2749  ;;  %v2788_v48 = vsel %vm1737_vm14, %v2778_v40, %v2787_v43 }
 0x476   : > { %v2782_v13 = vrot.slane %v2750_v47, %v6878_v23  ;;  %v3278_v8 = vrot.slane %v3253_v44, %v6878_v23 }
 0x478   : > { %v2789_v53 = vsel %vm1739_vm15, %v2782_v13, %v2788_v48 }
 0x479   : > { %v3259_v59 = vpop.permute.xlu0 %3258  ;;  %v3256_v62 = vpop.permute.xlu1 %3255  ;;  %v2791_v4 = vsel %vm1543_vm4, %v2789_v53, -inf }
 0x47a   : > { %v3282_v51 = vrot.slane %v3256_v62, %v6878_v23  ;;  %2792 = vmax.xlane.f32.xlu0 %v2791_v4  ;;  %v3286_v52 = vrot.slane %v3259_v59, %v6878_v23 }
 0x47c   : > { %v3307_v57 = vsel %vm1727_vm5, %v3282_v51, %v3278_v8 }
 0x47d   : > { %v3265_v61 = vpop.permute.xlu0 %3264  ;;  %v3262_v33 = vpop.permute.xlu1 %3261  ;;  %v3308_v37 = vsel %vm1729_vm8, %v3286_v52, %v3307_v57 }
 0x47e   : > { %v3290_v36 = vrot.slane %v3262_v33, %v6878_v23  ;;  %v3294_v6 = vrot.slane %v3265_v61, %v6878_v23 }
 0x480   : > { %v3309_v40 = vsel %vm1731_vm9, %v3290_v36, %v3308_v37 }
 0x481   : > { %v3271_v7 = vpop.permute.xlu0 %3270  ;;  %v3268_v43 = vpop.permute.xlu1 %3267  ;;  %v3310_v13 = vsel %vm1733_vm11, %v3294_v6, %v3309_v40 }
 0x482   : > { %v3298_v44 = vrot.slane %v3268_v43, %v6878_v23  ;;  %v3302_v47 = vrot.slane %v3271_v7, %v6878_v23 }
 0x484   : > { %v3311_v48 = vsel %vm1735_vm13, %v3298_v44, %v3310_v13 }
 0x485   : > { %v3274_v53 = vpop.permute.xlu1 %3273  ;;  %v3312_v62 = vsel %vm1737_vm14, %v3302_v47, %v3311_v48 }
 0x486   : > { %v3306_v59 = vrot.slane %v3274_v53, %v6878_v23 }
 0x488   : > { %v3313_v4 = vsel %vm1739_vm15, %v3306_v59, %v3312_v62 }
 0x489   : > { %v3315_v8 = vsel %vm1543_vm4, %v3313_v4, -inf }
 0x48a   : > { %3316 = vmax.xlane.f32.xlu0 %v3315_v8 }
 0x4e3   : > { %v1744_v51 = vpop.xlane.xlu0 %1743 }
 0x4e4   : > { %v1749_v52 = vrot.slane %v1744_v51, %v6868_v17  ;;  %v1753_v57 = vrot.slane %v1744_v51, %v6870_v18  ;;  %v1757_v61 = vrot.slane %v1744_v51, %v6872_v19  ;;  %v1765_v33 = vrot.slane %v1744_v51, %v6881_v25 }
 0x4e5   : > { %v1761_v36 = vrot.slane %v1744_v51, %v6875_v21  ;;  %v1773_v7 = vrot.slane %v1744_v51, %v6888_v30  ;;  %v1769_v13 = vrot.slane %v1744_v51, %v6885_v28 }
 0x4e6   : > { %v1786_v6 = vsub.f32 %v6965_v56, %v1749_v52  ;;  %v1787_v37 = vsub.f32 %v6961_v55, %v1753_v57  ;;  %v1788_v40 = vsub.f32 %v6976_v60, %v1757_v61  ;;  %v1790_v43 = vsub.f32 %v6996_v5, %v1765_v33 }
 0x4e7   : > { %v1789_v48 = vsub.f32 %v6986_v0, %v1761_v36  ;;  %v1792_v59 = vsub.f32 %v7011_v11, %v1773_v7  ;;  %v1777_v55 = vrot.slane %v1744_v51, %v6891_v32  ;;  %v1791_v60 = vsub.f32 %v7015_v12, %v1769_v13 }
 0x4e8   : > { %v1794_v44 = vmul.f32 1.442695, %v1786_v6  ;;  %v1796_v47 = vmul.f32 1.442695, %v1787_v37  ;;  %v1798_v53 = vmul.f32 1.442695, %v1788_v40 }
 0x4e9   : > { %v1802_v56 = vmul.f32 1.442695, %v1790_v43  ;;  %v1800_v62 = vmul.f32 1.442695, %v1789_v48  ;;  %v1806_v5 = vmul.f32 1.442695, %v1792_v59  ;;  %v1793_v4 = vsub.f32 %v7030_v22, %v1777_v55 }
 0x4ea   : > { %5624 = vpow2.f32 %v1794_v44  ;;  %v1804_v8 = vmul.f32 1.442695, %v1791_v60 }
 0x4eb   : > { %5626 = vpow2.f32 %v1796_v47  ;;  %v1808_v51 = vmul.f32 1.442695, %v1793_v4 }
 0x4ec   : > { %5628 = vpow2.f32 %v1798_v53 }
 0x4ed   : > { %5630 = vpow2.f32 %v1802_v56 }
 0x4ee   : > { %5632 = vpow2.f32 %v1800_v62 }
 0x4ef   : > { %5634 = vpow2.f32 %v1806_v5 }
 0x4f0   : > { %5636 = vpow2.f32 %v1804_v8 }
 0x4f1   : > { %5638 = vpow2.f32 %v1808_v51 }
 0x4f3   : > { %v2269_v0 = vpop.xlane.xlu1 %2268 }
 0x4f4   : > { %v2274_v52 = vrot.slane %v2269_v0, %v6868_v17  ;;  %v2278_v11 = vrot.slane %v2269_v0, %v6870_v18  ;;  %v2282_v57 = vrot.slane %v2269_v0, %v6872_v19  ;;  %v2286_v12 = vrot.slane %v2269_v0, %v6875_v21 }
 0x4f5   : > { %v2290_v61 = vrot.slane %v2269_v0, %v6881_v25  ;;  %v2294_v44 = vrot.slane %v2269_v0, %v6885_v28  ;;  %v2298_v47 = vrot.slane %v2269_v0, %v6888_v30  ;;  %v2302_v48 = vrot.slane %v2269_v0, %v6891_v32 }
 0x4f6   : > { %v2311_v33 = vsub.f32 %v7026_v20, %v2274_v52  ;;  %v2312_v22 = vsub.f32 %v7040_v29, %v2278_v11  ;;  %v2313_v36 = vsub.f32 %v7036_v27, %v2282_v57  ;;  %v2314_v7 = vsub.f32 %v7050_v35, %v2286_v12 }
 0x4f7   : > { %v7237_v6 = vpop.eup %5624  ;;  %v2315_v20 = vsub.f32 %v7046_v34, %v2290_v61  ;;  %v2316_v53 = vsub.f32 %v7060_v39, %v2294_v44  ;;  %v2317_v56 = vsub.f32 %v7056_v38, %v2298_v47  ;;  %v2318_v60 = vsub.f32 %v7070_v42, %v2302_v48 }
 0x4f8   : > { %v7239_v37 = vpop.eup %5626  ;;  %v2319_v40 = vmul.f32 1.442695, %v2311_v33  ;;  %1819 = vperm.xlu1 %5606, %v7237_v6   ;;  %v2321_v43 = vmul.f32 1.442695, %v2312_v22  ;;  %v2323_v29 = vmul.f32 1.442695, %v2313_v36 }
 0x4f9   : > { %1822 = vperm.xlu0 %5607, %v7239_v37   ;;  %v7246_v27 = vpop.eup %5628  ;;  %v2325_v35 = vmul.f32 1.442695, %v2314_v7  ;;  %v2327_v34 = vmul.f32 1.442695, %v2315_v20  ;;  %v2329_v5 = vmul.f32 1.442695, %v2316_v53 }
 0x4fa   : > { %5640 = vpow2.f32 %v2319_v40  ;;  %v7249_v13 = vpop.eup %5630  ;;  %v2331_v39 = vmul.f32 1.442695, %v2317_v56  ;;  %v2333_v52 = vmul.f32 1.442695, %v2318_v60 }
 0x4fb   : > { %5642 = vpow2.f32 %v2321_v43  ;;  %v7255_v59 = vpop.eup %5632 }
 0x4fc   : > { %1825 = vperm.xlu1 %5606, %v7246_v27   ;;  %5644 = vpow2.f32 %v2323_v29  ;;  %v7258_v55 = vpop.eup %5634 }
 0x4fd   : > { %1831 = vperm.xlu0 %5607, %v7249_v13   ;;  %5646 = vpow2.f32 %v2325_v35  ;;  %v7263_v62 = vpop.eup %5636 }
 0x4fe   : > { %5648 = vpow2.f32 %v2327_v34  ;;  %v7269_v11 = vpop.eup %5638 }
 0x4ff   : > { %5650 = vpow2.f32 %v2329_v5 }
 0x500   : > { %1828 = vperm.xlu1 %5606, %v7255_v59   ;;  %5652 = vpow2.f32 %v2331_v39 }
 0x501   : > { %1837 = vperm.xlu0 %5607, %v7258_v55   ;;  %5654 = vpow2.f32 %v2333_v52 }
 0x503   : > { %v2793_v4 = vpop.xlane.xlu0 %2792 }
 0x504   : > { %v2798_v8 = vrot.slane %v2793_v4, %v6868_v17  ;;  %v2802_v0 = vrot.slane %v2793_v4, %v6870_v18  ;;  %v2806_v38 = vrot.slane %v2793_v4, %v6872_v19  ;;  %1834 = vperm.xlu1 %5606, %v7263_v62   ;;  %v2810_v42 = vrot.slane %v2793_v4, %v6875_v21 }
 0x505   : > { %v2814_v61 = vrot.slane %v2793_v4, %v6881_v25  ;;  %v2818_v40 = vrot.slane %v2793_v4, %v6885_v28  ;;  %v2822_v43 = vrot.slane %v2793_v4, %v6888_v30  ;;  %v2826_v20 = vrot.slane %v2793_v4, %v6891_v32 }
 0x506   : > { %v2835_v57 = vsub.f32 %v7066_v41, %v2798_v8  ;;  %v2836_v51 = vsub.f32 %v7080_v46, %v2802_v0  ;;  %v2837_v33 = vsub.f32 %v7076_v45, %v2806_v38  ;;  %v2838_v41 = vsub.f32 %v7090_v50, %v2810_v42 }
 0x507   : > { %v7274_v12 = vpop.eup %5640  ;;  %v2839_v45 = vsub.f32 %v7086_v49, %v2814_v61  ;;  %v2840_v47 = vsub.f32 %v7100_v58, %v2818_v40  ;;  %v2841_v35 = vsub.f32 %v7096_v54, %v2822_v43  ;;  %v2842_v49 = vsub.f32 %v7106_v63, %v2826_v20 }
 0x508   : > { %v2843_v22 = vmul.f32 1.442695, %v2835_v57  ;;  %1840 = vperm.xlu1 %5606, %v7269_v11   ;;  %2344 = vperm.xlu0 %5607, %v7274_v12   ;;  %v7280_v36 = vpop.eup %5642  ;;  %v2845_v46 = vmul.f32 1.442695, %v2836_v51  ;;  %v2847_v44 = vmul.f32 1.442695, %v2837_v33 }
 0x509   : > { %v7284_v7 = vpop.eup %5644  ;;  %v2849_v50 = vmul.f32 1.442695, %v2838_v41  ;;  %v2851_v53 = vmul.f32 1.442695, %v2839_v45  ;;  %v2853_v34 = vmul.f32 1.442695, %v2840_v47 }
 0x50a   : > { %5656 = vpow2.f32 %v2843_v22  ;;  %v7291_v29 = vpop.eup %5646  ;;  %v2855_v58 = vmul.f32 1.442695, %v2841_v35  ;;  %v2857_v8 = vmul.f32 1.442695, %v2842_v49 }
 0x50b   : > { %5658 = vpow2.f32 %v2845_v46  ;;  %v7294_v48 = vpop.eup %5648 }
 0x50c   : > { %2347 = vperm.xlu1 %5606, %v7280_v36   ;;  %2350 = vperm.xlu0 %5607, %v7284_v7   ;;  %5660 = vpow2.f32 %v2847_v44  ;;  %v7300_v56 = vpop.eup %5650 }
 0x50d   : > { %5662 = vpow2.f32 %v2849_v50  ;;  %v7302_v5 = vpop.eup %5652 }
 0x50e   : > { %5664 = vpow2.f32 %v2851_v53  ;;  %v7309_v63 = vpop.eup %5654 }
 0x50f   : > { %5666 = vpow2.f32 %v2853_v34 }
 0x510   : > { %2353 = vperm.xlu1 %5606, %v7291_v29   ;;  %2356 = vperm.xlu0 %5607, %v7294_v48   ;;  %5668 = vpow2.f32 %v2855_v58 }
 0x511   : > { %5670 = vpow2.f32 %v2857_v8 }
 0x513   : > { %v3317_v60 = vpop.xlane.xlu0 %3316 }
 0x514   : > { %v3322_v39 = vrot.slane %v3317_v60, %v6868_v17  ;;  %v3326_v54 = vrot.slane %v3317_v60, %v6870_v18  ;;  %v3330_v4 = vrot.slane %v3317_v60, %v6872_v19  ;;  %2359 = vperm.xlu1 %5606, %v7300_v56   ;;  %2362 = vperm.xlu0 %5607, %v7302_v5  }
 0x515   : > { %v3334_v0 = vrot.slane %v3317_v60, %v6875_v21  ;;  %v3338_v57 = vrot.slane %v3317_v60, %v6881_v25  ;;  %v3342_v33 = vrot.slane %v3317_v60, %v6885_v28  ;;  %v3346_v40 = vrot.slane %v3317_v60, %v6888_v30 }
 0x516   : > { %v3359_v38 = vsub.f32 %v7110_v3, %v3322_v39  ;;  %v3360_v52 = vsub.f32 %v7116_v9, %v3326_v54  ;;  %v3361_v51 = vsub.f32 %v7120_v15, %v3330_v4  ;;  %v3350_v43 = vrot.slane %v3317_v60, %v6891_v32 }
 0x517   : > { %v7314_v42 = vpop.eup %5656  ;;  %v3362_v22 = vsub.f32 %v7126_v16, %v3334_v0  ;;  %v3363_v41 = vsub.f32 %v7130_v24, %v3338_v57  ;;  %v3364_v45 = vsub.f32 %v7136_v26, %v3342_v33  ;;  %v3365_v20 = vsub.f32 %v7140_v31, %v3346_v40 }
 0x518   : > { %v3367_v61 = vmul.f32 1.442695, %v3359_v38  ;;  %2365 = vperm.xlu1 %5606, %v7309_v63   ;;  %2868 = vperm.xlu0 %5607, %v7314_v42   ;;  %v3369_v3 = vmul.f32 1.442695, %v3360_v52  ;;  %v7322_v9 = vpop.eup %5658  ;;  %v3371_v46 = vmul.f32 1.442695, %v3361_v51  ;;  %v3366_v50 = vsub.f32 %v7146_v1, %v3350_v43 }
 0x519   : > { %v7326_v15 = vpop.eup %5660  ;;  %v3373_v16 = vmul.f32 1.442695, %v3362_v22  ;;  %v3375_v47 = vmul.f32 1.442695, %v3363_v41  ;;  %v3377_v35 = vmul.f32 1.442695, %v3364_v45 }
 0x51a   : > { %5672 = vpow2.f32 %v3367_v61  ;;  %v7332_v44 = vpop.eup %5662  ;;  %v3379_v26 = vmul.f32 1.442695, %v3365_v20  ;;  %v3381_v34 = vmul.f32 1.442695, %v3366_v50 }
 0x51b   : > { %5674 = vpow2.f32 %v3369_v3  ;;  %v7335_v24 = vpop.eup %5664 }
 0x51c   : > { %2871 = vperm.xlu1 %5606, %v7322_v9   ;;  %2874 = vperm.xlu0 %5607, %v7326_v15   ;;  %5676 = vpow2.f32 %v3371_v46  ;;  %v7340_v53 = vpop.eup %5666 }
 0x51d   : > { %5678 = vpow2.f32 %v3373_v16  ;;  %v7342_v49 = vpop.eup %5668 }
 0x51e   : > { %5680 = vpow2.f32 %v3375_v47  ;;  %v7346_v31 = vpop.eup %5670 }
 0x51f   : > { %5682 = vpow2.f32 %v3377_v35 }
 0x520   : > { %2877 = vperm.xlu1 %5606, %v7332_v44   ;;  %2880 = vperm.xlu0 %5607, %v7335_v24   ;;  %5684 = vpow2.f32 %v3379_v26 }
 0x521   : > { %5686 = vpow2.f32 %v3381_v34 }
 0x524   : > { %2883 = vperm.xlu1 %5606, %v7340_v53   ;;  %2886 = vperm.xlu0 %5607, %v7342_v49  }
 0x527   : > { %v7348_v58 = vpop.eup %5672 }
 0x528   : > { %2889 = vperm.xlu1 %5606, %v7346_v31   ;;  %3392 = vperm.xlu0 %5607, %v7348_v58   ;;  %v7352_v1 = vpop.eup %5674 }
 0x529   : > { %v7354_v60 = vpop.eup %5676 }
 0x52a   : > { %v7358_v39 = vpop.eup %5678 }
 0x52b   : > { %v7360_v54 = vpop.eup %5680 }
 0x52c   : > { %3395 = vperm.xlu1 %5606, %v7352_v1   ;;  %3398 = vperm.xlu0 %5607, %v7354_v60   ;;  %v7364_v4 = vpop.eup %5682 }
 0x52d   : > { %v7366_v8 = vpop.eup %5684 }
 0x52e   : > { %v7370_v0 = vpop.eup %5686 }
 0x530   : > { %3401 = vperm.xlu1 %5606, %v7358_v39   ;;  %3404 = vperm.xlu0 %5607, %v7360_v54  }
 0x534   : > { %3407 = vperm.xlu1 %5606, %v7364_v4   ;;  %3410 = vperm.xlu0 %5607, %v7366_v8  }
 0x538   : > { %3413 = vperm.xlu1 %5606, %v7370_v0  }
 0x573   : > { %v1820_v38 = vpop.permute.xlu1 %1819 }
 0x574   : > { %v1823_v52 = vpop.permute.xlu0 %1822  ;;  %v1845_v61 = vrot.slane %v1820_v38, %v6878_v23 }
 0x575   : > { %v1849_v51 = vrot.slane %v1823_v52, %v6878_v23 }
 0x577   : > { %v1826_v57 = vpop.permute.xlu1 %1825  ;;  %v1874_v40 = vsel %vm1727_vm5, %v1849_v51, %v1845_v61 }
 0x578   : > { %v1832_v33 = vpop.permute.xlu0 %1831  ;;  %v1853_v22 = vrot.slane %v1826_v57, %v6878_v23 }
 0x579   : > { %v1861_v45 = vrot.slane %v1832_v33, %v6878_v23 }
 0x57a   : > { %v1875_v46 = vsel %vm1729_vm8, %v1853_v22, %v1874_v40 }
 0x57b   : > { %v1829_v3 = vpop.permute.xlu1 %1828 }
 0x57c   : > { %v1857_v41 = vrot.slane %v1829_v3, %v6878_v23  ;;  %v1838_v16 = vpop.permute.xlu0 %1837 }
 0x57d   : > { %v1869_v26 = vrot.slane %v1838_v16, %v6878_v23 }
 0x57e   : > { %v1876_v43 = vsel %vm1731_vm9, %v1857_v41, %v1875_v46 }
 0x57f   : > { %v1835_v20 = vpop.permute.xlu1 %1834  ;;  %v1877_v50 = vsel %vm1733_vm11, %v1861_v45, %v1876_v43 }
 0x580   : > { %v1865_v47 = vrot.slane %v1835_v20, %v6878_v23 }
 0x582   : > { %v1878_v35 = vsel %vm1735_vm13, %v1865_v47, %v1877_v50 }
 0x583   : > { %v2345_v34 = vpop.permute.xlu0 %2344  ;;  %v1841_v38 = vpop.permute.xlu1 %1840  ;;  %v1879_v57 = vsel %vm1737_vm14, %v1869_v26, %v1878_v35 }
 0x584   : > { %v1873_v52 = vrot.slane %v1841_v38, %v6878_v23  ;;  %v2370_v3 = vrot.slane %v2345_v34, %v6878_v23 }
 0x586   : > { %v1880_v51 = vsel %vm1739_vm15, %v1873_v52, %v1879_v57 }
 0x587   : > { %v2351_v61 = vpop.permute.xlu0 %2350  ;;  %v2348_v33 = vpop.permute.xlu1 %2347  ;;  %v1882_v22 = vsel %vm1543_vm4, %v1880_v51, 0.0 }
 0x588   : > { %v2374_v40 = vrot.slane %v2348_v33, %v6878_v23  ;;  %1883 = vadd.xlane.f32.xlu0 %v1882_v22  ;;  %v2378_v41 = vrot.slane %v2351_v61, %v6878_v23 }
 0x58a   : > { %v2399_v46 = vsel %vm1727_vm5, %v2374_v40, %v2370_v3 }
 0x58b   : > { %v2357_v43 = vpop.permute.xlu0 %2356  ;;  %v2354_v45 = vpop.permute.xlu1 %2353  ;;  %v2400_v47 = vsel %vm1729_vm8, %v2378_v41, %v2399_v46 }
 0x58c   : > { %v2382_v16 = vrot.slane %v2354_v45, %v6878_v23  ;;  %v2386_v20 = vrot.slane %v2357_v43, %v6878_v23 }
 0x58e   : > { %v2401_v50 = vsel %vm1731_vm9, %v2382_v16, %v2400_v47 }
 0x58f   : > { %v2360_v35 = vpop.permute.xlu1 %2359  ;;  %v2363_v26 = vpop.permute.xlu0 %2362  ;;  %v2402_v52 = vsel %vm1733_vm11, %v2386_v20, %v2401_v50 }
 0x590   : > { %v2390_v34 = vrot.slane %v2360_v35, %v6878_v23  ;;  %v2394_v38 = vrot.slane %v2363_v26, %v6878_v23 }
 0x592   : > { %v2403_v57 = vsel %vm1735_vm13, %v2390_v34, %v2402_v52 }
 0x593   : > { %v2366_v51 = vpop.permute.xlu1 %2365  ;;  %v2869_v61 = vpop.permute.xlu0 %2868  ;;  %v2404_v22 = vsel %vm1737_vm14, %v2394_v38, %v2403_v57 }
 0x594   : > { %v2398_v33 = vrot.slane %v2366_v51, %v6878_v23  ;;  %v2894_v46 = vrot.slane %v2869_v61, %v6878_v23 }
 0x596   : > { %v2405_v3 = vsel %vm1739_vm15, %v2398_v33, %v2404_v22 }
 0x597   : > { %v2872_v40 = vpop.permute.xlu1 %2871  ;;  %v2407_v41 = vsel %vm1543_vm4, %v2405_v3, 0.0  ;;  %v2875_v43 = vpop.permute.xlu0 %2874 }
 0x598   : > { %v2898_v45 = vrot.slane %v2872_v40, %v6878_v23  ;;  %2408 = vadd.xlane.f32.xlu1 %v2407_v41  ;;  %v2902_v16 = vrot.slane %v2875_v43, %v6878_v23 }
 0x59a   : > { %v2923_v20 = vsel %vm1727_vm5, %v2898_v45, %v2894_v46 }
 0x59b   : > { %v2878_v47 = vpop.permute.xlu1 %2877  ;;  %v2881_v50 = vpop.permute.xlu0 %2880  ;;  %v2924_v34 = vsel %vm1729_vm8, %v2902_v16, %v2923_v20 }
 0x59c   : > { %v2906_v35 = vrot.slane %v2878_v47, %v6878_v23  ;;  %v2910_v26 = vrot.slane %v2881_v50, %v6878_v23 }
 0x59e   : > { %v2925_v38 = vsel %vm1731_vm9, %v2906_v35, %v2924_v34 }
 0x59f   : > { %v2884_v52 = vpop.permute.xlu1 %2883  ;;  %v2887_v57 = vpop.permute.xlu0 %2886  ;;  %v2926_v33 = vsel %vm1733_vm11, %v2910_v26, %v2925_v38 }
 0x5a0   : > { %v2914_v51 = vrot.slane %v2884_v52, %v6878_v23  ;;  %v2918_v61 = vrot.slane %v2887_v57, %v6878_v23 }
 0x5a2   : > { %v2927_v22 = vsel %vm1735_vm13, %v2914_v51, %v2926_v33 }
 0x5a3   : > { %v2890_v3 = vpop.permute.xlu1 %2889  ;;  %v3393_v40 = vpop.permute.xlu0 %3392  ;;  %v2928_v46 = vsel %vm1737_vm14, %v2918_v61, %v2927_v22 }
 0x5a4   : > { %v2922_v41 = vrot.slane %v2890_v3, %v6878_v23  ;;  %v3418_v20 = vrot.slane %v3393_v40, %v6878_v23 }
 0x5a6   : > { %v2929_v43 = vsel %vm1739_vm15, %v2922_v41, %v2928_v46 }
 0x5a7   : > { %v3396_v45 = vpop.permute.xlu1 %3395  ;;  %v2931_v16 = vsel %vm1543_vm4, %v2929_v43, 0.0  ;;  %v3399_v47 = vpop.permute.xlu0 %3398 }
 0x5a8   : > { %v3422_v50 = vrot.slane %v3396_v45, %v6878_v23  ;;  %2932 = vadd.xlane.f32.xlu0 %v2931_v16  ;;  %v3426_v35 = vrot.slane %v3399_v47, %v6878_v23 }
 0x5a9   : > { %2023 = vrot.lane.b32.xlu1 %v6850_v10, %s6288_s9 }
 0x5aa   : > { %v3447_v26 = vsel %vm1727_vm5, %v3422_v50, %v3418_v20 }
 0x5ab   : > { %v3402_v34 = vpop.permute.xlu1 %3401  ;;  %v3405_v38 = vpop.permute.xlu0 %3404  ;;  %v3448_v51 = vsel %vm1729_vm8, %v3426_v35, %v3447_v26 }
 0x5ac   : > { %v3430_v52 = vrot.slane %v3402_v34, %v6878_v23  ;;  %v3434_v57 = vrot.slane %v3405_v38, %v6878_v23 }
 0x5ad   : > { %3072 = vrot.lane.b32.xlu1 %v6850_v10, %s6289_s27 }
 0x5ae   : > { %v3449_v61 = vsel %vm1731_vm9, %v3430_v52, %v3448_v51 }
 0x5af   : > { %v3408_v33 = vpop.permute.xlu1 %3407  ;;  %v3411_v22 = vpop.permute.xlu0 %3410  ;;  %v3450_v41 = vsel %vm1733_vm11, %v3434_v57, %v3449_v61 }
 0x5b0   : > { %v3438_v3 = vrot.slane %v3408_v33, %v6878_v23  ;;  %v3442_v40 = vrot.slane %v3411_v22, %v6878_v23 }
 0x5b2   : > { %v3451_v46 = vsel %vm1735_vm13, %v3438_v3, %v3450_v41 }
 0x5b3   : > { %v3414_v43 = vpop.permute.xlu1 %3413  ;;  %v3452_v16 = vsel %vm1737_vm14, %v3442_v40, %v3451_v46 }
 0x5b4   : > { %v3446_v45 = vrot.slane %v3414_v43, %v6878_v23 }
 0x5b6   : > { %v3453_v20 = vsel %vm1739_vm15, %v3446_v45, %v3452_v16 }
 0x5b7   : > { %v3455_v47 = vsel %vm1543_vm4, %v3453_v20, 0.0 }
 0x5b8   : > { %3456 = vadd.xlane.f32.xlu0 %v3455_v47 }
 0x5ce   : > { %2548 = vrot.lane.b32.xlu0 %v6850_v10, %s6290_s2 }
 0x611   : > { %v1884_v50 = vpop.xlane.xlu0 %1883 }
 0x612   : > { %5688 = vrcp.f32 %v1884_v50 }
 0x61f   : > { %v5689_v35 = vpop.eup %5688 }
 0x620   : > { %v1890_v26 = vrot.slane %v5689_v35, %v6868_v17  ;;  %v1894_v34 = vrot.slane %v5689_v35, %v6870_v18  ;;  %v1898_v38 = vrot.slane %v5689_v35, %v6872_v19  ;;  %v1906_v52 = vrot.slane %v5689_v35, %v6881_v25 }
 0x621   : > { %v2409_v57 = vpop.xlane.xlu1 %2408  ;;  %v1902_v51 = vrot.slane %v5689_v35, %v6875_v21  ;;  %v1914_v61 = vrot.slane %v5689_v35, %v6888_v30  ;;  %v1910_v47 = vrot.slane %v5689_v35, %v6885_v28 }
 0x622   : > { %5690 = vrcp.f32 %v2409_v57  ;;  %v1927_v33 = vmul.f32 %v7237_v6, %v1890_v26  ;;  %v1928_v22 = vmul.f32 %v7239_v37, %v1894_v34  ;;  %v1929_v3 = vmul.f32 %v7246_v27, %v1898_v38 }
 0x623   : > { %v1931_v40 = vmul.f32 %v7249_v13, %v1906_v52  ;;  %v1930_v16 = vmul.f32 %v7255_v59, %v1902_v51  ;;  %v1933_v20 = vmul.f32 %v7258_v55, %v1914_v61  ;;  %v1932_v27 = vmul.f32 %v7263_v62, %v1910_v47 }
 0x624   : > { %v1935_v41 = vpack.c.bf16 %v1927_v33, %v1927_v33  ;;  %v1936_v46 = vpack.c.bf16 %v1928_v22, %v1928_v22  ;;  %v1937_v45 = vpack.c.bf16 %v1929_v3, %v1929_v3  ;;  %v1918_v13 = vrot.slane %v5689_v35, %v6891_v32 }
 0x625   : > { %v2024_v43 = vpop.permute.xlu1 %2023  ;;  %v1939_v37 = vpack.c.bf16 %v1931_v40, %v1931_v40  ;;  %v1938_v38 = vpack.c.bf16 %v1930_v16, %v1930_v16  ;;  %v1941_v55 = vpack.c.bf16 %v1933_v20, %v1933_v20  ;;  %v1940_v52 = vpack.c.bf16 %v1932_v27, %v1932_v27 }
 0x626   : > { %v2030_v50 = vsel %vm2028_vm0, %v2024_v43, 0  ;;  %v1951_v6 = vunpack.c.l.b16 %v1935_v41  ;;  %v1952_v26 = vunpack.c.l.b16 %v1936_v46  ;;  %v1953_v34 = vunpack.c.l.b16 %v1937_v45 }
 0x627   : > { %5279 = vmatpush3.bf16.msra.mxu0 %v2030_v50  ;;  %v1955_v59 = vunpack.c.l.b16 %v1939_v37  ;;  %v1934_v57 = vmul.f32 %v7269_v11, %v1918_v13  ;;  %v1954_v51 = vunpack.c.l.b16 %v1938_v38  ;;  %v1957_v61 = vunpack.c.l.b16 %v1941_v55 }
 0x628   : > { %1960 = vperm.xlu1 %5606, %v1951_v6   ;;  %1963 = vperm.xlu0 %5607, %v1952_v26   ;;  %v1956_v40 = vunpack.c.l.b16 %v1940_v52 }
 0x629   : > { %5290 = vmatprep.subr.bf16.mxu0 %v6278_v2  ;;  %v1942_v41 = vpack.c.bf16 %v1934_v57, %v1934_v57 }
 0x62b   : > { %v1958_v50 = vunpack.c.l.b16 %v1942_v41 }
 0x62c   : > { %1966 = vperm.xlu1 %5606, %v1953_v34   ;;  %1972 = vperm.xlu0 %5607, %v1955_v59  }
 0x62f   : > { %v5691_v33 = vpop.eup %5690 }
 0x630   : > { %1969 = vperm.xlu1 %5606, %v1954_v51   ;;  %1978 = vperm.xlu0 %5607, %v1957_v61   ;;  %v2415_v62 = vrot.slane %v5691_v33, %v6868_v17  ;;  %v2419_v35 = vrot.slane %v5691_v33, %v6870_v18  ;;  %v2423_v22 = vrot.slane %v5691_v33, %v6872_v19 }
 0x631   : > { %v2933_v3 = vpop.xlane.xlu0 %2932  ;;  %v2427_v46 = vrot.slane %v5691_v33, %v6875_v21  ;;  %v2431_v43 = vrot.slane %v5691_v33, %v6881_v25  ;;  %v2439_v47 = vrot.slane %v5691_v33, %v6888_v30  ;;  %v2435_v26 = vrot.slane %v5691_v33, %v6885_v28 }
 0x632   : > { %5692 = vrcp.f32 %v2933_v3  ;;  %v2452_v11 = vmul.f32 %v7274_v12, %v2415_v62  ;;  %v2453_v45 = vmul.f32 %v7280_v36, %v2419_v35  ;;  %v2454_v16 = vmul.f32 %v7284_v7, %v2423_v22 }
 0x633   : > { %v2455_v6 = vmul.f32 %v7291_v29, %v2427_v46  ;;  %v2456_v34 = vmul.f32 %v7294_v48, %v2431_v43  ;;  %v2458_v12 = vmul.f32 %v7302_v5, %v2439_v47  ;;  %v2457_v36 = vmul.f32 %v7300_v56, %v2435_v26 }
 0x634   : > { %1975 = vperm.xlu1 %5606, %v1956_v40   ;;  %v2460_v20 = vpack.c.bf16 %v2452_v11, %v2452_v11  ;;  %v2461_v27 = vpack.c.bf16 %v2453_v45, %v2453_v45  ;;  %v2462_v13 = vpack.c.bf16 %v2454_v16, %v2454_v16  ;;  %v2443_v7 = vrot.slane %v5691_v33, %v6891_v32 }
 0x635   : > { %v2463_v55 = vpack.c.bf16 %v2455_v6, %v2455_v6  ;;  %v2464_v52 = vpack.c.bf16 %v2456_v34, %v2456_v34  ;;  %v2466_v29 = vpack.c.bf16 %v2458_v12, %v2458_v12  ;;  %v2465_v57 = vpack.c.bf16 %v2457_v36, %v2457_v36 }
 0x636   : > { %v2476_v37 = vunpack.c.l.b16 %v2460_v20  ;;  %v2477_v59 = vunpack.c.l.b16 %v2461_v27  ;;  %v2478_v38 = vunpack.c.l.b16 %v2462_v13  ;;  %v2459_v51 = vmul.f32 %v7309_v63, %v2443_v7 }
 0x637   : > { %v2479_v61 = vunpack.c.l.b16 %v2463_v55  ;;  %v2480_v48 = vunpack.c.l.b16 %v2464_v52  ;;  %v2482_v5 = vunpack.c.l.b16 %v2466_v29  ;;  %v2481_v3 = vunpack.c.l.b16 %v2465_v57 }
 0x638   : > { %1981 = vperm.xlu1 %5606, %v1958_v50   ;;  %2485 = vperm.xlu0 %5607, %v2476_v37   ;;  %v2467_v40 = vpack.c.bf16 %v2459_v51, %v2459_v51 }
 0x63a   : > { %v2483_v16 = vunpack.c.l.b16 %v2467_v40 }
 0x63c   : > { %2488 = vperm.xlu1 %5606, %v2477_v59   ;;  %2491 = vperm.xlu0 %5607, %v2478_v38  }
 0x63f   : > { %v5693_v62 = vpop.eup %5692 }
 0x640   : > { %2494 = vperm.xlu1 %5606, %v2479_v61   ;;  %2497 = vperm.xlu0 %5607, %v2480_v48   ;;  %v2939_v56 = vrot.slane %v5693_v62, %v6868_v17  ;;  %v2947_v33 = vrot.slane %v5693_v62, %v6872_v19  ;;  %v2943_v35 = vrot.slane %v5693_v62, %v6870_v18 }
 0x641   : > { %v3457_v22 = vpop.xlane.xlu0 %3456  ;;  %v2955_v41 = vrot.slane %v5693_v62, %v6881_v25  ;;  %v2951_v46 = vrot.slane %v5693_v62, %v6875_v21  ;;  %v2959_v47 = vrot.slane %v5693_v62, %v6885_v28  ;;  %v2963_v50 = vrot.slane %v5693_v62, %v6888_v30 }
 0x642   : > { %5694 = vrcp.f32 %v3457_v22  ;;  %v2976_v63 = vmul.f32 %v7314_v42, %v2939_v56  ;;  %v2978_v43 = vmul.f32 %v7326_v15, %v2947_v33  ;;  %v2977_v11 = vmul.f32 %v7322_v9, %v2943_v35 }
 0x643   : > { %v2980_v20 = vmul.f32 %v7335_v24, %v2955_v41  ;;  %v2979_v27 = vmul.f32 %v7332_v44, %v2951_v46  ;;  %v2981_v42 = vmul.f32 %v7340_v53, %v2959_v47  ;;  %v2982_v9 = vmul.f32 %v7342_v49, %v2963_v50 }
 0x644   : > { %2503 = vperm.xlu1 %5606, %v2482_v5   ;;  %2500 = vperm.xlu0 %5607, %v2481_v3   ;;  %v2984_v45 = vpack.c.bf16 %v2976_v63, %v2976_v63  ;;  %v2986_v26 = vpack.c.bf16 %v2978_v43, %v2978_v43  ;;  %v2985_v37 = vpack.c.bf16 %v2977_v11, %v2977_v11 }
 0x645   : > { %v2967_v15 = vrot.slane %v5693_v62, %v6891_v32  ;;  %v2988_v24 = vpack.c.bf16 %v2980_v20, %v2980_v20  ;;  %v2987_v12 = vpack.c.bf16 %v2979_v27, %v2979_v27  ;;  %v2989_v36 = vpack.c.bf16 %v2981_v42, %v2981_v42 }
 0x646   : > { %v3000_v6 = vunpack.c.l.b16 %v2984_v45  ;;  %v3002_v13 = vunpack.c.l.b16 %v2986_v26  ;;  %v3001_v34 = vunpack.c.l.b16 %v2985_v37  ;;  %v2990_v7 = vpack.c.bf16 %v2982_v9, %v2982_v9 }
 0x647   : > { %v2983_v59 = vmul.f32 %v7346_v31, %v2967_v15  ;;  %v3004_v38 = vunpack.c.l.b16 %v2988_v24  ;;  %v3003_v44 = vunpack.c.l.b16 %v2987_v12  ;;  %v3005_v29 = vunpack.c.l.b16 %v2989_v36 }
 0x648   : > { %3009 = vperm.xlu1 %5606, %v3000_v6   ;;  %2506 = vperm.xlu0 %5607, %v2483_v16   ;;  %v3006_v57 = vunpack.c.l.b16 %v2990_v7  ;;  %v2549_v16 = vpop.permute.xlu0 %2548 }
 0x649   : > { %v2991_v51 = vpack.c.bf16 %v2983_v59, %v2983_v59 }
 0x64b   : > { %v3007_v33 = vunpack.c.l.b16 %v2991_v51 }
 0x64c   : > { %3015 = vperm.xlu1 %5606, %v3002_v13   ;;  %3012 = vperm.xlu0 %5607, %v3001_v34  }
 0x64f   : > { %v5695_v55 = vpop.eup %5694 }
 0x650   : > { %3021 = vperm.xlu1 %5606, %v3004_v38   ;;  %3018 = vperm.xlu0 %5607, %v3003_v44   ;;  %v3463_v53 = vrot.slane %v5695_v55, %v6868_v17  ;;  %v3467_v49 = vrot.slane %v5695_v55, %v6870_v18  ;;  %v3471_v52 = vrot.slane %v5695_v55, %v6872_v19 }
 0x651   : > { %v3475_v61 = vrot.slane %v5695_v55, %v6875_v21  ;;  %v3479_v5 = vrot.slane %v5695_v55, %v6881_v25  ;;  %v3487_v19 = vrot.slane %v5695_v55, %v6888_v30  ;;  %v3483_v35 = vrot.slane %v5695_v55, %v6885_v28 }
 0x652   : > { %v3500_v48 = vmul.f32 %v7348_v58, %v3463_v53  ;;  %v3501_v31 = vmul.f32 %v7352_v1, %v3467_v49  ;;  %v3502_v62 = vmul.f32 %v7354_v60, %v3471_v52  ;;  %v3491_v60 = vrot.slane %v5695_v55, %v6891_v32 }
 0x653   : > { %v3503_v18 = vmul.f32 %v7358_v39, %v3475_v61  ;;  %v3504_v58 = vmul.f32 %v7360_v54, %v3479_v5  ;;  %v3506_v1 = vmul.f32 %v7366_v8, %v3487_v19  ;;  %v3505_v25 = vmul.f32 %v7364_v4, %v3483_v35  ;;  %v3073_v4 = vpop.permute.xlu1 %3072 }
 0x654   : > { %3024 = vperm.xlu1 %5606, %v3005_v29   ;;  %3027 = vperm.xlu0 %5607, %v3006_v57   ;;  %v3508_v56 = vpack.c.bf16 %v3500_v48, %v3500_v48  ;;  %v3509_v21 = vpack.c.bf16 %v3501_v31, %v3501_v31  ;;  %v3510_v3 = vpack.c.bf16 %v3502_v62, %v3502_v62  ;;  %v2554_v48 = vsel %vm2028_vm0, %v2549_v16, 0 }
 0x655   : > { %v3511_v39 = vpack.c.bf16 %v3503_v18, %v3503_v18  ;;  %v3512_v46 = vpack.c.bf16 %v3504_v58, %v3504_v58  ;;  %v3514_v28 = vpack.c.bf16 %v3506_v1, %v3506_v1  ;;  %v3513_v43 = vpack.c.bf16 %v3505_v25, %v3505_v25 }
 0x656   : > { %v3524_v22 = vunpack.c.l.b16 %v3508_v56  ;;  %v3525_v40 = vunpack.c.l.b16 %v3509_v21  ;;  %v3526_v41 = vunpack.c.l.b16 %v3510_v3  ;;  %v3507_v54 = vmul.f32 %v7370_v0, %v3491_v60 }
 0x657   : > { %v3527_v30 = vunpack.c.l.b16 %v3511_v39  ;;  %v3528_v63 = vunpack.c.l.b16 %v3512_v46  ;;  %v3530_v11 = vunpack.c.l.b16 %v3514_v28  ;;  %v3529_v8 = vunpack.c.l.b16 %v3513_v43 }
 0x658   : > { %3030 = vperm.xlu1 %5606, %v3007_v33   ;;  %3533 = vperm.xlu0 %5607, %v3524_v22   ;;  %v3515_v45 = vpack.c.bf16 %v3507_v54, %v3507_v54 }
 0x65a   : > { %v3531_v32 = vunpack.c.l.b16 %v3515_v45 }
 0x65c   : > { %3536 = vperm.xlu1 %5606, %v3525_v40   ;;  %3539 = vperm.xlu0 %5607, %v3526_v41  }
 0x660   : > { %3542 = vperm.xlu1 %5606, %v3527_v30   ;;  %3545 = vperm.xlu0 %5607, %v3528_v63  }
 0x664   : > { %3551 = vperm.xlu1 %5606, %v3530_v11   ;;  %3548 = vperm.xlu0 %5607, %v3529_v8   ;;  %v3078_v11 = vsel %vm2028_vm0, %v3073_v4, 0 }
 0x668   : > { %3596 = vrot.lane.b32.xlu1 %v6850_v10, %s6291_s11  ;;  %3554 = vperm.xlu0 %5607, %v3531_v32  }
 0x6a3   : > { %v1964_v20 = vpop.permute.xlu0 %1963  ;;  %v1961_v47 = vpop.permute.xlu1 %1960 }
 0x6a4   : > { %v1990_v6 = vrot.slane %v1964_v20, %v6878_v23  ;;  %v1986_v0 = vrot.slane %v1961_v47, %v6878_v23 }
 0x6a6   : > { %v2015_v42 = vsel %vm1727_vm5, %v1990_v6, %v1986_v0 }
 0x6a7   : > { %v1967_v50 = vpop.permute.xlu1 %1966  ;;  %v1973_v26 = vpop.permute.xlu0 %1972 }
 0x6a8   : > { %v1994_v37 = vrot.slane %v1967_v50, %v6878_v23  ;;  %v2002_v13 = vrot.slane %v1973_v26, %v6878_v23 }
 0x6aa   : > { %v2016_v10 = vsel %vm1729_vm8, %v1994_v37, %v2015_v42 }
 0x6ab   : > { %v1970_v27 = vpop.permute.xlu1 %1969  ;;  %v1979_v34 = vpop.permute.xlu0 %1978 }
 0x6ac   : > { %v1998_v9 = vrot.slane %v1970_v27, %v6878_v23  ;;  %v2010_v59 = vrot.slane %v1979_v34, %v6878_v23 }
 0x6ae   : > { %v2017_v15 = vsel %vm1731_vm9, %v1998_v9, %v2016_v10 }
 0x6af   : > { %v1976_v24 = vpop.permute.xlu1 %1975  ;;  %v2018_v36 = vsel %vm1733_vm11, %v2002_v13, %v2017_v15 }
 0x6b0   : > { %v2006_v12 = vrot.slane %v1976_v24, %v6878_v23 }
 0x6b2   : > { %v2019_v7 = vsel %vm1735_vm13, %v2006_v12, %v2018_v36 }
 0x6b3   : > { %v2486_v38 = vpop.permute.xlu0 %2485  ;;  %v1982_v44 = vpop.permute.xlu1 %1981  ;;  %v2020_v53 = vsel %vm1737_vm14, %v2010_v59, %v2019_v7 }
 0x6b4   : > { %v2014_v55 = vrot.slane %v1982_v44, %v6878_v23  ;;  %v2511_v51 = vrot.slane %v2486_v38, %v6878_v23 }
 0x6b6   : > { %v2021_v49 = vsel %vm1739_vm15, %v2014_v55, %v2020_v53 }
 0x6b7   : > { %v2022_v52 = vpack.c.b16 %v2021_v49, %v2021_v49  ;;  %v2492_v29 = vpop.permute.xlu0 %2491  ;;  %v2489_v57 = vpop.permute.xlu1 %2488 }
 0x6b8   : > { %v2515_v61 = vrot.slane %v2489_v57, %v6878_v23  ;;  %v2519_v31 = vrot.slane %v2492_v29, %v6878_v23 }
 0x6b9   : > { %5281 = vmatmul.mubr.msk.bf16.vlgmr.msra.gmra.mxu0 %vm1543_vm4, %v2022_v52 }
 0x6ba   : > { %v2540_v62 = vsel %vm1727_vm5, %v2515_v61, %v2511_v51  ;;  %5291 = vmatpush3.bf16.msra.mxu0 %v2554_v48  ;;  %5292 = vmatprep.mubr.msk.bf16.mxu0 %vm6279_vm1, %v6278_v2 }
 0x6bb   : > { %v2498_v5 = vpop.permute.xlu0 %2497  ;;  %v2495_v56 = vpop.permute.xlu1 %2494  ;;  %5302 = vmatprep.subr.bf16.mxu0 %v6278_v2  ;;  %v2541_v19 = vsel %vm1729_vm8, %v2519_v31, %v2540_v62 }
 0x6bc   : > { %v2523_v33 = vrot.slane %v2495_v56, %v6878_v23  ;;  %v2527_v18 = vrot.slane %v2498_v5, %v6878_v23 }
 0x6be   : > { %v2542_v35 = vsel %vm1731_vm9, %v2523_v33, %v2541_v19 }
 0x6bf   : > { %v2501_v22 = vpop.permute.xlu0 %2500  ;;  %v2504_v21 = vpop.permute.xlu1 %2503  ;;  %v2543_v58 = vsel %vm1733_vm11, %v2527_v18, %v2542_v35 }
 0x6c0   : > { %v2531_v3 = vrot.slane %v2501_v22, %v6878_v23  ;;  %v2535_v1 = vrot.slane %v2504_v21, %v6878_v23 }
 0x6c2   : > { %v2544_v25 = vsel %vm1735_vm13, %v2531_v3, %v2543_v58 }
 0x6c3   : > { %v2507_v60 = vpop.permute.xlu0 %2506  ;;  %v3010_v40 = vpop.permute.xlu1 %3009  ;;  %v2545_v39 = vsel %vm1737_vm14, %v2535_v1, %v2544_v25 }
 0x6c4   : > { %v2539_v41 = vrot.slane %v2507_v60, %v6878_v23  ;;  %v3035_v43 = vrot.slane %v3010_v40, %v6878_v23 }
 0x6c6   : > { %v2546_v46 = vsel %vm1739_vm15, %v2539_v41, %v2545_v39  ;;  %v5610_v41 = vld [vmem:[%s6813_s26 + $0x8] sm:$0xff]  }
 0x6c7   : > { %v2547_v28 = vpack.c.b16 %v2546_v46, %v2546_v46  ;;  %v3013_v30 = vpop.permute.xlu0 %3012  ;;  %v3016_v63 = vpop.permute.xlu1 %3015  ;;  %5321 = vmatpush3.bf16.msra.mxu1 %v5610_v41 }
 0x6c8   : > { %v3039_v54 = vrot.slane %v3013_v30, %v6878_v23  ;;  %v3043_v8 = vrot.slane %v3016_v63, %v6878_v23  ;;  %5322 = vmatprep.subr.bf16.mxu1 %v6278_v2  ;;  %v5718_v63 = vld [vmem:[%s6801_s5] sm:$0xff]  ;;  %s7974_s5 = scalar_lea.vmem [#allocation6], %s6716_s10 }
 0x6c9   : > { %5293 = vmatmul.mubr.msk.bf16.vlgmr.msra.gmra.mxu0 %vm1543_vm4, %v2547_v28 }
 0x6ca   : > { %v3064_v45 = vsel %vm1727_vm5, %v3039_v54, %v3035_v43  ;;  %5303 = vmatpush3.bf16.msra.mxu0 %v3078_v11  ;;  %5304 = vmatprep.mubr.msk.bf16.mxu0 %vm6279_vm1, %v6278_v2  ;;  %v5611_v43 = vld [vmem:[%s6813_s26] sm:$0xff]   ;;  %s7976_s26 = scalar_lea.vmem [#allocation9], %s6716_s10 }
 0x6cb   : > { %v3019_v32 = vpop.permute.xlu0 %3018  ;;  %v3022_v16 = vpop.permute.xlu1 %3021  ;;  %5314 = vmatprep.subr.bf16.mxu0 %v6278_v2  ;;  %v3065_v47 = vsel %vm1729_vm8, %v3043_v8, %v3064_v45  ;;  %5323 = vmatpush3.bf16.msra.mxu1 %v5611_v43 }
 0x6cc   : > { %v3047_v20 = vrot.slane %v3019_v32, %v6878_v23  ;;  %v3051_v4 = vrot.slane %v3022_v16, %v6878_v23  ;;  %5336 = vmatprep.subr.bf16.mxu1 %v6278_v2 }
 0x6ce   : > { %v3066_v50 = vsel %vm1731_vm9, %v3047_v20, %v3065_v47 }
 0x6cf   : > { %v3028_v6 = vpop.permute.xlu0 %3027  ;;  %v3025_v0 = vpop.permute.xlu1 %3024  ;;  %v3067_v37 = vsel %vm1733_vm11, %v3051_v4, %v3066_v50 }
 0x6d0   : > { %v3055_v26 = vrot.slane %v3025_v0, %v6878_v23  ;;  %v3059_v27 = vrot.slane %v3028_v6, %v6878_v23 }
 0x6d2   : > { %v3068_v42 = vsel %vm1735_vm13, %v3055_v26, %v3067_v37  ;;  %v5157_v26 = vld [vmem:[%s7974_s5] ss:$0 sm:$0xff] }
 0x6d3   : > { %v3534_v9 = vpop.permute.xlu0 %3533  ;;  %v3031_v10 = vpop.permute.xlu1 %3030  ;;  %v3069_v13 = vsel %vm1737_vm14, %v3059_v27, %v3068_v42 }
 0x6d4   : > { %v3063_v15 = vrot.slane %v3031_v10, %v6878_v23  ;;  %v3559_v7 = vrot.slane %v3534_v9, %v6878_v23 }
 0x6d6   : > { %v3070_v34 = vsel %vm1739_vm15, %v3063_v15, %v3069_v13  ;;  %v5719_v13 = vld [vmem:[#allocation2] sm:$0xff] }
 0x6d7   : > { %v3071_v24 = vpack.c.b16 %v3070_v34, %v3070_v34  ;;  %v3540_v12 = vpop.permute.xlu0 %3539  ;;  %v3537_v36 = vpop.permute.xlu1 %3536 }
 0x6d8   : > { %v3563_v59 = vrot.slane %v3537_v36, %v6878_v23  ;;  %v3567_v38 = vrot.slane %v3540_v12, %v6878_v23 }
 0x6d9   : > { %5305 = vmatmul.mubr.msk.bf16.vlgmr.msra.gmra.mxu0 %vm1543_vm4, %v3071_v24 }
 0x6da   : > { %v3588_v44 = vsel %vm1727_vm5, %v3563_v59, %v3559_v7  ;;  %5316 = vmatprep.mubr.msk.bf16.mxu0 %vm6279_vm1, %v6278_v2 }
 0x6db   : > { %v3546_v55 = vpop.permute.xlu0 %3545  ;;  %v3543_v53 = vpop.permute.xlu1 %3542  ;;  %v3589_v29 = vsel %vm1729_vm8, %v3567_v38, %v3588_v44 }
 0x6dc   : > { %v3571_v49 = vrot.slane %v3543_v53, %v6878_v23  ;;  %v3575_v52 = vrot.slane %v3546_v55, %v6878_v23  ;;  %v5612_v55 = vld [vmem:[%s6823_s15 + $0x8] sm:$0xff]   ;;  %v5613_v53 = vld [vmem:[%s6823_s15] sm:$0xff]   ;;  %s7978_s15 = scalar_lea.vmem [#allocation11], %s6716_s10 }
 0x6de   : > { %v3590_v57 = vsel %vm1731_vm9, %v3571_v49, %v3589_v29  ;;  %v1387_v49 = vld [vmem:[%s6796_s1] sm:$0xf]  ;;  %s7975_s1 = scalar_lea.vmem [#allocation8], %s6716_s10 }
 0x6df   : > { %v3549_v51 = vpop.permute.xlu0 %3548  ;;  %v3552_v61 = vpop.permute.xlu1 %3551  ;;  %v3591_v31 = vsel %vm1733_vm11, %v3575_v52, %v3590_v57  ;;  %v5614_v52 = vld [vmem:[%s6818_s8 + $0x8] sm:$0xff]   ;;  %v5615_v29 = vld [vmem:[%s6818_s8] sm:$0xff]   ;;  %s7977_s8 = scalar_lea.vmem [#allocation12], %s6716_s10 }
 0x6e0   : > { %v3579_v48 = vrot.slane %v3549_v51, %v6878_v23  ;;  %v3583_v62 = vrot.slane %v3552_v61, %v6878_v23 }
 0x6e2   : > { %v3592_v5 = vsel %vm1735_vm13, %v3579_v48, %v3591_v31  ;;  %v5161_v31 = vld [vmem:[%s7975_s1] ss:$0 sm:$0xff] }
 0x6e3   : > { %v3555_v56 = vpop.permute.xlu0 %3554  ;;  %v3597_v33 = vpop.permute.xlu1 %3596  ;;  %v3593_v35 = vsel %vm1737_vm14, %v3583_v62, %v3592_v5  ;;  %v5162_v5 = vld [vmem:[%s7976_s26] ss:$0 sm:$0xff] }
 0x6e4   : > { %v3587_v18 = vrot.slane %v3555_v56, %v6878_v23  ;;  %v3602_v19 = vsel %vm2028_vm0, %v3597_v33, 0 }
 0x6e5   : > { %5315 = vmatpush3.bf16.msra.mxu0 %v3602_v19  ;;  %v5167_v19 = vld [vmem:[%s7977_s8] ss:$0 sm:$0xff] }
 0x6e6   : > { %v3594_v22 = vsel %vm1739_vm15, %v3587_v18, %v3593_v35  ;;  %5328 = vmatprep.subr.bf16.mxu0 %v6278_v2 }
 0x6e7   : > { %v3595_v21 = vpack.c.b16 %v3594_v22, %v3594_v22 }
 0x6e9   : > { %5317 = vmatmul.mubr.msk.bf16.vlgmr.msra.gmra.mxu0 %vm1543_vm4, %v3595_v21 }
 0x6ea   : > { %5332 = vmatprep.mubr.msk.bf16.mxu0 %vm6279_vm1, %v6278_v2  ;;  %5329 = vmatpush3.bf16.msra.mxu0 %v5614_v52 }
 0x6eb   : > { %5330 = vmatprep.subr.bf16.mxu0 %v6278_v2 }
 0x6ee   : > { %5331 = vmatpush3.bf16.msra.mxu0 %v5615_v29 }
 0x6ef   : > { %5344 = vmatprep.subr.bf16.mxu0 %v6278_v2 }
 0x779   : > { %v2066_v3 = vpop.f32.mrf.mxu0 }
 0x77b   : > { %v5282_v58 = vpop.f32.mrf.mxu0 }
 0x77d   : > { %v2069_v1 = vpop.f32.mrf.mxu0 }
 0x77f   : > { %v5283_v23 = vpop.f32.mrf.mxu0 }
 0x789   : > { %v2590_v25 = vpop.f32.mrf.mxu0 }
 0x78a   : > { %3645 = vrot.lane.b32.xlu0 %v2590_v25, %s6292_s0  ;;  %v5163_v25 = vld [vmem:[%s7978_s15] ss:$0 sm:$0xff] }
 0x78b   : > { %v5294_v60 = vpop.f32.mrf.mxu0 }
 0x78d   : > { %v2593_v40 = vpop.f32.mrf.mxu0 }
 0x78f   : > { %v5295_v39 = vpop.f32.mrf.mxu0 }
 0x799   : > { %v3114_v46 = vpop.f32.mrf.mxu0 }
 0x79a   : > { %3649 = vrot.lane.b32.xlu1 %v3114_v46, %s6293_s24 }
 0x79b   : > { %v5306_v28 = vpop.f32.mrf.mxu0 }
 0x79d   : > { %v3117_v30 = vpop.f32.mrf.mxu0 }
 0x79e   : > { %3730 = vperm.xlu1 %5606, %v5718_v63  }
 0x79f   : > { %v5307_v54 = vpop.f32.mrf.mxu0 }
 0x7a9   : > { %v3638_v11 = vpop.f32.mrf.mxu0 }
 0x7aa   : > { %3653 = vrot.lane.b32.xlu0 %v3638_v11, %s6294_s22 }
 0x7ab   : > { %v5318_v8 = vpop.f32.mrf.mxu0 }
 0x7ad   : > { %v3641_v45 = vpop.f32.mrf.mxu0 }
 0x7af   : > { %v5319_v32 = vpop.f32.mrf.mxu0 }
 0x7fc   : > { %v3646_v16 = vpop.permute.xlu0 %3645 }
 0x7fd   : > { %v3656_v47 = vsel %vm1543_vm4, %v2066_v3, %v3646_v16 }
 0x80c   : > { %v3650_v20 = vpop.permute.xlu1 %3649 }
 0x80d   : > { %v3658_v4 = vsel %vm3657_vm3, %v3656_v47, %v3650_v20 }
 0x819   : > { %v7601_v42 = vpop.permute.xlu1 %3730 }
 0x81c   : > { %v3654_v50 = vpop.permute.xlu0 %3653 }
 0x81d   : > { %v3660_v6 = vsel %vm3659_vm6, %v3658_v4, %v3654_v50 }
 0x81e   : > { %v3661_v0 = vpack.c.bf16 %v3660_v6, %v3660_v6 }
 0x820   : > { %5325 = vmatmul.mubr.msk.bf16.vlgmr.msra.gmra.mxu1 %vm1495_vm2, %v3661_v0 }
 0x821   : > { %5340 = vmatprep.mubr.msk.bf16.mxu1 %vm6279_vm1, %v6278_v2  ;;  %5337 = vmatpush3.bf16.msra.mxu1 %v5612_v55 }
 0x822   : > { %5338 = vmatprep.subr.bf16.mxu1 %v6278_v2 }
 0x825   : > { %5339 = vmatpush3.bf16.msra.mxu1 %v5613_v53 }
 0x826   : > { %5350 = vmatprep.subr.bf16.mxu1 %v6278_v2 }
 0x828   : > { %5341 = vmatmul.mubr.msk.bf16.vlgmr.msra.gmra.mxu1 %vm1495_vm2, %v1387_v49 }
 0x829   : > { %5352 = vmatprep.mubr.msk.bf16.mxu1 %vm6279_vm1, %v6278_v2 }
 0x8e0   : > { %v3722_v37 = vpop.f32.mrf.mxu1 }
 0x8e1   : > { %v3723_v27 = vadd.f32 %v5157_v26, %v3722_v37 }
 0x8e2   : > { %v5326_v9 = vpop.f32.mrf.mxu1 }
 0x8e3   : > { %v3733_v10 = vmul.f32 %v7601_v42, %v3723_v27 }
 0x8e4   : > { %v3725_v15 = vpop.f32.mrf.mxu1 }
 0x8e5   : > { %v3734_v34 = vadd.f32 %v5719_v13, %v3733_v10 }
 0x8e6   : > { %v5327_v24 = vpop.f32.mrf.mxu1 }
 0x8e7   : > { %v3735_v12 = vsel %vm1495_vm2, %v3734_v34, 0.0 }
 0x8e8   : > { %3736 = vadd.xlane.f32.xlu0 %v3735_v12  ;;  %v3892_v35 = vpop.f32.mrf.mxu1 }
 0x8e9   : > { %v3893_v22 = vadd.f32 %v5167_v19, %v3892_v35 }
 0x8ea   : > { %v5342_v21 = vpop.f32.mrf.mxu1 }
 0x8eb   : > { %v7631_v3 = vpack.c.bf16 %v3893_v22, %v3893_v22 }
 0x8ec   : > { %v3895_v58 = vpop.f32.mrf.mxu1 }
 0x8ed   : > { %v3904_v1 = vsel %vm1543_vm4, %v7631_v3, 0 }
 0x8ee   : > { %v5343_v23 = vpop.f32.mrf.mxu1 }
 0x8fe   : > { %4017 = vrot.lane.b32.xlu0 %v7631_v3, %s6280_s18 }
 0x902   : > { %4128 = vrot.lane.b32.xlu0 %v7631_v3, %s6285_s16 }
 0x906   : > { %4239 = vrot.lane.b32.xlu0 %v7631_v3, %s6286_s28 }
 0x971   : > { %v3737_v36 = vpop.xlane.xlu0 %3736 }
 0x972   : > { %v3739_v7 = vmul.f32 0.03125, %v3737_v36 }
 0x974   : > { %v3740_v59 = vsub.f32 %v3734_v34, %v3739_v7 }
 0x975   : > { %v4018_v39 = vpop.permute.xlu0 %4017 }
 0x976   : > { %v3741_v38 = vmul.f32 %v3740_v59, %v3740_v59  ;;  %v4023_v28 = vsel %vm1543_vm4, %v4018_v39, 0 }
 0x978   : > { %v3742_v44 = vsel %vm1495_vm2, %v3741_v38, 0.0 }
 0x979   : > { %3743 = vadd.xlane.f32.xlu1 %v3742_v44  ;;  %v4129_v43 = vpop.permute.xlu0 %4128 }
 0x97a   : > { %v4134_v11 = vsel %vm1543_vm4, %v4129_v43, 0 }
 0x97d   : > { %v4240_v8 = vpop.permute.xlu0 %4239 }
 0x97e   : > { %v4245_v32 = vsel %vm1543_vm4, %v4240_v8, 0 }
 0xa02   : > { %v3744_v57 = vpop.xlane.xlu1 %3743 }
 0xa03   : > { %v3745_v51 = vmul.f32 0.03125, %v3744_v57 }
 0xa05   : > { %v3746_v61 = vadd.f32 1e-05, %v3745_v51 }
 0xa07   : > { %5696 = vrsqrt.f32 %v3746_v61 }
 0xa14   : > { %v5697_v48 = vpop.eup %5696 }
 0xa15   : > { %v3748_v62 = vmul.f32 %v5697_v48, %v3740_v59 }
 0xa17   : > { %v3756_v56 = vmul.f32 %v5161_v31, %v3748_v62 }
 0xa19   : > { %v7622_v33 = vadd.f32 %v5162_v5, %v3756_v56 }
 0xa1b   : > { %v3765_v18 = vpack.c.bf16 %v7622_v33, %v7622_v33 }
 0xa1d   : > { %5333 = vmatmul.mubr.msk.bf16.vlgmr.msra.gmra.mxu0 %vm1495_vm2, %v3765_v18 }
 0xa1e   : > { %5346 = vmatprep.mubr.msk.bf16.mxu0 %vm6279_vm1, %v6278_v2  ;;  %5345 = vmatpush3.bf16.xpose.msra.mxu0 %v3904_v1 }
 0xa1f   : > { %5356 = vmatprep.subr.bf16.mxu0 %v6278_v2 }
 0xadd   : > { %v3826_v60 = vpop.f32.mrf.mxu0 }
 0xade   : > { %v3827_v40 = vadd.f32 %v5163_v25, %v3826_v60 }
 0xadf   : > { %v5334_v41 = vpop.f32.mrf.mxu0 }
 0xae0   : > { %v3898_v46 = vpack.c.bf16 %v3827_v40, %v3827_v40 }
 0xae1   : > { %v3829_v30 = vpop.f32.mrf.mxu0 }
 0xae2   : > { %4015 = vrot.lane.b32.xlu1 %v3898_v46, %s6280_s18  ;;  %5347 = vmatmul.mubr.msk.bf16.vlgmr.msra.gmra.mxu0 %vm1543_vm4, %v3898_v46  ;;  %s7980_s18 = scalar_lea.vmem %s7979_s17, %s8019_s29  ;;  %s7983_s29 = scalar_lea.vmem [#allocation14], %s6716_s10 }
 0xae3   : > { %v5335_v63 = vpop.f32.mrf.mxu0  ;;  %5357 = vmatpush3.bf16.xpose.msra.mxu0 %v4023_v28  ;;  %5358 = vmatprep.mubr.msk.bf16.mxu0 %vm6279_vm1, %v6278_v2  ;;  %v1469_v20 = vld [vmem:[%s7980_s18] sm:$0x1] }
 0xae4   : > { %5368 = vmatprep.subr.bf16.mxu0 %v6278_v2  ;;  %vm1470_vm7 = vcmp.eq.f32.partialorder %v1469_v20, 0.0 }
 0xae5   : > { %v3946_v47 = vsel %vm1470_vm7, 1, %v6287_v14 }
 0xae6   : > { %4126 = vrot.lane.b32.xlu1 %v3898_v46, %s6285_s16  ;;  %v3950_v4 = vrot.slane %v3946_v47, %v6868_v17 }
 0xae8   : > { %vm7672_vm10 = vcmp.eq.s32.totalorder %v3950_v4, 1 }
 0xaea   : > { %4237 = vrot.lane.b32.xlu1 %v3898_v46, %s6286_s28 }
 0xb54   : > { %v4016_v54 = vpop.permute.xlu1 %4015 }
 0xb55   : > { %5359 = vmatmul.mubr.msk.bf16.vlgmr.msra.gmra.mxu0 %vm1543_vm4, %v4016_v54 }
 0xb56   : > { %5369 = vmatpush3.bf16.xpose.msra.mxu0 %v4134_v11  ;;  %5370 = vmatprep.mubr.msk.bf16.mxu0 %vm6279_vm1, %v6278_v2 }
 0xb57   : > { %5380 = vmatprep.subr.bf16.mxu0 %v6278_v2 }
 0xb58   : > { %v4127_v45 = vpop.permute.xlu1 %4126 }
 0xb5c   : > { %v4238_v16 = vpop.permute.xlu1 %4237 }
 0xb5d   : > { %5371 = vmatmul.mubr.msk.bf16.vlgmr.msra.gmra.mxu0 %vm1543_vm4, %v4127_v45 }
 0xb5e   : > { %5381 = vmatpush3.bf16.xpose.msra.mxu0 %v4245_v32  ;;  %5382 = vmatprep.mubr.msk.bf16.mxu0 %vm6279_vm1, %v6278_v2 }
 0xb5f   : > { %5392 = vmatprep.subr.bf16.mxu0 %v6278_v2 }
 0xb65   : > { %5383 = vmatmul.mubr.msk.bf16.vlgmr.msra.gmra.mxu0 %vm1543_vm4, %v4238_v16 }
 0xb66   : > { %5396 = vmatprep.mubr.msk.bf16.mxu0 %vm6279_vm1, %v6278_v2 }
 0xba2   : > { %v3940_v6 = vpop.f32.mrf.mxu0 }
 0xba3   : > { %v3952_v0 = vsel %vm7672_vm10, -1e+30, %v3940_v6 }
 0xba4   : > { %v3953_v26 = vsel %vm1543_vm4, %v3952_v0, -inf  ;;  %v5348_v37 = vpop.f32.mrf.mxu0 }
 0xba5   : > { %3954 = vmax.xlane.f32.xlu0 %v3953_v26 }
 0xba6   : > { %v3943_v27 = vpop.f32.mrf.mxu0 }
 0xba8   : > { %v5349_v9 = vpop.f32.mrf.mxu0 }
 0xc15   : > { %v4059_v10 = vpop.f32.mrf.mxu0 }
 0xc16   : > { %v4065_v14 = vsel %vm7672_vm10, -1e+30, %v4059_v10 }
 0xc17   : > { %v4066_v17 = vsel %vm1543_vm4, %v4065_v14, -inf  ;;  %v5360_v15 = vpop.f32.mrf.mxu0 }
 0xc18   : > { %4067 = vmax.xlane.f32.xlu1 %v4066_v17 }
 0xc19   : > { %v4062_v13 = vpop.f32.mrf.mxu0 }
 0xc1b   : > { %v5361_v34 = vpop.f32.mrf.mxu0 }
 0xc1c   : > { %v5616_v34 = vld [vmem:[%s6828_s21 + $0x8] sm:$0xff]  }
 0xc1d   : > { %v4170_v24 = vpop.f32.mrf.mxu0  ;;  %5393 = vmatpush3.bf16.msra.mxu0 %v5616_v34 }
 0xc1e   : > { %v4176_v12 = vsel %vm7672_vm10, -1e+30, %v4170_v24  ;;  %5394 = vmatprep.subr.bf16.mxu0 %v6278_v2 }
 0xc1f   : > { %v4177_v36 = vsel %vm1543_vm4, %v4176_v12, -inf  ;;  %v5372_v7 = vpop.f32.mrf.mxu0 }
 0xc20   : > { %4178 = vmax.xlane.f32.xlu0 %v4177_v36  ;;  %v5617_v7 = vld [vmem:[%s6828_s21] sm:$0xff]   ;;  %s7985_s21 = scalar_lea.vmem [#allocation17], %s6716_s10 }
 0xc21   : > { %v4173_v59 = vpop.f32.mrf.mxu0  ;;  %5395 = vmatpush3.bf16.msra.mxu0 %v5617_v7 }
 0xc22   : > { %5408 = vmatprep.subr.bf16.mxu0 %v6278_v2 }
 0xc23   : > { %v5373_v38 = vpop.f32.mrf.mxu0 }
 0xc25   : > { %v4281_v44 = vpop.f32.mrf.mxu0 }
 0xc26   : > { %v4287_v55 = vsel %vm7672_vm10, -1e+30, %v4281_v44 }
 0xc27   : > { %v4288_v53 = vsel %vm1543_vm4, %v4287_v55, -inf  ;;  %v5384_v49 = vpop.f32.mrf.mxu0 }
 0xc28   : > { %4289 = vmax.xlane.f32.xlu0 %v4288_v53 }
 0xc29   : > { %v4284_v52 = vpop.f32.mrf.mxu0 }
 0xc2b   : > { %v5385_v29 = vpop.f32.mrf.mxu0 }
 0xc2e   : > { %v3955_v57 = vpop.xlane.xlu0 %3954 }
 0xc2f   : > { %v3956_v51 = vsub.f32 %v3952_v0, %v3955_v57 }
 0xc31   : > { %v3957_v61 = vmul.f32 1.442695, %v3956_v51 }
 0xc33   : > { %5698 = vpow2.f32 %v3957_v61 }
 0xc40   : > { %v5699_v48 = vpop.eup %5698 }
 0xc41   : > { %v3959_v31 = vsel %vm1543_vm4, %v5699_v48, 0.0 }
 0xc42   : > { %3960 = vadd.xlane.f32.xlu1 %v3959_v31 }
 0xc53   : > { %3966 = vrot.lane.b32.xlu1 %v7631_v3, %s6281_s19  ;;  %s7986_s19 = scalar_lea.vmem [#allocation20], %s6716_s10 }
 0xca1   : > { %v4068_v62 = vpop.xlane.xlu1 %4067 }
 0xca2   : > { %v4069_v5 = vsub.f32 %v4065_v14, %v4068_v62 }
 0xca4   : > { %v4070_v56 = vmul.f32 1.442695, %v4069_v5 }
 0xca6   : > { %5700 = vpow2.f32 %v4070_v56 }
 0xca9   : > { %v4179_v18 = vpop.xlane.xlu0 %4178 }
 0xcaa   : > { %v4180_v19 = vsub.f32 %v4176_v12, %v4179_v18  ;;  %v5179_v18 = vld [vmem:[%s7983_s29] ss:$0 sm:$0xff] }
 0xcac   : > { %v4181_v35 = vmul.f32 1.442695, %v4180_v19 }
 0xcae   : > { %5702 = vpow2.f32 %v4181_v35 }
 0xcb1   : > { %v4290_v22 = vpop.xlane.xlu0 %4289 }
 0xcb2   : > { %v4291_v21 = vsub.f32 %v4287_v55, %v4290_v22 }
 0xcb3   : > { %v5701_v58 = vpop.eup %5700 }
 0xcb4   : > { %v4292_v1 = vmul.f32 1.442695, %v4291_v21  ;;  %v4072_v23 = vsel %vm1543_vm4, %v5701_v58, 0.0 }
 0xcb5   : > { %4073 = vadd.xlane.f32.xlu0 %v4072_v23 }
 0xcb6   : > { %5704 = vpow2.f32 %v4292_v1 }
 0xcbb   : > { %v5703_v25 = vpop.eup %5702 }
 0xcbc   : > { %v4183_v60 = vsel %vm1543_vm4, %v5703_v25, 0.0 }
 0xcbd   : > { %4184 = vadd.xlane.f32.xlu1 %v4183_v60 }
 0xcc3   : > { %v5705_v40 = vpop.eup %5704 }
 0xcc4   : > { %v4294_v41 = vsel %vm1543_vm4, %v5705_v40, 0.0 }
 0xcc5   : > { %4295 = vadd.xlane.f32.xlu0 %v4294_v41 }
 0xccb   : > { %v3961_v39 = vpop.xlane.xlu1 %3960 }
 0xccc   : > { %5706 = vrcp.f32 %v3961_v39 }
 0xcce   : > { %4189 = vrot.lane.b32.xlu1 %v7631_v3, %s6282_s20  ;;  %s7987_s20 = scalar_lea.vmem [#allocation21], %s6716_s10 }
 0xccf   : > { %v3967_v46 = vpop.permute.xlu1 %3966 }
 0xcd0   : > { %v3972_v28 = vsel %vm2028_vm0, %v3967_v46, 0 }
 0xcd1   : > { %5351 = vmatpush3.bf16.msra.mxu1 %v3972_v28  ;;  %v5618_v28 = vld [vmem:[%s6757_s25 + $0x8] sm:$0xff]  }
 0xcd2   : > { %4300 = vrot.lane.b32.xlu1 %v7631_v3, %s6284_s3  ;;  %5362 = vmatprep.subr.bf16.mxu1 %v6278_v2  ;;  %s7990_s3 = sld [smem:[#allocation40_spill]] }
 0xcd8   : > { %p5197_p3 = scmp.ne.s32.totalorder %s7990_s3, 1 }
 0xcd9   : > { %v5707_v30 = vpop.eup %5706 }
 0xcda   : > { %v3963_v63 = vmul.f32 %v5707_v30, %v5699_v48  ;;  %v5619_v30 = vld [vmem:[%s6757_s25] sm:$0xff]   ;;  %s7984_s25 = scalar_lea.vmem [#allocation15], %s6716_s10 }
 0xcdb   : > { %4078 = vrot.lane.b32.xlu0 %v7631_v3, %s6283_s30  ;;  %s7989_s30 = scalar_lea.vmem [#allocation24], %s6716_s10 }
 0xcdc   : > { %v3964_v43 = vpack.c.bf16 %v3963_v63, %v3963_v63  ;;  %v5621_v63 = vld [vmem:[%s6833_s4 + $0x10] sm:$0xff]  }
 0xcde   : > { %5353 = vmatmul.mubr.msk.bf16.vlgmr.msra.gmra.mxu1 %vm1543_vm4, %v3964_v43 }
 0xcdf   : > { %5364 = vmatprep.mubr.msk.bf16.mxu1 %vm6279_vm1, %v6278_v2 }
 0xd3e   : > { %v4074_v54 = vpop.xlane.xlu0 %4073 }
 0xd3f   : > { %5708 = vrcp.f32 %v4074_v54 }
 0xd46   : > { %v4185_v11 = vpop.xlane.xlu1 %4184 }
 0xd47   : > { %5710 = vrcp.f32 %v4185_v11 }
 0xd4a   : > { %v4190_v47 = vpop.permute.xlu1 %4189 }
 0xd4b   : > { %v4195_v50 = vsel %vm2028_vm0, %v4190_v47, 0 }
 0xd4c   : > { %v5709_v8 = vpop.eup %5708 }
 0xd4d   : > { %v4076_v32 = vmul.f32 %v5709_v8, %v5701_v58 }
 0xd4e   : > { %v4296_v45 = vpop.xlane.xlu0 %4295  ;;  %v4301_v0 = vpop.permute.xlu1 %4300 }
 0xd4f   : > { %5712 = vrcp.f32 %v4296_v45  ;;  %v4077_v3 = vpack.c.bf16 %v4076_v32, %v4076_v32  ;;  %v4306_v27 = vsel %vm2028_vm0, %v4301_v0, 0  ;;  %v5183_v45 = vld [vmem:[%s7984_s25] ss:$0 sm:$0xff] }
 0xd52   : > { %v4079_v16 = vpop.permute.xlu0 %4078 }
 0xd53   : > { %v4084_v20 = vsel %vm2028_vm0, %v4079_v16, 0  ;;  %v5184_v16 = vld [vmem:[%s7985_s21] ss:$0 sm:$0xff] }
 0xd54   : > { %5363 = vmatpush3.bf16.msra.mxu1 %v4084_v20  ;;  %v5711_v4 = vpop.eup %5710 }
 0xd55   : > { %5374 = vmatprep.subr.bf16.mxu1 %v6278_v2  ;;  %v4187_v6 = vmul.f32 %v5711_v4, %v5703_v25  ;;  %v5622_v4 = vld [vmem:[%s6833_s4 + $0x8] sm:$0xff]  }
 0xd57   : > { %5365 = vmatmul.mubr.msk.bf16.vlgmr.msra.gmra.mxu1 %vm1543_vm4, %v4077_v3  ;;  %v4188_v26 = vpack.c.bf16 %v4187_v6, %v4187_v6  ;;  %v5185_v6 = vld [vmem:[%s7986_s19] ss:$0 sm:$0xff] }
 0xd58   : > { %5375 = vmatpush3.bf16.msra.mxu1 %v4195_v50  ;;  %5376 = vmatprep.mubr.msk.bf16.mxu1 %vm6279_vm1, %v6278_v2  ;;  %v5623_v50 = vld [vmem:[%s6833_s4] sm:$0xff]  }
 0xd59   : > { %5386 = vmatprep.subr.bf16.mxu1 %v6278_v2 }
 0xd5c   : > { %v5713_v37 = vpop.eup %5712 }
 0xd5d   : > { %v4298_v9 = vmul.f32 %v5713_v37, %v5705_v40 }
 0xd5f   : > { %5377 = vmatmul.mubr.msk.bf16.vlgmr.msra.gmra.mxu1 %vm1543_vm4, %v4188_v26  ;;  %v4299_v10 = vpack.c.bf16 %v4298_v9, %v4298_v9 }
 0xd60   : > { %5387 = vmatpush3.bf16.msra.mxu1 %v4306_v27  ;;  %5388 = vmatprep.mubr.msk.bf16.mxu1 %vm6279_vm1, %v6278_v2 }
 0xd61   : > { %5400 = vmatprep.subr.bf16.mxu1 %v6278_v2 }
 0xd67   : > { %5389 = vmatmul.mubr.msk.bf16.vlgmr.msra.gmra.mxu1 %vm1543_vm4, %v4299_v10 }
 0xd68   : > { %5404 = vmatprep.mubr.msk.bf16.mxu1 %vm6279_vm1, %v6278_v2  ;;  %5401 = vmatpush3.bf16.msra.mxu1 %v5618_v28 }
 0xd69   : > { %5402 = vmatprep.subr.bf16.mxu1 %v6278_v2 }
 0xd6c   : > { %5403 = vmatpush3.bf16.msra.mxu1 %v5619_v30 }
 0xd9e   : > { %v4008_v14 = vpop.f32.mrf.mxu1 }
 0xda0   : > { %v5354_v17 = vpop.f32.mrf.mxu1 }
 0xda2   : > { %v4011_v15 = vpop.f32.mrf.mxu1 }
 0xda3   : > { %v5189_v15 = vld [vmem:[%s7987_s20] ss:$0 sm:$0xff] }
 0xda4   : > { %v5355_v13 = vpop.f32.mrf.mxu1 }
 0xe17   : > { %v4120_v24 = vpop.f32.mrf.mxu1 }
 0xe18   : > { %4349 = vrot.lane.b32.xlu0 %v4120_v24, %s6292_s0 }
 0xe19   : > { %v5366_v12 = vpop.f32.mrf.mxu1 }
 0xe1b   : > { %v4123_v36 = vpop.f32.mrf.mxu1 }
 0xe1d   : > { %v5367_v59 = vpop.f32.mrf.mxu1 }
 0xe1f   : > { %v4231_v38 = vpop.f32.mrf.mxu1 }
 0xe20   : > { %4353 = vrot.lane.b32.xlu1 %v4231_v38, %s6293_s24 }
 0xe21   : > { %v5378_v44 = vpop.f32.mrf.mxu1 }
 0xe23   : > { %v4234_v55 = vpop.f32.mrf.mxu1 }
 0xe25   : > { %v5379_v53 = vpop.f32.mrf.mxu1 }
 0xe27   : > { %v4342_v49 = vpop.f32.mrf.mxu1 }
 0xe28   : > { %4357 = vrot.lane.b32.xlu0 %v4342_v49, %s6294_s22 }
 0xe29   : > { %v5390_v52 = vpop.f32.mrf.mxu1 }
 0xe2b   : > { %v4345_v29 = vpop.f32.mrf.mxu1 }
 0xe2d   : > { %v5391_v57 = vpop.f32.mrf.mxu1 }
 0xe8a   : > { %v4350_v51 = vpop.permute.xlu0 %4349 }
 0xe8b   : > { %v4360_v48 = vsel %vm1543_vm4, %v4008_v14, %v4350_v51  ;;  %vm4571_vm4 = vcmask 523264  }
 0xe92   : > { %v4354_v61 = vpop.permute.xlu1 %4353 }
 0xe93   : > { %v4361_v31 = vsel %vm3657_vm3, %v4360_v48, %v4354_v61  ;;  %v5196_v48 = vld [vmem:[%s7989_s30] ss:$0 sm:$0xff] }
 0xe9a   : > { %v4358_v62 = vpop.permute.xlu0 %4357 }
 0xe9b   : > { %v4362_v5 = vsel %vm3659_vm6, %v4361_v31, %v4358_v62 }
 0xe9c   : > { %v4363_v56 = vpack.c.bf16 %v4362_v5, %v4362_v5 }
 0xe9e   : > { %5397 = vmatmul.mubr.msk.bf16.vlgmr.msra.gmra.mxu0 %vm1495_vm2, %v4363_v56 }
 0xe9f   : > { %5416 = vmatprep.mubr.msk.bf16.mxu0 %vm6279_vm1, %v6278_v2 }
 0xf5e   : > { %v4424_v19 = vpop.f32.mrf.mxu0 }
 0xf5f   : > { %v4425_v35 = vadd.f32 %v5179_v18, %v4424_v19 }
 0xf60   : > { %v5398_v22 = vpop.f32.mrf.mxu0 }
 0xf61   : > { %v4430_v21 = vmul.f32 %v4425_v35, %v7601_v42 }
 0xf62   : > { %v4427_v58 = vpop.f32.mrf.mxu0 }
 0xf63   : > { %v4431_v1 = vadd.f32 %v4430_v21, %v7622_v33  ;;  %v5620_v33 = vld [vmem:[%s6833_s4 + $0x18] sm:$0xff]   ;;  %s7988_s4 = scalar_lea.vmem [#allocation23], %s6716_s10 }
 0xf64   : > { %v5399_v23 = vpop.f32.mrf.mxu0  ;;  %5409 = vmatpush3.bf16.msra.mxu0 %v5620_v33  ;;  %v5195_v51 = vld [vmem:[%s7988_s4] ss:$0 sm:$0xff] }
 0xf65   : > { %v4432_v25 = vsel %vm1495_vm2, %v4431_v1, 0.0  ;;  %5410 = vmatprep.subr.bf16.mxu0 %v6278_v2 }
 0xf66   : > { %4433 = vadd.xlane.f32.xlu1 %v4432_v25 }
 0xf68   : > { %5411 = vmatpush3.bf16.msra.mxu0 %v5621_v63 }
 0xf69   : > { %5412 = vmatprep.subr.bf16.mxu0 %v6278_v2 }
 0xf6c   : > { %5413 = vmatpush3.bf16.msra.mxu0 %v5622_v4 }
 0xf6d   : > { %5414 = vmatprep.subr.bf16.mxu0 %v6278_v2 }
 0xf70   : > { %5415 = vmatpush3.bf16.msra.mxu0 %v5623_v50 }
 0xfef   : > { %v4434_v60 = vpop.xlane.xlu1 %4433 }
 0xff0   : > { %v4435_v40 = vmul.f32 0.03125, %v4434_v60 }
 0xff2   : > { %v4436_v41 = vsub.f32 %v4431_v1, %v4435_v40 }
 0xff4   : > { %v4437_v39 = vmul.f32 %v4436_v41, %v4436_v41 }
 0xff6   : > { %v4438_v46 = vsel %vm1495_vm2, %v4437_v39, 0.0 }
 0xff7   : > { %4439 = vadd.xlane.f32.xlu0 %v4438_v46 }
0x1080   : > { %v4440_v43 = vpop.xlane.xlu0 %4439 }
0x1081   : > { %v4441_v54 = vmul.f32 0.03125, %v4440_v43 }
0x1083   : > { %v4442_v11 = vadd.f32 1e-05, %v4441_v54 }
0x1085   : > { %5714 = vrsqrt.f32 %v4442_v11 }
0x1092   : > { %v5715_v8 = vpop.eup %5714 }
0x1093   : > { %v4444_v32 = vmul.f32 %v5715_v8, %v4436_v41 }
0x1095   : > { %v4452_v20 = vmul.f32 %v5183_v45, %v4444_v32 }
0x1097   : > { %v4460_v47 = vadd.f32 %v5184_v16, %v4452_v20 }
0x1099   : > { %v4461_v3 = vpack.c.bf16 %v4460_v47, %v4460_v47 }
0x109b   : > { %5405 = vmatmul.mubr.msk.bf16.vlgmr.msra.gmra.mxu1 %vm1495_vm2, %v4461_v3 }
0x115b   : > { %v4522_v0 = vpop.f32.mrf.mxu1 }
0x115c   : > { %v4523_v26 = vadd.f32 %v5185_v6, %v4522_v0 }
0x115d   : > { %v5406_v37 = vpop.f32.mrf.mxu1 }
0x115e   : > { %vm4528_vm1 = vcmp.gt.f32.partialorder %v4523_v26, 0.0  ;;  %v4529_v27 = vmul.f32 0.01, %v4523_v26 }
0x115f   : > { %v4525_v9 = vpop.f32.mrf.mxu1 }
0x1160   : > { %v4530_v10 = vsel %vm4528_vm1, %v4523_v26, %v4529_v27 }
0x1161   : > { %v4531_v14 = vpack.c.bf16 %v4530_v10, %v4530_v10  ;;  %v5407_v17 = vpop.f32.mrf.mxu1 }
0x1163   : > { %5417 = vmatmul.mubr.msk.bf16.vlgmr.msra.gmra.mxu0 %vm4571_vm4, %v4531_v14 }
0x1223   : > { %v4609_v13 = vpop.f32.mrf.mxu0 }
0x1224   : > { %v4610_v34 = vadd.f32 %v5189_v15, %v4609_v13 }
0x1225   : > { %v5418_v24 = vpop.f32.mrf.mxu0 }
0x1226   : > { %v4615_v2 = vmul.f32 %v4610_v34, %v7601_v42 }
0x1227   : > { %v4612_v12 = vpop.f32.mrf.mxu0 }
0x1228   : > { %v4616_v36 = vadd.f32 %v4615_v2, %v4460_v47 }
0x1229   : > { %v5419_v7 = vpop.f32.mrf.mxu0 }
0x122a   : > { %v4617_v59 = vsel %vm1495_vm2, %v4616_v36, 0.0 }
0x122b   : > { %4618 = vadd.xlane.f32.xlu0 %v4617_v59 }
0x12b4   : > { %v4619_v38 = vpop.xlane.xlu0 %4618 }
0x12b5   : > { %v4620_v44 = vmul.f32 0.03125, %v4619_v38 }
0x12b7   : > { %v4621_v55 = vsub.f32 %v4616_v36, %v4620_v44 }
0x12b9   : > { %v4622_v53 = vmul.f32 %v4621_v55, %v4621_v55 }
0x12bb   : > { %v4623_v49 = vsel %vm1495_vm2, %v4622_v53, 0.0 }
0x12bc   : > { %4624 = vadd.xlane.f32.xlu1 %v4623_v49 }
0x1345   : > { %v4625_v52 = vpop.xlane.xlu1 %4624 }
0x1346   : > { %v4626_v29 = vmul.f32 0.03125, %v4625_v52 }
0x1348   : > { %v4627_v57 = vadd.f32 1e-05, %v4626_v29 }
0x134a   : > { %5716 = vrsqrt.f32 %v4627_v57 }
0x1357   : > { %v5717_v42 = vpop.eup %5716 }
0x1358   : > { %v4629_v61 = vmul.f32 %v5717_v42, %v4621_v55 }
0x135a   : > { %v4637_v31 = vmul.f32 %v5195_v51, %v4629_v61  ;;  %4650 = sbr.rel (%p5197_p3) target bundleno = 4960 (0x1360), region = 180 }
0x135c   : > { %v4645_v62 = vadd.f32 %v5196_v48, %v4637_v31 }
0x135e   : > { %4646 = vst.msk [vmem:[#allocation2] sm:$0xff] %vm1495_vm2, %v4645_v62 }
0x135f   : > { %4651 = vst.msk [vmem:[%s1331_s13] sm:$0xff] %vm1495_vm2, %v4645_v62 }
0x1360 PF: > { %s7991_s16 = sld [smem:[#allocation41_spill]]  ;;  %s4666_s24 = sshll.u32 %s1331_s13, 4  ;;  %s4667_s24 = int_to_ptr.vmem [resolvable:$true] %s4666_s24 }
0x1361   : > { %s7992_s28 = sld [smem:[#allocation37_spill]]  ;;  %s6112_s1 = scalar_lea.vmem %s4667_s24, 128 }
0x1362   : > { %s7994_s11 = sld [smem:[#allocation76_spill]]  ;;  %p6113_p5 = scmp.ne.s32.totalorder %s4667_s24, %s6112_s1 }
0x1363   : > { %s6295_s26 = smov [#allocation26]  }
0x1364   : > { %p6114_p6 = pnand %p6113_p5, %p6513_p12  ;;  %s6116_s8 = sshll.u32 %s6295_s26, 4  ;;  %s6117_s8 = int_to_ptr.vmem [resolvable:$false] %s6116_s8 }
0x1365   : > { %s6118_s15 = scalar_lea.vmem %s6117_s8, 256  ;;  %p6119_p0 = scmp.lt.s32.totalorder %s4667_s24, %s6117_s8 }
0x1366   : > { %s5199_s27 = sshll.u32 %s7991_s16, 7  ;;  %p6115_p13 = pneg %p6114_p6 }
0x1367   : > { %s7995_s22 = sand.u32 1, %s7992_s28   ;;  %p6120_p1 = scmp.lt.s32.totalorder %s6118_s15, %s6112_s1 }
0x1368   : > { %s4664_s0 = scalar_lea.hbm %s7994_s11, %s5199_s27  ;;  %s4653_s5 = scalar_lea.sflag [#allocation5], %s7995_s22 }
0x1369   : > { %p6121_p9 = por %p6120_p1, %p6119_p0 }
0x136b   : > { %p6122_p10 = pnand %p6121_p9, %p6115_p13 }
0x136d   : > { %6125 = shalt.err (!%p6122_p10)
}
0x136e   : > { %s6126_s14 = scalar_lea.hbm %s4664_s0, 128  ;;  %s6130_s23 = scalar_lea.hbm %s7994_s11, 256 }
0x136f   : > { %p6127_p11 = scmp.ne.s32.totalorder %s4664_s0, %s6126_s14  ;;  %p6131_p8 = scmp.lt.s32.totalorder %s4664_s0, %s7994_s11 }
0x1370   : > { %p6132_p3 = scmp.lt.s32.totalorder %s6130_s23, %s6126_s14 }
0x1371   : > { %p6128_p4 = pnand %p6127_p11, %p6513_p12 }
0x1372   : > { %p6133_p5 = por %p6132_p3, %p6131_p8 }
0x1373   : > { %p6129_p7 = pneg %p6128_p4 }
0x1375   : > { %p6134_p6 = pnand %p6133_p5, %p6129_p7 }
0x1377   : > { %6137 = shalt.err (!%p6134_p6)
}
0x1378   : > { %5448 = dma.vmem_to_hbm [thread:$0]  (%p6513_p12), %s4667_s24, 128, %s4664_s0, %s4653_s5  }
0x1379 PF: > { %s7996_s29 = sld [smem:[#allocation43_spill]] }
0x137a   : > { %s7997_s25 = sld [smem:[#allocation36_spill]] }
0x137f   : > { %p5498_p13 = scmp.ge.s32.totalorder %s7996_s29, 2 }
0x1380   : > { %s4678_s19 = sand.u32 1, %s7997_s25  }
0x1381   : > { %p5494_p0 = pnand %p5498_p13, %p6523_p2  ;;  %s4679_s20 = scalar_lea.sflag [#allocation5], %s4678_s19 }
0x1383   : > { %p5495_p1 = pneg %p5494_p0 }
0x1385   : > { %6215 = dma.done.wait (%p5495_p1), %s4679_s20, 128  }
0x1386   : > { %6217 = vsyncadd (%p5495_p1), %s4679_s20, 4294967168  ;;  %s61_s3 = sadd.s32 1, %s7996_s29   ;;  %s7999_s5 = sld [smem:[#allocation37_spill]] }
0x1387   : > { %p58_p9 = scmp.ge.s32.totalorder %s61_s3, 6   ;;  %s8000_s26 = sld [smem:[#allocation38_spill]] }
0x1388   : > { %s8001_s27 = sld [smem:[#allocation49_spill]]  ;;  %s8007_s28 = smov %s6236_s6 }
0x1389   : > { %s8002_s4 = sld [smem:[#allocation39_spill]]  ;;  %s8009_s29 = smov %s6252_s7 }
0x138a   : > { %s8003_s2 = sld [smem:[#allocation47_spill]] }
0x138b   : > { %s8004_s0 = sld [smem:[#allocation42_spill]] }
0x138c   : > { %s8005_s30 = sld [smem:[#allocation45_spill]] }
0x138d   : > { %s8006_s16 = sld [smem:[#allocation46_spill]] }
0x138f   : > { %s8008_s6 = smov %s8002_s4  ;;  %60 = sbr.rel (!%p58_p9) target bundleno = 49 (0x31), region = 356 }
0x1392   : > { %s8010_s7 = smov %s8005_s30 }
0x1393   : > { %s8011_s30 = smov %s8006_s16 }
0x1394   :  { %4684 = vsyncpa [#allocation4], 1 }
0x1395   :  { %4686 = vsyncpa [#allocation4 + $0x1], 1 }
0x1396   :  { %4687 = vsyncpa [#allocation7], 1 }
0x1397   :  { %4689 = vsyncpa [#allocation7 + $0x1], 1 }
0x1398   :  { %4690 = vsyncpa [#allocation10], 1 }
0x1399   :  { %4692 = vsyncpa [#allocation10 + $0x1], 1 }
0x139a   :  { %4693 = vsyncpa [#allocation13], 1 }
0x139b   :  { %4695 = vsyncpa [#allocation13 + $0x1], 1 }
0x139c   :  { %4696 = vsyncpa [#allocation16], 1 }
0x139d   :  { %4698 = vsyncpa [#allocation16 + $0x1], 1 }
0x139e   :  { %4699 = vsyncpa [#allocation19], 1 }
0x139f   :  { %4701 = vsyncpa [#allocation19 + $0x1], 1 }
0x13a0   :  { %4702 = vsyncpa [#allocation22], 1 }
0x13a1   :  { %4704 = vsyncpa [#allocation22 + $0x1], 1 }
0x13a2   :  { %4705 = vsyncpa [#allocation25], 1 }
0x13a3   :  { %4707 = vsyncpa [#allocation25 + $0x1], 1 }
0x13a4   :  { %4708 = vsyncpa [#allocation5], 1 }
0x13a5   :  { %4710 = vsyncpa [#allocation5 + $0x1], 1 }

</bundles_post_ra>
